<compile_context>
chip_gen: v7x
topology: tpu7x:2x2x1
jax: 0.10.0
libtpu: 0.0.40
codegen_flags: <defaults>
</compile_context>

<pallas_src>
import jax
import jax.numpy as jnp
from jax.experimental import pallas as pl
from jax.experimental.pallas import tpu as pltpu


# --------------------------------------------------------------------------
# Kernel
# --------------------------------------------------------------------------
def _mlp_kernel(x_ref,
                w1, c1, w2, c2, w3, c3, w4, c4, w5, b5,
                out_ref):
    """Fused fc1..fc4 (eval-mode BN folded) + ReLU, plus fc5 as a lane reduction."""

    def layer(h, w_ref, c_ref):
        # bf16 x bf16 matmul on the MXU with f32 accumulation; the bias-add /
        # ReLU epilogue stays f32 (v5e VPU has no bf16 ALUs).
        z = jnp.dot(h.astype(w_ref.dtype), w_ref[...],
                    preferred_element_type=jnp.float32)
        return jnp.maximum(z + c_ref[...], 0.0)

    h = x_ref[...]                       # (block_b, D_in) bf16 (pre-cast on host)
    h = layer(h, w1, c1)                 # fc1 + bn1 + relu   (dropout = id in eval)
    h = layer(h, w2, c2)                 # fc2 + bn2 + relu
    h = layer(h, w3, c3)                 # fc3 + bn3 + relu
    h = layer(h, w4, c4)                 # fc4 + bn4 + relu
    # fc5 (out_features=1): VPU multiply + lane reduction instead of burning a
    # full MXU pass for a single output column.
    out_ref[...] = jnp.sum(h * w5[...], axis=-1, keepdims=True) + b5[...]


# --------------------------------------------------------------------------
# Block-size / VMEM heuristics
# --------------------------------------------------------------------------
def _choose_block_b(batch, max_block_b):
    """128-aligned rows/step, as few grid steps as possible, small tail pad."""
    if batch <= max_block_b:
        return max(128, pl.cdiv(batch, 128) * 128)
    n_steps = pl.cdiv(batch, max_block_b)
    return pl.cdiv(pl.cdiv(batch, n_steps), 128) * 128


def _vmem_estimate_bytes(block_b, d_in):
    """Rough VMEM footprint: double-buffered weights + per-row activations."""
    weights = 2 * 2 * (d_in * 128 + 128 * 256 + 256 * 512 + 512 * 128)   # bf16 x2 buf
    weights += 2 * 4 * (128 + 256 + 512 + 128 + 128 + 1)                 # f32 biases etc.
    per_row = (2 * 2 * d_in                      # bf16 x tile, double-buffered
               + 4 * (128 + 256 + 512 + 128)     # f32 hidden activations
               + 2 * (128 + 256 + 512)           # bf16 matmul-input copies
               + 2 * 4)                          # f32 output column, double-buffered
    return weights + block_b * per_row + (256 << 10)


# --------------------------------------------------------------------------
# Wrapper
# --------------------------------------------------------------------------
def strong_nn_forward(x, params, *, block_b=None, max_block_b=1024, min_steps=1):
    """x: (B, input_dim) float32.  params: folded kernel operands (see fold_params).

    block_b:     rows per grid step; default picks adaptively (multiple of 128,
                 capped at max_block_b) so the kernel is MXU-bound rather than
                 grid-step-overhead-bound.
    min_steps:   set to 2 (or more) on v7x for moderate batches so the
                 "parallel" batch grid can feed both TensorCores.
    """
    B, D = x.shape
    if block_b is None:
        block_b = _choose_block_b(B, max_block_b)
        if min_steps > 1:
            block_b = min(block_b,
                          max(128, pl.cdiv(pl.cdiv(B, min_steps), 128) * 128))

    b_pad = pl.cdiv(B, block_b) * block_b
    x = x.astype(jnp.bfloat16)           # halve x DMA; no per-step layer-1 cast
    if b_pad != B:
        # Small 128-aligned tail pad (padded rows are sliced off below); fuses
        # with the bf16 cast, so no full extra f32 HBM pass over x.
        x = jnp.pad(x, ((0, b_pad - B), (0, 0)))
    grid = (b_pad // block_b,)

    def resident(p):
        # Full-array block whose block index never changes -> stays VMEM-resident
        # across grid steps (no per-step re-DMA of weights/biases).
        return pl.BlockSpec(p.shape, lambda i: (0, 0))

    in_specs = [pl.BlockSpec((block_b, D), lambda i: (i, 0))]
    in_specs += [resident(p) for p in params]
    out_specs = pl.BlockSpec((block_b, 1), lambda i: (i, 0))

    # Only raise the scoped VMEM limit if a caller-requested block_b needs it;
    # budget against v7x's 64 MiB physical VMEM per TensorCore.
    est = _vmem_estimate_bytes(block_b, D)
    vmem_limit = None
    if est > (30 << 20):
        vmem_limit = min(int(est * 1.25), 64 << 20)

    out = pl.pallas_call(
        _mlp_kernel,
        out_shape=jax.ShapeDtypeStruct((b_pad, 1), jnp.float32),
        grid=grid,
        in_specs=in_specs,
        out_specs=out_specs,
        compiler_params=pltpu.CompilerParams(
            dimension_semantics=("parallel",),
            vmem_limit_bytes=vmem_limit),
    )(x, *params)
    return out[:B]


# --------------------------------------------------------------------------
# Parameters (synthetic, deterministic) + host-side BN folding
# --------------------------------------------------------------------------
def make_raw_params(key, input_dim):
    """Raw module-style params: Linear (w, b) + BN (gamma, beta, rmean, rvar)."""
    dims = [input_dim, 128, 256, 512, 128, 1]
    keys = jax.random.split(key, 32)
    ki = 0
    raw = []
    for li in range(5):
        fin, fout = dims[li], dims[li + 1]
        layer = {
            "w": 0.05 * jax.random.normal(keys[ki], (fin, fout), jnp.float32),
            "b": 0.01 * jax.random.normal(keys[ki + 1], (1, fout), jnp.float32),
        }
        ki += 2
        if li < 4:  # BN after fc1..fc4 only
            layer["gamma"] = 1.0 + 0.1 * jax.random.normal(keys[ki], (1, fout), jnp.float32)
            layer["beta"] = 0.05 * jax.random.normal(keys[ki + 1], (1, fout), jnp.float32)
            layer["rmean"] = 0.1 * jax.random.normal(keys[ki + 2], (1, fout), jnp.float32)
            layer["rvar"] = 1.0 + 0.1 * jax.random.uniform(keys[ki + 3], (1, fout), jnp.float32)
            ki += 4
        raw.append(layer)
    return raw


def fold_params(raw, weight_dtype=jnp.bfloat16, eps=1e-5):
    """Fold eval-mode BN into each Linear; cast hidden weights to bf16."""
    folded = []
    for li, layer in enumerate(raw):
        w, b = layer["w"], layer["b"]
        if li < 4:
            scale = layer["gamma"] / jnp.sqrt(layer["rvar"] + eps)   # (1, fout)
            shift = layer["beta"] - layer["rmean"] * scale
            w_f = (w * scale).astype(weight_dtype)    # per-column scale into W
            c = b * scale + shift                     # f32 fused bias + shift
            folded += [w_f, c]
        else:
            # fc5: (128, 1) -> (1, 128) row for the in-kernel lane reduction.
            folded += [w.T.astype(jnp.float32), b.reshape(1, 1)]
    return tuple(folded)


# --------------------------------------------------------------------------
# References
# --------------------------------------------------------------------------
def reference_folded(x, params):
    """Plain-JAX reference using the identical fold / bf16 precision recipe."""
    w1, c1, w2, c2, w3, c3, w4, c4, w5, b5 = params
    h = x.astype(jnp.bfloat16)
    for w, c in [(w1, c1), (w2, c2), (w3, c3), (w4, c4)]:
        z = jnp.dot(h.astype(w.dtype), w, preferred_element_type=jnp.float32)
        h = jnp.maximum(z + c, 0.0)
    return jnp.sum(h * w5, axis=-1, keepdims=True) + b5


def reference_module(x, raw, eps=1e-5):
    """Unfolded f32 eval-mode semantics of the original PyTorch module."""
    h = x
    for li, layer in enumerate(raw):
        h = h @ layer["w"] + layer["b"]
        if li < 4:
            h = (h - layer["rmean"]) / jnp.sqrt(layer["rvar"] + eps) \
                * layer["gamma"] + layer["beta"]
            h = jnp.maximum(h, 0.0)      # dropout = identity in eval mode
    return h


# --------------------------------------------------------------------------
# Demo / correctness check
# --------------------------------------------------------------------------
if __name__ == "__main__":
    key = jax.random.PRNGKey(0)
    k_x, k_p = jax.random.split(key)

    batch, input_dim = 300, 32
    x = jax.random.normal(k_x, (batch, input_dim), jnp.float32)

    raw = make_raw_params(k_p, input_dim)
    params = fold_params(raw)

    # Default adaptive path: single 384-row block (small 84-row tail pad).
    out = jax.block_until_ready(strong_nn_forward(x, params))
    assert out.shape == (batch, 1)

    # Multi-step grid path (3 steps of 128 rows) must agree with it.
    out_multi = jax.block_until_ready(strong_nn_forward(x, params, block_b=128))
    assert jnp.allclose(out, out_multi, atol=1e-5, rtol=1e-5), "block-size mismatch"

    # Check vs a reference using the identical fold / bf16 recipe.
    ref_f = reference_folded(x, params)
    assert jnp.allclose(out, ref_f, atol=1e-3, rtol=1e-3), "mismatch vs folded reference"

    # Semantic check vs the unfolded f32 module math (tolerance covers bf16
    # weights + bf16 activations).
    ref_m = reference_module(x, raw)
    assert jnp.allclose(out, ref_m, atol=2e-2, rtol=5e-2), "mismatch vs module reference"

    print("KERNEL_OK")
</pallas_src>

<mosaic_0001>
module attributes {stable_mosaic.version = 11 : i64} {
  func.func @_mlp_kernel(%arg0: i32, %arg1: memref<384x32xbf16, #tpu.memory_space<vmem>>, %arg2: memref<32x128xbf16, #tpu.memory_space<vmem>>, %arg3: memref<1x128xf32, #tpu.memory_space<vmem>>, %arg4: memref<128x256xbf16, #tpu.memory_space<vmem>>, %arg5: memref<1x256xf32, #tpu.memory_space<vmem>>, %arg6: memref<256x512xbf16, #tpu.memory_space<vmem>>, %arg7: memref<1x512xf32, #tpu.memory_space<vmem>>, %arg8: memref<512x128xbf16, #tpu.memory_space<vmem>>, %arg9: memref<1x128xf32, #tpu.memory_space<vmem>>, %arg10: memref<1x128xf32, #tpu.memory_space<vmem>>, %arg11: memref<1x1xf32, #tpu.memory_space<vmem>>, %arg12: memref<384x1xf32, #tpu.memory_space<vmem>>) attributes {dimension_semantics = [#tpu.dimension_semantics<parallel>], iteration_bounds = array<i64: 1>, scalar_prefetch = 0 : i64, scratch_operands = 0 : i64, tpu.core_type = #tpu.core_type<tc>, window_params = [{transform_indices = @transform_0, window_bounds = array<i64: 384, 32>}, {pipeline_mode = #tpu.pipeline_mode<synchronous>, transform_indices = @transform_1, window_bounds = array<i64: 32, 128>}, {pipeline_mode = #tpu.pipeline_mode<synchronous>, transform_indices = @transform_2, window_bounds = array<i64: 1, 128>}, {pipeline_mode = #tpu.pipeline_mode<synchronous>, transform_indices = @transform_3, window_bounds = array<i64: 128, 256>}, {pipeline_mode = #tpu.pipeline_mode<synchronous>, transform_indices = @transform_4, window_bounds = array<i64: 1, 256>}, {pipeline_mode = #tpu.pipeline_mode<synchronous>, transform_indices = @transform_5, window_bounds = array<i64: 256, 512>}, {pipeline_mode = #tpu.pipeline_mode<synchronous>, transform_indices = @transform_6, window_bounds = array<i64: 1, 512>}, {pipeline_mode = #tpu.pipeline_mode<synchronous>, transform_indices = @transform_7, window_bounds = array<i64: 512, 128>}, {pipeline_mode = #tpu.pipeline_mode<synchronous>, transform_indices = @transform_8, window_bounds = array<i64: 1, 128>}, {pipeline_mode = #tpu.pipeline_mode<synchronous>, transform_indices = @transform_9, window_bounds = array<i64: 1, 128>}, {pipeline_mode = #tpu.pipeline_mode<synchronous>, transform_indices = @transform_10, window_bounds = array<i64: 1, 1>}, {transform_indices = @transform_11, window_bounds = array<i64: 384, 1>}]} {
    %c0 = arith.constant 0 : index
    %c0_0 = arith.constant 0 : index
    %0 = vector.load %arg1[%c0, %c0_0] : memref<384x32xbf16, #tpu.memory_space<vmem>>, vector<384x32xbf16>
    %c0_1 = arith.constant 0 : index
    %c0_2 = arith.constant 0 : index
    %1 = vector.load %arg2[%c0_1, %c0_2] : memref<32x128xbf16, #tpu.memory_space<vmem>>, vector<32x128xbf16>
    %cst = arith.constant dense<0.000000e+00> : vector<384x128xf32>
    %2 = tpu.matmul %0, %1, %cst {dimension_numbers = #tpu.dot_dimension_numbers<[1], [0], [0], [1], [0, 0, 1, 1], [], []>} : vector<384x32xbf16>, vector<32x128xbf16>, vector<384x128xf32> -> vector<384x128xf32>
    %c0_3 = arith.constant 0 : index
    %c0_4 = arith.constant 0 : index
    %3 = vector.load %arg3[%c0_3, %c0_4] : memref<1x128xf32, #tpu.memory_space<vmem>>, vector<1x128xf32>
    %4 = vector.broadcast %3 : vector<1x128xf32> to vector<384x128xf32>
    %5 = arith.addf %2, %4 : vector<384x128xf32>
    %cst_5 = arith.constant 0.000000e+00 : f32
    %6 = vector.broadcast %cst_5 : f32 to vector<384x128xf32>
    %7 = arith.maximumf %5, %6 : vector<384x128xf32>
    %8 = arith.truncf %7 : vector<384x128xf32> to vector<384x128xbf16>
    %c0_6 = arith.constant 0 : index
    %c0_7 = arith.constant 0 : index
    %9 = vector.load %arg4[%c0_6, %c0_7] : memref<128x256xbf16, #tpu.memory_space<vmem>>, vector<128x256xbf16>
    %cst_8 = arith.constant dense<0.000000e+00> : vector<384x256xf32>
    %10 = tpu.matmul %8, %9, %cst_8 {dimension_numbers = #tpu.dot_dimension_numbers<[1], [0], [0], [1], [0, 0, 1, 1], [], []>} : vector<384x128xbf16>, vector<128x256xbf16>, vector<384x256xf32> -> vector<384x256xf32>
    %c0_9 = arith.constant 0 : index
    %c0_10 = arith.constant 0 : index
    %11 = vector.load %arg5[%c0_9, %c0_10] : memref<1x256xf32, #tpu.memory_space<vmem>>, vector<1x256xf32>
    %12 = vector.broadcast %11 : vector<1x256xf32> to vector<384x256xf32>
    %13 = arith.addf %10, %12 : vector<384x256xf32>
    %cst_11 = arith.constant 0.000000e+00 : f32
    %14 = vector.broadcast %cst_11 : f32 to vector<384x256xf32>
    %15 = arith.maximumf %13, %14 : vector<384x256xf32>
    %16 = arith.truncf %15 : vector<384x256xf32> to vector<384x256xbf16>
    %c0_12 = arith.constant 0 : index
    %c0_13 = arith.constant 0 : index
    %17 = vector.load %arg6[%c0_12, %c0_13] : memref<256x512xbf16, #tpu.memory_space<vmem>>, vector<256x512xbf16>
    %cst_14 = arith.constant dense<0.000000e+00> : vector<384x512xf32>
    %18 = tpu.matmul %16, %17, %cst_14 {dimension_numbers = #tpu.dot_dimension_numbers<[1], [0], [0], [1], [0, 0, 1, 1], [], []>} : vector<384x256xbf16>, vector<256x512xbf16>, vector<384x512xf32> -> vector<384x512xf32>
    %c0_15 = arith.constant 0 : index
    %c0_16 = arith.constant 0 : index
    %19 = vector.load %arg7[%c0_15, %c0_16] : memref<1x512xf32, #tpu.memory_space<vmem>>, vector<1x512xf32>
    %20 = vector.broadcast %19 : vector<1x512xf32> to vector<384x512xf32>
    %21 = arith.addf %18, %20 : vector<384x512xf32>
    %cst_17 = arith.constant 0.000000e+00 : f32
    %22 = vector.broadcast %cst_17 : f32 to vector<384x512xf32>
    %23 = arith.maximumf %21, %22 : vector<384x512xf32>
    %24 = arith.truncf %23 : vector<384x512xf32> to vector<384x512xbf16>
    %c0_18 = arith.constant 0 : index
    %c0_19 = arith.constant 0 : index
    %25 = vector.load %arg8[%c0_18, %c0_19] : memref<512x128xbf16, #tpu.memory_space<vmem>>, vector<512x128xbf16>
    %cst_20 = arith.constant dense<0.000000e+00> : vector<384x128xf32>
    %26 = tpu.matmul %24, %25, %cst_20 {dimension_numbers = #tpu.dot_dimension_numbers<[1], [0], [0], [1], [0, 0, 1, 1], [], []>} : vector<384x512xbf16>, vector<512x128xbf16>, vector<384x128xf32> -> vector<384x128xf32>
    %c0_21 = arith.constant 0 : index
    %c0_22 = arith.constant 0 : index
    %27 = vector.load %arg9[%c0_21, %c0_22] : memref<1x128xf32, #tpu.memory_space<vmem>>, vector<1x128xf32>
    %28 = vector.broadcast %27 : vector<1x128xf32> to vector<384x128xf32>
    %29 = arith.addf %26, %28 : vector<384x128xf32>
    %cst_23 = arith.constant 0.000000e+00 : f32
    %30 = vector.broadcast %cst_23 : f32 to vector<384x128xf32>
    %31 = arith.maximumf %29, %30 : vector<384x128xf32>
    %c0_24 = arith.constant 0 : index
    %c0_25 = arith.constant 0 : index
    %32 = vector.load %arg10[%c0_24, %c0_25] : memref<1x128xf32, #tpu.memory_space<vmem>>, vector<1x128xf32>
    %33 = vector.broadcast %32 : vector<1x128xf32> to vector<384x128xf32>
    %34 = arith.mulf %31, %33 : vector<384x128xf32>
    %cst_26 = arith.constant dense<0.000000e+00> : vector<384xf32>
    %35 = vector.multi_reduction <add>, %34, %cst_26 [1] : vector<384x128xf32> to vector<384xf32>
    %36 = vector.shape_cast %35 : vector<384xf32> to vector<384x1xf32>
    %c0_27 = arith.constant 0 : index
    %c0_28 = arith.constant 0 : index
    %37 = vector.load %arg11[%c0_27, %c0_28] : memref<1x1xf32, #tpu.memory_space<vmem>>, vector<1x1xf32>
    %38 = vector.broadcast %37 : vector<1x1xf32> to vector<384x1xf32>
    %39 = arith.addf %36, %38 : vector<384x1xf32>
    %c0_29 = arith.constant 0 : index
    %c0_30 = arith.constant 0 : index
    %40 = vector.load %arg12[%c0_29, %c0_30] : memref<384x1xf32, #tpu.memory_space<vmem>>, vector<384x1xf32>
    tpu.vector_store %arg12[%c0_29, %c0_30], %39 {strides = array<i32>} : memref<384x1xf32, #tpu.memory_space<vmem>>, vector<384x1xf32>,
    return
  }
  func.func @transform_0(%arg0: i32) -> (i32, i32) {
    %c0_i32 = arith.constant 0 : i32
    %c0_i32_0 = arith.constant 0 : i32
    return %arg0, %c0_i32 : i32, i32
  }
  func.func @transform_1(%arg0: i32) -> (i32, i32) {
    %c0_i32 = arith.constant 0 : i32
    %c0_i32_0 = arith.constant 0 : i32
    %c0_i32_1 = arith.constant 0 : i32
    return %c0_i32, %c0_i32_0 : i32, i32
  }
  func.func @transform_2(%arg0: i32) -> (i32, i32) {
    %c0_i32 = arith.constant 0 : i32
    %c0_i32_0 = arith.constant 0 : i32
    %c0_i32_1 = arith.constant 0 : i32
    return %c0_i32, %c0_i32_0 : i32, i32
  }
  func.func @transform_3(%arg0: i32) -> (i32, i32) {
    %c0_i32 = arith.constant 0 : i32
    %c0_i32_0 = arith.constant 0 : i32
    %c0_i32_1 = arith.constant 0 : i32
    return %c0_i32, %c0_i32_0 : i32, i32
  }
  func.func @transform_4(%arg0: i32) -> (i32, i32) {
    %c0_i32 = arith.constant 0 : i32
    %c0_i32_0 = arith.constant 0 : i32
    %c0_i32_1 = arith.constant 0 : i32
    return %c0_i32, %c0_i32_0 : i32, i32
  }
  func.func @transform_5(%arg0: i32) -> (i32, i32) {
    %c0_i32 = arith.constant 0 : i32
    %c0_i32_0 = arith.constant 0 : i32
    %c0_i32_1 = arith.constant 0 : i32
    return %c0_i32, %c0_i32_0 : i32, i32
  }
  func.func @transform_6(%arg0: i32) -> (i32, i32) {
    %c0_i32 = arith.constant 0 : i32
    %c0_i32_0 = arith.constant 0 : i32
    %c0_i32_1 = arith.constant 0 : i32
    return %c0_i32, %c0_i32_0 : i32, i32
  }
  func.func @transform_7(%arg0: i32) -> (i32, i32) {
    %c0_i32 = arith.constant 0 : i32
    %c0_i32_0 = arith.constant 0 : i32
    %c0_i32_1 = arith.constant 0 : i32
    return %c0_i32, %c0_i32_0 : i32, i32
  }
  func.func @transform_8(%arg0: i32) -> (i32, i32) {
    %c0_i32 = arith.constant 0 : i32
    %c0_i32_0 = arith.constant 0 : i32
    %c0_i32_1 = arith.constant 0 : i32
    return %c0_i32, %c0_i32_0 : i32, i32
  }
  func.func @transform_9(%arg0: i32) -> (i32, i32) {
    %c0_i32 = arith.constant 0 : i32
    %c0_i32_0 = arith.constant 0 : i32
    %c0_i32_1 = arith.constant 0 : i32
    return %c0_i32, %c0_i32_0 : i32, i32
  }
  func.func @transform_10(%arg0: i32) -> (i32, i32) {
    %c0_i32 = arith.constant 0 : i32
    %c0_i32_0 = arith.constant 0 : i32
    %c0_i32_1 = arith.constant 0 : i32
    return %c0_i32, %c0_i32_0 : i32, i32
  }
  func.func @transform_11(%arg0: i32) -> (i32, i32) {
    %c0_i32 = arith.constant 0 : i32
    %c0_i32_0 = arith.constant 0 : i32
    return %arg0, %c0_i32 : i32, i32
  }
}

</mosaic_0001>

<bundles_post_ra>
// kernel: tpu_custom_call.1
= control target key start
LH: loop header
LB: loop body
LE: loop exit
PB: predicated region body
PF: predicated region fallthrough
CT: control target
= control target key end

     0   :  { %s5426_s0 = inlined_call_operand.vmem [shape: bf16[384,32], index: 0, kind: input, shape index: {}]   ;;  %s5427_s1 = inlined_call_operand.hbm [shape: bf16[32,128], index: 1, kind: input, shape index: {}]   ;;  %s5428_s2 = inlined_call_operand.vmem [shape: f32[1,128], index: 2, kind: input, shape index: {}]   ;;  %s5429_s3 = inlined_call_operand.hbm [shape: bf16[128,256], index: 3, kind: input, shape index: {}]   ;;  %s5430_s4 = inlined_call_operand.vmem [shape: f32[1,256], index: 4, kind: input, shape index: {}]   ;;  %s5431_s5 = inlined_call_operand.hbm [shape: bf16[256,512], index: 5, kind: input, shape index: {}]   ;;  %s5432_s6 = inlined_call_operand.vmem [shape: f32[1,512], index: 6, kind: input, shape index: {}]   ;;  %s5433_s7 = inlined_call_operand.vmem [shape: bf16[512,128], index: 7, kind: input, shape index: {}]   ;;  %s5434_s8 = inlined_call_operand.vmem [shape: f32[1,128], index: 8, kind: input, shape index: {}]   ;;  %s5435_s9 = inlined_call_operand.vmem [shape: f32[1,128], index: 9, kind: input, shape index: {}]   ;;  %s5436_s10 = inlined_call_operand.<no memory space> [shape: f32[1,1], index: 10, kind: input, shape index: {}]   ;;  %s5437_s11 = inlined_call_operand.vmem [shape: f32[384,1], index: 11, kind: output, shape index: {}]  }
   0x1   :  { %v16_v0 = vstv %s5436_s10 }
   0x2   :  { %17 = vst [vmem:[#allocation2] sm:$0x1] %v16_v0 }
   0x3   :  { %18 = vsyncpa [#allocation4], 0 }
   0x4   :  { %19 = vsyncpa [#allocation6], 0  ;;  %s4108_s19 = smov [#allocation5]   ;;  %s4038_s23 = scalar_lea.hbm %s5429_s3, 2048 }
   0x5   :  { %s41_s20 = sshll.u32 %s4108_s19, 4  ;;  %p4039_p0 = scmp.ne.s32.totalorder %s5429_s3, %s4038_s23  ;;  %s42_s20 = int_to_ptr.vmem [resolvable:$true] %s41_s20 }
   0x6   :  { %p4042_p1 = scmp.lt.u32.totalorder %s4038_s23, %s5429_s3 }
   0x8   :  { %p4044_p2 = pnand %p4042_p1, %p4039_p0 }
   0xa   :  { %4047 = shalt.err (!%p4044_p2)
}
   0xb   :  { %s4048_s10 = scalar_lea.vmem %s42_s20, 2048  ;;  %p4053_p4 = scmp.lt.s32.totalorder %s42_s20, %s42_s20 }
   0xc   :  { %p4049_p3 = scmp.ne.s32.totalorder %s42_s20, %s4048_s10  ;;  %p4054_p5 = scmp.lt.s32.totalorder %s4048_s10, %s4048_s10 }
   0xe   :  { %p4055_p6 = por %p4054_p5, %p4053_p4 }
  0x10   :  { %p4056_p7 = pnand %p4055_p6, %p4049_p3 }
  0x12   :  { %4059 = shalt.err (!%p4056_p7)
}
  0x13   :  { %s4109_s28 = smov 128   ;;  %s4110_s29 = smov 8  }
  0x14   :  { %47 = dma.hbm_to_vmem [thread:$0]  %s5429_s3, 2048, %s42_s20, [#allocation6], %s4109_s28, %s4109_s28, %s4110_s29  }
  0x15   :  { %s4111_s13 = smov [#allocation3]   ;;  %s4060_s17 = scalar_lea.hbm %s5427_s1, 256 }
  0x16   :  { %s27_s14 = sshll.u32 %s4111_s13, 4  ;;  %p4061_p8 = scmp.ne.s32.totalorder %s5427_s1, %s4060_s17  ;;  %s28_s14 = int_to_ptr.vmem [resolvable:$true] %s27_s14 }
  0x17   :  { %p4064_p9 = scmp.lt.u32.totalorder %s4060_s17, %s5427_s1 }
  0x19   :  { %p4066_p10 = pnand %p4064_p9, %p4061_p8 }
  0x1b   :  { %4069 = shalt.err (!%p4066_p10)
}
  0x1c   :  { %s4070_s23 = scalar_lea.vmem %s28_s14, 256  ;;  %p4075_p12 = scmp.lt.s32.totalorder %s28_s14, %s28_s14 }
  0x1d   :  { %p4071_p11 = scmp.ne.s32.totalorder %s28_s14, %s4070_s23  ;;  %p4076_p13 = scmp.lt.s32.totalorder %s4070_s23, %s4070_s23 }
  0x1f   :  { %p4077_p0 = por %p4076_p13, %p4075_p12 }
  0x21   :  { %p4078_p1 = pnand %p4077_p0, %p4071_p11 }
  0x23   :  { %4081 = shalt.err (!%p4078_p1)
}
  0x24   :  { %s4112_s3 = smov 64   ;;  %s4113_s20 = smov 4  }
  0x25   :  { %33 = dma.hbm_to_vmem [thread:$0]  %s5427_s1, 256, %s28_s14, [#allocation4], %s4112_s3, %s4112_s3, %s4113_s20  }
  0x26   :  { %s4114_s26 = smov [#allocation7]   ;;  %s4082_s29 = scalar_lea.hbm %s5431_s5, 8192 }
  0x27   :  { %s55_s27 = sshll.u32 %s4114_s26, 4  ;;  %p4083_p2 = scmp.ne.s32.totalorder %s5431_s5, %s4082_s29  ;;  %s56_s27 = int_to_ptr.vmem [resolvable:$true] %s55_s27 }
  0x28   :  { %p4086_p3 = scmp.lt.u32.totalorder %s4082_s29, %s5431_s5 }
  0x2a   :  { %p4088_p4 = pnand %p4086_p3, %p4083_p2 }
  0x2c   :  { %4091 = shalt.err (!%p4088_p4)
}
  0x2d   :  { %s4092_s16 = scalar_lea.vmem %s56_s27, 8192  ;;  %p4097_p6 = scmp.lt.s32.totalorder %s56_s27, %s56_s27 }
  0x2e   :  { %p4093_p5 = scmp.ne.s32.totalorder %s56_s27, %s4092_s16  ;;  %p4098_p7 = scmp.lt.s32.totalorder %s4092_s16, %s4092_s16 }
  0x30   :  { %p4099_p8 = por %p4098_p7, %p4097_p6 }
  0x32   :  { %p4100_p9 = pnand %p4099_p8, %p4093_p5 }
  0x34   :  { %4103 = shalt.err (!%p4100_p9)
}
  0x35   :  { %s4115_s1 = smov 256   ;;  %s4116_s14 = smov 16  }
  0x36   :  { %61 = dma.hbm_to_vmem [thread:$0]  %s5431_s5, 8192, %s56_s27, [#allocation6], %s4115_s1, %s4115_s1, %s4116_s14  }
  0x37   :  { %4104 = dma.done.wait [#allocation4], 256  }
  0x38   :  { %4105 = vsyncadd [#allocation4], 4294967040 }
  0x39   :  { %4106 = dma.done.wait [#allocation6], 10240  }
  0x3a   :  { %4107 = vsyncadd [#allocation6], 4294957056  ;;  %v3860_v1 = vld [vmem:[#allocation3] sm:$0xff]   ;;  %v3861_v2 = vld [vmem:[#allocation3 + $0x8] sm:$0xff]   ;;  %vm273_vm0 = vcmask 261120   ;;  %v5438_v43 = vmov 0  }
  0x3b   :  { %3622 = vmatprep.subr.bf16.mxu0 %v3860_v1  ;;  %v3862_v3 = vld [vmem:[%s5426_s0] sm:$0xff]   ;;  %v3863_v4 = vld [vmem:[%s5426_s0 + $0x8] sm:$0xff]   ;;  %v3864_v5 = vld [vmem:[%s5426_s0 + $0x10] sm:$0xff]   ;;  %783 = vmatprep.mubr.bf16.mxu1 %v5438_v43  ;;  %vm3375_vm1 = vcmask 7168  }
  0x3c   :  { %3623 = vmatpush3.bf16.msra.mxu0 %v3860_v1  ;;  %3626 = vmatprep.mubr.msk.bf16.mxu0 %vm273_vm0, %v3862_v3  ;;  %v3865_v6 = vld [vmem:[%s5426_s0 + $0x18] sm:$0xff]   ;;  %v3866_v7 = vld [vmem:[%s5426_s0 + $0x20] sm:$0xff]   ;;  %v3867_v8 = vld [vmem:[%s5426_s0 + $0x28] sm:$0xff]  }
  0x3d   :  { %3624 = vmatprep.subr.bf16.mxu0 %v3861_v2  ;;  %v3868_v9 = vld [vmem:[%s5426_s0 + $0x30] sm:$0xff]   ;;  %v3869_v13 = vld [vmem:[%s5426_s0 + $0x38] sm:$0xff]   ;;  %v3891_v14 = vld [vmem:[#allocation5 + $0x10] ss:$8 sps:$4 sm:$0xff]  }
  0x3e   :  { %v3886_v10 = vld [vmem:[#allocation5 + $0x4] ss:$8 sps:$4 sm:$0xff]   ;;  %v3888_v11 = vld [vmem:[#allocation5] ss:$8 sps:$4 sm:$0xff]   ;;  %v3889_v12 = vld [vmem:[#allocation5 + $0x14] ss:$8 sps:$4 sm:$0xff]  }
  0x3f   :  { %751 = vmatprep.subr.bf16.mxu1 %v3886_v10  ;;  %v3892_v15 = vld [vmem:[#allocation5 + $0x24] ss:$8 sps:$4 sm:$0xff]   ;;  %v3894_v17 = vld [vmem:[#allocation5 + $0x20] ss:$8 sps:$4 sm:$0xff]   ;;  %v3895_v18 = vld [vmem:[#allocation5 + $0x34] ss:$8 sps:$4 sm:$0xff]  }
  0x40   :  { %3625 = vmatpush3.bf16.msra.mxu0 %v3861_v2  ;;  %752 = vmatpush1.bf16.msra.mxu1 %v3888_v11  ;;  %v3870_v16 = vld [vmem:[%s5426_s0 + $0x40] sm:$0xff]   ;;  %v3871_v20 = vld [vmem:[%s5426_s0 + $0x48] sm:$0xff]   ;;  %v3872_v22 = vld [vmem:[%s5426_s0 + $0x50] sm:$0xff]  }
  0x41   :  { %753 = vmatprep.subr.bf16.mxu1 %v3889_v12  ;;  %v3897_v19 = vld [vmem:[#allocation5 + $0x30] ss:$8 sps:$4 sm:$0xff]   ;;  %v3898_v21 = vld [vmem:[#allocation5 + $0x44] ss:$8 sps:$4 sm:$0xff]   ;;  %v3900_v23 = vld [vmem:[#allocation5 + $0x40] ss:$8 sps:$4 sm:$0xff]  }
  0x42   :  { %v3901_v24 = vld [vmem:[#allocation5 + $0x54] ss:$8 sps:$4 sm:$0xff]   ;;  %v3903_v25 = vld [vmem:[#allocation5 + $0x50] ss:$8 sps:$4 sm:$0xff]   ;;  %v3873_v26 = vld [vmem:[%s5426_s0 + $0x58] sm:$0xff]  }
  0x43   :  { %3627 = vmatmul.mubr.msk.bf16.vlgmr.msra.gmra.mrb[0].mxu0 %vm273_vm0, %v3863_v4  ;;  %v3874_v27 = vld [vmem:[%s5426_s0 + $0x60] sm:$0xff]   ;;  %v3875_v28 = vld [vmem:[%s5426_s0 + $0x68] sm:$0xff]   ;;  %v3876_v29 = vld [vmem:[%s5426_s0 + $0x70] sm:$0xff]  }
  0x44   :  { %3630 = vmatprep.mubr.msk.bf16.mxu0 %vm273_vm0, %v3864_v5  ;;  %754 = vmatpush1.bf16.msra.mxu1 %v3891_v14  ;;  %v3877_v30 = vld [vmem:[%s5426_s0 + $0x78] sm:$0xff]   ;;  %v3878_v31 = vld [vmem:[%s5426_s0 + $0x80] sm:$0xff]   ;;  %v3879_v32 = vld [vmem:[%s5426_s0 + $0x88] sm:$0xff]  }
  0x45   :  { %755 = vmatprep.subr.bf16.mxu1 %v3892_v15  ;;  %v3880_v33 = vld [vmem:[%s5426_s0 + $0x90] sm:$0xff]   ;;  %v3881_v34 = vld [vmem:[%s5426_s0 + $0x98] sm:$0xff]   ;;  %v3882_v35 = vld [vmem:[%s5426_s0 + $0xa0] sm:$0xff]  }
  0x46   :  { %v3883_v36 = vld [vmem:[%s5426_s0 + $0xa8] sm:$0xff]   ;;  %v3884_v37 = vld [vmem:[%s5426_s0 + $0xb0] sm:$0xff]   ;;  %v3885_v39 = vld [vmem:[%s5426_s0 + $0xb8] sm:$0xff]  }
  0x47   :  { %v3904_v38 = vld [vmem:[#allocation5 + $0x64] ss:$8 sps:$4 sm:$0xff]   ;;  %v3906_v40 = vld [vmem:[#allocation5 + $0x60] ss:$8 sps:$4 sm:$0xff]   ;;  %v3907_v41 = vld [vmem:[#allocation5 + $0x74] ss:$8 sps:$4 sm:$0xff]  }
  0x48   :  { %756 = vmatpush1.bf16.msra.mxu1 %v3894_v17  ;;  %v3909_v42 = vld [vmem:[#allocation5 + $0x70] ss:$8 sps:$4 sm:$0xff]   ;;  %v3912_v45 = vld [vmem:[#allocation7 + $0x4] ss:$16 sps:$4 sm:$0xff]   ;;  %v4317_v50 = vld [vmem:[%s5428_s2] ss:$0 sm:$0xff] }
  0x49   :  { %757 = vmatprep.subr.bf16.mxu1 %v3895_v18  ;;  %v3910_v44 = vld [vmem:[#allocation7] ss:$16 sps:$4 sm:$0xff]   ;;  %1574 = vmatprep.subr.bf16.mxu0 %v3912_v45  ;;  %v3915_v47 = vld [vmem:[#allocation7 + $0x24] ss:$16 sps:$4 sm:$0xff]  }
  0x4a   :  { %1575 = vmatpush1.bf16.msra.mxu0 %v3910_v44  ;;  %v3913_v46 = vld [vmem:[#allocation7 + $0x20] ss:$16 sps:$4 sm:$0xff]   ;;  %v3918_v49 = vld [vmem:[#allocation7 + $0x44] ss:$16 sps:$4 sm:$0xff]  }
  0x4b   :  { %3631 = vmatmul.mubr.msk.bf16.gmra.mrb[4].mxu0 %vm273_vm0, %v3865_v6  ;;  %1576 = vmatprep.subr.bf16.mxu0 %v3915_v47  ;;  %v3916_v48 = vld [vmem:[#allocation7 + $0x40] ss:$16 sps:$4 sm:$0xff]  }
  0x4c   :  { %3634 = vmatprep.mubr.msk.bf16.mxu0 %vm273_vm0, %v3866_v7  ;;  %758 = vmatpush1.bf16.msra.mxu1 %v3897_v19  ;;  %v3919_v6 = vld [vmem:[#allocation7 + $0x60] ss:$16 sps:$4 sm:$0xff]   ;;  %v3921_v7 = vld [vmem:[#allocation7 + $0x64] ss:$16 sps:$4 sm:$0xff]  }
  0x4d   :  { %759 = vmatprep.subr.bf16.mxu1 %v3898_v21 }
  0x4e   :  { %1577 = vmatpush1.bf16.msra.mxu0 %v3913_v46 }
  0x4f   :  { %1578 = vmatprep.subr.bf16.mxu0 %v3918_v49 }
  0x50   :  { %760 = vmatpush1.bf16.msra.mxu1 %v3900_v23  ;;  %v3924_v23 = vld [vmem:[#allocation7 + $0x84] ss:$16 sps:$4 sm:$0xff]  }
  0x51   :  { %761 = vmatprep.subr.bf16.mxu1 %v3901_v24 }
  0x52   :  { %1579 = vmatpush1.bf16.msra.mxu0 %v3916_v48 }
  0x53   :  { %3635 = vmatmul.mubr.msk.bf16.gmra.mrb[8].mxu0 %vm273_vm0, %v3867_v8  ;;  %1580 = vmatprep.subr.bf16.mxu0 %v3921_v7 }
  0x54   :  { %3638 = vmatprep.mubr.msk.bf16.mxu0 %vm273_vm0, %v3868_v9  ;;  %762 = vmatpush1.bf16.msra.mxu1 %v3903_v25 }
  0x55   :  { %763 = vmatprep.subr.bf16.mxu1 %v3904_v38 }
  0x56   :  { %1581 = vmatpush1.bf16.msra.mxu0 %v3919_v6 }
  0x57   :  { %1582 = vmatprep.subr.bf16.mxu0 %v3924_v23 }
  0x58   :  { %764 = vmatpush1.bf16.msra.mxu1 %v3906_v40 }
  0x59   :  { %765 = vmatprep.subr.bf16.mxu1 %v3907_v41 }
  0x5b   :  { %3639 = vmatmul.mubr.msk.bf16.gmra.mrb[12].mxu0 %vm273_vm0, %v3869_v13 }
  0x5c   :  { %3642 = vmatprep.mubr.msk.bf16.mxu0 %vm273_vm0, %v3870_v16  ;;  %766 = vmatpush1.bf16.msra.mxu1 %v3909_v42 }
  0x5d   :  { %3674 = vmatprep.subr.bf16.mxu1 %v3912_v45 }
  0x63   :  { %3643 = vmatmul.mubr.msk.bf16.gmra.mrb[16].mxu0 %vm273_vm0, %v3871_v20 }
  0x64   :  { %3646 = vmatprep.mubr.msk.bf16.mxu0 %vm273_vm0, %v3872_v22  ;;  %v3922_v22 = vld [vmem:[#allocation7 + $0x80] ss:$16 sps:$4 sm:$0xff]  }
  0x65   :  { %1583 = vmatpush1.bf16.msra.mxu0 %v3922_v22 }
  0x6b   :  { %3647 = vmatmul.mubr.msk.bf16.gmra.mrb[20].mxu0 %vm273_vm0, %v3873_v26 }
  0x6c   :  { %3650 = vmatprep.mubr.msk.bf16.mxu0 %vm273_vm0, %v3874_v27 }
  0x73   :  { %3651 = vmatmul.mubr.msk.bf16.gmra.mrb[24].mxu0 %vm273_vm0, %v3875_v28 }
  0x74   :  { %3654 = vmatprep.mubr.msk.bf16.mxu0 %vm273_vm0, %v3876_v29 }
  0x7b   :  { %3655 = vmatmul.mubr.msk.bf16.gmra.mrb[28].mxu0 %vm273_vm0, %v3877_v30 }
  0x7c   :  { %3658 = vmatprep.mubr.msk.bf16.mxu0 %vm273_vm0, %v3878_v31 }
  0x83   :  { %3659 = vmatmul.mubr.msk.bf16.gmra.mrb[32].mxu0 %vm273_vm0, %v3879_v32 }
  0x84   :  { %3662 = vmatprep.mubr.msk.bf16.mxu0 %vm273_vm0, %v3880_v33 }
  0x8b   :  { %3663 = vmatmul.mubr.msk.bf16.gmra.mrb[36].mxu0 %vm273_vm0, %v3881_v34 }
  0x8c   :  { %3666 = vmatprep.mubr.msk.bf16.mxu0 %vm273_vm0, %v3882_v35 }
  0x93   :  { %3667 = vmatmul.mubr.msk.bf16.gmra.mrb[40].mxu0 %vm273_vm0, %v3883_v36 }
  0x94   :  { %3670 = vmatprep.mubr.msk.bf16.mxu0 %vm273_vm0, %v3884_v37 }
  0x9b   :  { %3671 = vmatmul.mubr.msk.bf16.gmra.mrb[44].mxu0 %vm273_vm0, %v3885_v39 }
 0x116   :  { %v3628_v51 = vpop.f32.mrb[0].mxu0 }
 0x117   :  { %v389_v52 = vadd.f32 %v3628_v51, %v4317_v50  ;;  %v380_v53 = vpop.f32.mrb[1].mxu0 }
 0x118   :  { %v381_v54 = vadd.f32 %v4317_v50, %v380_v53  ;;  %v3629_v55 = vpop.f32.mrb[2].mxu0 }
 0x119   :  { %v392_v56 = vadd.f32 %v3629_v55, %v4317_v50  ;;  %v383_v57 = vpop.f32.mrb[3].mxu0  ;;  %v573_v59 = vmax.f32 %v389_v52, 0.0  ;;  %v3927_v55 = vld [vmem:[#allocation7 + $0xa4] ss:$16 sps:$4 sm:$0xff]  }
 0x11a   :  { %v384_v58 = vadd.f32 %v4317_v50, %v383_v57  ;;  %v571_v61 = vmax.f32 %v381_v54, 0.0  ;;  %v3925_v54 = vld [vmem:[#allocation7 + $0xa0] ss:$16 sps:$4 sm:$0xff]   ;;  %1584 = vmatprep.subr.bf16.mxu0 %v3927_v55 }
 0x11b   :  { %v574_v60 = vmax.f32 %v392_v56, 0.0  ;;  %1585 = vmatpush1.bf16.msra.mxu0 %v3925_v54 }
 0x11c   :  { %v572_v62 = vmax.f32 %v384_v58, 0.0 }
 0x11d   :  { %v620_v63 = vpack.c.bf16 %v574_v60, %v573_v59 }
 0x11e   :  { %v619_v0 = vpack.c.bf16 %v572_v62, %v571_v61  ;;  %v3632_v1 = vpop.f32.mrb[4].mxu0 }
 0x11f   :  { %v405_v2 = vadd.f32 %v3632_v1, %v4317_v50  ;;  %v396_v3 = vpop.f32.mrb[5].mxu0 }
 0x120   :  { %784 = vmatmul.mubr.bf16.vlgmr.msra.gmra.mrb[0].mxu1 %v619_v0  ;;  %v397_v4 = vadd.f32 %v4317_v50, %v396_v3  ;;  %v3633_v5 = vpop.f32.mrb[6].mxu0 }
 0x121   :  { %v577_v8 = vmax.f32 %v405_v2, 0.0  ;;  %v408_v9 = vadd.f32 %v3633_v5, %v4317_v50  ;;  %v399_v10 = vpop.f32.mrb[7].mxu0  ;;  %793 = vmatprep.mubr.bf16.mxu1 %v5438_v43  ;;  %3690 = vmatpush1.bf16.msra.mxu1 %v3910_v44 }
 0x122   :  { %v575_v11 = vmax.f32 %v397_v4, 0.0  ;;  %v400_v12 = vadd.f32 %v4317_v50, %v399_v10  ;;  %3675 = vmatprep.subr.bf16.mxu1 %v3915_v47 }
 0x123   :  { %v578_v13 = vmax.f32 %v408_v9, 0.0 }
 0x124   :  { %v576_v14 = vmax.f32 %v400_v12, 0.0 }
 0x125   :  { %v622_v15 = vpack.c.bf16 %v578_v13, %v577_v8  ;;  %3691 = vmatpush1.bf16.msra.mxu1 %v3913_v46 }
 0x126   :  { %v621_v16 = vpack.c.bf16 %v576_v14, %v575_v11  ;;  %v3636_v17 = vpop.f32.mrb[8].mxu0  ;;  %3676 = vmatprep.subr.bf16.mxu1 %v3918_v49  ;;  %v3933_v11 = vld [vmem:[#allocation7 + $0xe4] ss:$16 sps:$4 sm:$0xff]  }
 0x127   :  { %v421_v18 = vadd.f32 %v3636_v17, %v4317_v50  ;;  %v412_v19 = vpop.f32.mrb[9].mxu0 }
 0x128   :  { %794 = vmatmul.mubr.bf16.gmra.mrb[4].mxu1 %v620_v63  ;;  %v413_v20 = vadd.f32 %v4317_v50, %v412_v19  ;;  %v3637_v21 = vpop.f32.mrb[10].mxu0 }
 0x129   :  { %803 = vmatprep.mubr.bf16.mxu1 %v5438_v43  ;;  %v581_v24 = vmax.f32 %v421_v18, 0.0  ;;  %v424_v25 = vadd.f32 %v3637_v21, %v4317_v50  ;;  %v415_v26 = vpop.f32.mrb[11].mxu0  ;;  %3692 = vmatpush1.bf16.msra.mxu1 %v3916_v48 }
 0x12a   :  { %v579_v27 = vmax.f32 %v413_v20, 0.0  ;;  %v416_v28 = vadd.f32 %v4317_v50, %v415_v26  ;;  %3677 = vmatprep.subr.bf16.mxu1 %v3921_v7  ;;  %v3930_v7 = vld [vmem:[#allocation7 + $0xc4] ss:$16 sps:$4 sm:$0xff]  }
 0x12b   :  { %v582_v29 = vmax.f32 %v424_v25, 0.0  ;;  %1586 = vmatprep.subr.bf16.mxu0 %v3930_v7  ;;  %v3936_v25 = vld [vmem:[#allocation7 + $0x104] ss:$16 sps:$4 sm:$0xff]  }
 0x12c   :  { %v580_v30 = vmax.f32 %v416_v28, 0.0 }
 0x12d   :  { %v4333_v31 = vpack.c.bf16 %v582_v29, %v581_v24  ;;  %3693 = vmatpush1.bf16.msra.mxu1 %v3919_v6  ;;  %v3928_v6 = vld [vmem:[#allocation7 + $0xc0] ss:$16 sps:$4 sm:$0xff]  }
 0x12e   :  { %v623_v32 = vpack.c.bf16 %v580_v30, %v579_v27  ;;  %v3640_v33 = vpop.f32.mrb[12].mxu0  ;;  %3678 = vmatprep.subr.bf16.mxu1 %v3924_v23  ;;  %1587 = vmatpush1.bf16.msra.mxu0 %v3928_v6  ;;  %v3934_v24 = vld [vmem:[#allocation7 + $0x100] ss:$16 sps:$4 sm:$0xff]  }
 0x12f   :  { %v437_v34 = vadd.f32 %v3640_v33, %v4317_v50  ;;  %v428_v35 = vpop.f32.mrb[13].mxu0  ;;  %1588 = vmatprep.subr.bf16.mxu0 %v3933_v11 }
 0x130   :  { %804 = vmatmul.mubr.bf16.gmra.mrb[8].mxu1 %v621_v16  ;;  %v429_v36 = vadd.f32 %v4317_v50, %v428_v35  ;;  %v3641_v37 = vpop.f32.mrb[14].mxu0 }
 0x131   :  { %813 = vmatprep.mubr.bf16.mxu1 %v5438_v43  ;;  %v585_v38 = vmax.f32 %v437_v34, 0.0  ;;  %v440_v39 = vadd.f32 %v3641_v37, %v4317_v50  ;;  %v431_v40 = vpop.f32.mrb[15].mxu0  ;;  %3694 = vmatpush1.bf16.msra.mxu1 %v3922_v22 }
 0x132   :  { %v583_v41 = vmax.f32 %v429_v36, 0.0  ;;  %v432_v42 = vadd.f32 %v4317_v50, %v431_v40  ;;  %3679 = vmatprep.subr.bf16.mxu1 %v3927_v55  ;;  %v3937_v40 = vld [vmem:[#allocation7 + $0x120] ss:$16 sps:$4 sm:$0xff]  }
 0x133   :  { %v586_v44 = vmax.f32 %v440_v39, 0.0 }
 0x134   :  { %v584_v45 = vmax.f32 %v432_v42, 0.0 }
 0x135   :  { %v4340_v46 = vpack.c.bf16 %v586_v44, %v585_v38  ;;  %3695 = vmatpush1.bf16.msra.mxu1 %v3925_v54 }
 0x136   :  { %v4342_v47 = vpack.c.bf16 %v584_v45, %v583_v41  ;;  %v3644_v48 = vpop.f32.mrb[16].mxu0  ;;  %3680 = vmatprep.subr.bf16.mxu1 %v3930_v7  ;;  %v3939_v41 = vld [vmem:[#allocation7 + $0x124] ss:$16 sps:$4 sm:$0xff]  }
 0x137   :  { %v453_v49 = vadd.f32 %v3644_v48, %v4317_v50  ;;  %v444_v51 = vpop.f32.mrb[17].mxu0  ;;  %v3948_v7 = vld [vmem:[#allocation7 + $0x184] ss:$16 sps:$4 sm:$0xff]  }
 0x138   :  { %814 = vmatmul.mubr.bf16.gmra.mrb[12].mxu1 %v622_v15  ;;  %v445_v52 = vadd.f32 %v4317_v50, %v444_v51  ;;  %v3645_v53 = vpop.f32.mrb[18].mxu0  ;;  %v3931_v15 = vld [vmem:[#allocation7 + $0xe0] ss:$16 sps:$4 sm:$0xff]  }
 0x139   :  { %823 = vmatprep.mubr.bf16.mxu1 %v5438_v43  ;;  %v589_v56 = vmax.f32 %v453_v49, 0.0  ;;  %v456_v57 = vadd.f32 %v3645_v53, %v4317_v50  ;;  %v447_v58 = vpop.f32.mrb[19].mxu0  ;;  %3696 = vmatpush1.bf16.msra.mxu1 %v3928_v6 }
 0x13a   :  { %v587_v59 = vmax.f32 %v445_v52, 0.0  ;;  %v448_v60 = vadd.f32 %v4317_v50, %v447_v58  ;;  %3681 = vmatprep.subr.bf16.mxu1 %v3933_v11  ;;  %1589 = vmatpush1.bf16.msra.mxu0 %v3931_v15 }
 0x13b   :  { %v590_v61 = vmax.f32 %v456_v57, 0.0  ;;  %1590 = vmatprep.subr.bf16.mxu0 %v3936_v25 }
 0x13c   :  { %v588_v62 = vmax.f32 %v448_v60, 0.0  ;;  %v3942_v60 = vld [vmem:[#allocation7 + $0x144] ss:$16 sps:$4 sm:$0xff]  }
 0x13d   :  { %v4349_v63 = vpack.c.bf16 %v590_v61, %v589_v56  ;;  %3697 = vmatpush1.bf16.msra.mxu1 %v3931_v15 }
 0x13e   :  { %v4351_v0 = vpack.c.bf16 %v588_v62, %v587_v59  ;;  %v3648_v1 = vpop.f32.mrb[20].mxu0  ;;  %3682 = vmatprep.subr.bf16.mxu1 %v3936_v25  ;;  %1591 = vmatpush1.bf16.msra.mxu0 %v3934_v24  ;;  %v3940_v59 = vld [vmem:[#allocation7 + $0x140] ss:$16 sps:$4 sm:$0xff]  }
 0x13f   :  { %v469_v2 = vadd.f32 %v3648_v1, %v4317_v50  ;;  %v460_v3 = vpop.f32.mrb[21].mxu0  ;;  %1592 = vmatprep.subr.bf16.mxu0 %v3939_v41  ;;  %v3949_v25 = vld [vmem:[#allocation7 + $0x1a0] ss:$16 sps:$4 sm:$0xff]  }
 0x140   :  { %824 = vmatmul.mubr.bf16.gmra.mrb[16].mxu1 %v623_v32  ;;  %v461_v4 = vadd.f32 %v4317_v50, %v460_v3  ;;  %v3649_v5 = vpop.f32.mrb[22].mxu0 }
 0x141   :  { %833 = vmatprep.mubr.bf16.mxu1 %v5438_v43  ;;  %v593_v8 = vmax.f32 %v469_v2, 0.0  ;;  %v472_v9 = vadd.f32 %v3649_v5, %v4317_v50  ;;  %v463_v10 = vpop.f32.mrb[23].mxu0  ;;  %3698 = vmatpush1.bf16.msra.mxu1 %v3934_v24  ;;  %v3945_v2 = vld [vmem:[#allocation7 + $0x164] ss:$16 sps:$4 sm:$0xff]  }
 0x142   :  { %v591_v12 = vmax.f32 %v461_v4, 0.0  ;;  %v464_v13 = vadd.f32 %v4317_v50, %v463_v10  ;;  %3683 = vmatprep.subr.bf16.mxu1 %v3939_v41  ;;  %1593 = vmatpush1.bf16.msra.mxu0 %v3937_v40 }
 0x143   :  { %v594_v14 = vmax.f32 %v472_v9, 0.0  ;;  %1594 = vmatprep.subr.bf16.mxu0 %v3942_v60 }
 0x144   :  { %v592_v16 = vmax.f32 %v464_v13, 0.0  ;;  %v3946_v13 = vld [vmem:[#allocation7 + $0x180] ss:$16 sps:$4 sm:$0xff]  }
 0x145   :  { %v4358_v17 = vpack.c.bf16 %v594_v14, %v593_v8  ;;  %3699 = vmatpush1.bf16.msra.mxu1 %v3937_v40 }
 0x146   :  { %v4360_v18 = vpack.c.bf16 %v592_v16, %v591_v12  ;;  %v3652_v19 = vpop.f32.mrb[24].mxu0  ;;  %3684 = vmatprep.subr.bf16.mxu1 %v3942_v60  ;;  %1595 = vmatpush1.bf16.msra.mxu0 %v3940_v59  ;;  %v3951_v16 = vld [vmem:[#allocation7 + $0x1a4] ss:$16 sps:$4 sm:$0xff]  }
 0x147   :  { %v485_v20 = vadd.f32 %v3652_v19, %v4317_v50  ;;  %v476_v21 = vpop.f32.mrb[25].mxu0  ;;  %1596 = vmatprep.subr.bf16.mxu0 %v3945_v2 }
 0x148   :  { %834 = vmatmul.mubr.bf16.gmra.mrb[20].mxu1 %v4333_v31  ;;  %v477_v22 = vadd.f32 %v4317_v50, %v476_v21  ;;  %v3653_v23 = vpop.f32.mrb[26].mxu0 }
 0x149   :  { %843 = vmatprep.mubr.bf16.mxu1 %v5438_v43  ;;  %v597_v26 = vmax.f32 %v485_v20, 0.0  ;;  %v488_v27 = vadd.f32 %v3653_v23, %v4317_v50  ;;  %v479_v28 = vpop.f32.mrb[27].mxu0  ;;  %3700 = vmatpush1.bf16.msra.mxu1 %v3940_v59 }
 0x14a   :  { %v595_v29 = vmax.f32 %v477_v22, 0.0  ;;  %v480_v30 = vadd.f32 %v4317_v50, %v479_v28  ;;  %3685 = vmatprep.subr.bf16.mxu1 %v3945_v2  ;;  %v3957_v2 = vld [vmem:[#allocation7 + $0x1e4] ss:$16 sps:$4 sm:$0xff]  }
 0x14b   :  { %v598_v32 = vmax.f32 %v488_v27, 0.0 }
 0x14c   :  { %v596_v31 = vmax.f32 %v480_v30, 0.0 }
 0x14d   :  { %v4368_v33 = vpack.c.bf16 %v598_v32, %v597_v26  ;;  %v3954_v26 = vld [vmem:[#allocation7 + $0x1c4] ss:$16 sps:$4 sm:$0xff]  }
 0x14e   :  { %v4370_v34 = vpack.c.bf16 %v596_v31, %v595_v29  ;;  %v3656_v35 = vpop.f32.mrb[28].mxu0  ;;  %v3952_v31 = vld [vmem:[#allocation7 + $0x1c0] ss:$16 sps:$4 sm:$0xff]  }
 0x14f   :  { %v501_v36 = vadd.f32 %v3656_v35, %v4317_v50  ;;  %v492_v37 = vpop.f32.mrb[29].mxu0 }
 0x150   :  { %844 = vmatmul.mubr.bf16.gmra.mrb[24].mxu1 %v4342_v47  ;;  %v493_v38 = vadd.f32 %v4317_v50, %v492_v37  ;;  %v3657_v39 = vpop.f32.mrb[30].mxu0 }
 0x151   :  { %853 = vmatprep.mubr.bf16.mxu1 %v5438_v43  ;;  %v601_v42 = vmax.f32 %v501_v36, 0.0  ;;  %v504_v44 = vadd.f32 %v3657_v39, %v4317_v50  ;;  %v495_v45 = vpop.f32.mrb[31].mxu0 }
 0x152   :  { %v599_v48 = vmax.f32 %v493_v38, 0.0  ;;  %v496_v49 = vadd.f32 %v4317_v50, %v495_v45 }
 0x153   :  { %v602_v51 = vmax.f32 %v504_v44, 0.0 }
 0x154   :  { %v600_v47 = vmax.f32 %v496_v49, 0.0 }
 0x155   :  { %v4378_v52 = vpack.c.bf16 %v602_v51, %v601_v42 }
 0x156   :  { %v4380_v53 = vpack.c.bf16 %v600_v47, %v599_v48  ;;  %v3660_v54 = vpop.f32.mrb[32].mxu0 }
 0x157   :  { %v517_v55 = vadd.f32 %v3660_v54, %v4317_v50  ;;  %v508_v56 = vpop.f32.mrb[33].mxu0 }
 0x158   :  { %854 = vmatmul.mubr.bf16.gmra.mrb[28].mxu1 %v4340_v46  ;;  %v509_v57 = vadd.f32 %v4317_v50, %v508_v56  ;;  %v3661_v58 = vpop.f32.mrb[34].mxu0  ;;  %v3943_v46 = vld [vmem:[#allocation7 + $0x160] ss:$16 sps:$4 sm:$0xff]  }
 0x159   :  { %863 = vmatprep.mubr.bf16.mxu1 %v5438_v43  ;;  %v605_v61 = vmax.f32 %v517_v55, 0.0  ;;  %v520_v62 = vadd.f32 %v3661_v58, %v4317_v50  ;;  %v511_v1 = vpop.f32.mrb[35].mxu0  ;;  %1597 = vmatpush1.bf16.msra.mxu0 %v3943_v46 }
 0x15a   :  { %v603_v3 = vmax.f32 %v509_v57, 0.0  ;;  %v512_v4 = vadd.f32 %v4317_v50, %v511_v1  ;;  %3701 = vmatpush1.bf16.msra.mxu1 %v3943_v46  ;;  %1598 = vmatprep.subr.bf16.mxu0 %v3948_v7 }
 0x15b   :  { %v606_v5 = vmax.f32 %v520_v62, 0.0  ;;  %3686 = vmatprep.subr.bf16.mxu1 %v3948_v7 }
 0x15c   :  { %v604_v6 = vmax.f32 %v512_v4, 0.0 }
 0x15d   :  { %v4388_v8 = vpack.c.bf16 %v606_v5, %v605_v61  ;;  %1599 = vmatpush1.bf16.msra.mxu0 %v3946_v13 }
 0x15e   :  { %v4390_v9 = vpack.c.bf16 %v604_v6, %v603_v3  ;;  %v3664_v10 = vpop.f32.mrb[36].mxu0  ;;  %3702 = vmatpush1.bf16.msra.mxu1 %v3946_v13  ;;  %1600 = vmatprep.subr.bf16.mxu0 %v3951_v16 }
 0x15f   :  { %v533_v11 = vadd.f32 %v3664_v10, %v4317_v50  ;;  %v524_v12 = vpop.f32.mrb[37].mxu0  ;;  %3687 = vmatprep.subr.bf16.mxu1 %v3951_v16 }
 0x160   :  { %864 = vmatmul.mubr.bf16.gmra.mrb[32].mxu1 %v4351_v0  ;;  %v525_v14 = vadd.f32 %v4317_v50, %v524_v12  ;;  %v3665_v15 = vpop.f32.mrb[38].mxu0 }
 0x161   :  { %873 = vmatprep.mubr.bf16.mxu1 %v5438_v43  ;;  %v609_v19 = vmax.f32 %v533_v11, 0.0  ;;  %v536_v20 = vadd.f32 %v3665_v15, %v4317_v50  ;;  %v527_v21 = vpop.f32.mrb[39].mxu0  ;;  %1601 = vmatpush1.bf16.msra.mxu0 %v3949_v25 }
 0x162   :  { %v607_v22 = vmax.f32 %v525_v14, 0.0  ;;  %v528_v23 = vadd.f32 %v4317_v50, %v527_v21  ;;  %3703 = vmatpush1.bf16.msra.mxu1 %v3949_v25  ;;  %1602 = vmatprep.subr.bf16.mxu0 %v3954_v26 }
 0x163   :  { %v610_v24 = vmax.f32 %v536_v20, 0.0  ;;  %3688 = vmatprep.subr.bf16.mxu1 %v3954_v26 }
 0x164   :  { %v608_v0 = vmax.f32 %v528_v23, 0.0 }
 0x165   :  { %v4398_v27 = vpack.c.bf16 %v610_v24, %v609_v19  ;;  %1603 = vmatpush1.bf16.msra.mxu0 %v3952_v31 }
 0x166   :  { %v637_v28 = vpack.c.bf16 %v608_v0, %v607_v22  ;;  %v3668_v29 = vpop.f32.mrb[40].mxu0  ;;  %3704 = vmatpush1.bf16.msra.mxu1 %v3952_v31  ;;  %1604 = vmatprep.subr.bf16.mxu0 %v3957_v2 }
 0x167   :  { %v549_v30 = vadd.f32 %v3668_v29, %v4317_v50  ;;  %v540_v32 = vpop.f32.mrb[41].mxu0  ;;  %3689 = vmatprep.subr.bf16.mxu1 %v3957_v2 }
 0x168   :  { %874 = vmatmul.mubr.bf16.gmra.mrb[36].mxu1 %v4349_v63  ;;  %v541_v35 = vadd.f32 %v4317_v50, %v540_v32  ;;  %v3669_v36 = vpop.f32.mrb[42].mxu0 }
 0x169   :  { %883 = vmatprep.mubr.bf16.mxu1 %v5438_v43  ;;  %v613_v37 = vmax.f32 %v549_v30, 0.0  ;;  %v552_v38 = vadd.f32 %v3669_v36, %v4317_v50  ;;  %v543_v39 = vpop.f32.mrb[43].mxu0 }
 0x16a   :  { %v611_v40 = vmax.f32 %v541_v35, 0.0  ;;  %v544_v41 = vadd.f32 %v4317_v50, %v543_v39 }
 0x16b   :  { %v614_v42 = vmax.f32 %v552_v38, 0.0 }
 0x16c   :  { %v612_v44 = vmax.f32 %v544_v41, 0.0 }
 0x16d   :  { %v640_v45 = vpack.c.bf16 %v614_v42, %v613_v37 }
 0x16e   :  { %v639_v63 = vpack.c.bf16 %v612_v44, %v611_v40  ;;  %v3672_v48 = vpop.f32.mrb[44].mxu0 }
 0x16f   :  { %v565_v49 = vadd.f32 %v3672_v48, %v4317_v50  ;;  %v556_v51 = vpop.f32.mrb[45].mxu0 }
 0x170   :  { %884 = vmatmul.mubr.bf16.gmra.mrb[40].mxu1 %v4360_v18  ;;  %v557_v47 = vadd.f32 %v4317_v50, %v556_v51  ;;  %v3673_v54 = vpop.f32.mrb[46].mxu0  ;;  %v3955_v18 = vld [vmem:[#allocation7 + $0x1e0] ss:$16 sps:$4 sm:$0xff]  }
 0x171   :  { %893 = vmatprep.mubr.bf16.mxu1 %v5438_v43  ;;  %v617_v55 = vmax.f32 %v565_v49, 0.0  ;;  %v568_v56 = vadd.f32 %v3673_v54, %v4317_v50  ;;  %v559_v57 = vpop.f32.mrb[47].mxu0  ;;  %1605 = vmatpush1.bf16.msra.mxu0 %v3955_v18 }
 0x172   :  { %v615_v58 = vmax.f32 %v557_v47, 0.0  ;;  %v560_v59 = vadd.f32 %v4317_v50, %v559_v57  ;;  %3705 = vmatpush1.bf16.msra.mxu1 %v3955_v18  ;;  %2671 = vmatprep.subr.bf16.mxu0 %v5438_v43  ;;  %v3960_v50 = vld [vmem:[#allocation7 + $0xc] ss:$16 sps:$4 sm:$0xff]  }
 0x173   :  { %v618_v60 = vmax.f32 %v568_v56, 0.0  ;;  %1847 = vmatprep.subr.bf16.mxu1 %v3960_v50 }
 0x174   :  { %v616_v61 = vmax.f32 %v560_v59, 0.0 }
 0x175   :  { %v642_v62 = vpack.c.bf16 %v618_v60, %v617_v55 }
 0x176   :  { %v641_v1 = vpack.c.bf16 %v616_v61, %v615_v58 }
 0x178   :  { %894 = vmatmul.mubr.bf16.gmra.mrb[44].mxu1 %v4358_v17  ;;  %v661_v17 = vlaneseq }
 0x179   :  { %903 = vmatprep.mubr.bf16.mxu1 %v5438_v43 }
 0x180   :  { %904 = vmatmul.mubr.bf16.gmra.mrb[48].mxu1 %v4370_v34 }
 0x181   :  { %913 = vmatprep.mubr.bf16.mxu1 %v5438_v43 }
 0x188   :  { %914 = vmatmul.mubr.bf16.gmra.mrb[52].mxu1 %v4368_v33  ;;  %v4433_v33 = vshrl.u32 %v661_v17, 7 }
 0x189   :  { %923 = vmatprep.mubr.bf16.mxu1 %v5438_v43 }
 0x18a   :  { %v5441_v34 = vsub.s32 0, %v4433_v33 }
 0x190   :  { %924 = vmatmul.mubr.bf16.gmra.mrb[56].mxu1 %v4380_v53  ;;  %v5440_v53 = vsub.s32 1, %v4433_v33 }
 0x191   :  { %933 = vmatprep.mubr.bf16.mxu1 %v5438_v43 }
 0x198   :  { %934 = vmatmul.mubr.bf16.gmra.mrb[60].mxu1 %v4378_v52  ;;  %v659_v52 = vld [vmem:[%s5430_s4] sm:$0x3] }
 0x199   :  { %943 = vmatprep.mubr.bf16.mxu1 %v5438_v43  ;;  %v4442_v3 = vrot.slane %v659_v52, %v5441_v34  ;;  %v4446_v4 = vrot.slane %v659_v52, %v5440_v53 }
 0x1a0   :  { %944 = vmatmul.mubr.bf16.gmra.mrb[64].mxu1 %v4390_v9 }
 0x1a1   :  { %953 = vmatprep.mubr.bf16.mxu1 %v5438_v43 }
 0x1a8   :  { %954 = vmatmul.mubr.bf16.gmra.mrb[68].mxu1 %v4388_v8 }
 0x1a9   :  { %963 = vmatprep.mubr.bf16.mxu1 %v5438_v43 }
 0x1b0   :  { %964 = vmatmul.mubr.bf16.gmra.mrb[72].mxu1 %v637_v28 }
 0x1b1   :  { %973 = vmatprep.mubr.bf16.mxu1 %v5438_v43 }
 0x1b8   :  { %974 = vmatmul.mubr.bf16.gmra.mrb[76].mxu1 %v4398_v27 }
 0x1b9   :  { %983 = vmatprep.mubr.bf16.mxu1 %v5438_v43 }
 0x1c0   :  { %984 = vmatmul.mubr.bf16.gmra.mrb[80].mxu1 %v639_v63 }
 0x1c1   :  { %993 = vmatprep.mubr.bf16.mxu1 %v5438_v43 }
 0x1c8   :  { %994 = vmatmul.mubr.bf16.gmra.mrb[84].mxu1 %v640_v45 }
 0x1c9   :  { %1003 = vmatprep.mubr.bf16.mxu1 %v5438_v43 }
 0x1d0   :  { %1004 = vmatmul.mubr.bf16.gmra.mrb[88].mxu1 %v641_v1 }
 0x1d1   :  { %1013 = vmatprep.mubr.bf16.mxu1 %v5438_v43 }
 0x1d8   :  { %1014 = vmatmul.mubr.bf16.gmra.mrb[92].mxu1 %v642_v62 }
 0x1f3   :  { %v785_v5 = vpop.f32.mrb[0].mxu1 }
 0x1f4   :  { %v786_v46 = vadd.f32 %v785_v5, %v4442_v3  ;;  %v787_v6 = vpop.f32.mrb[1].mxu1 }
 0x1f5   :  { %v788_v7 = vadd.f32 %v787_v6, %v4446_v4  ;;  %v789_v8 = vpop.f32.mrb[2].mxu1 }
 0x1f6   :  { %v790_v9 = vadd.f32 %v789_v8, %v4442_v3  ;;  %v791_v10 = vpop.f32.mrb[3].mxu1  ;;  %v1024_v12 = vmax.f32 %v786_v46, 0.0 }
 0x1f7   :  { %v792_v11 = vadd.f32 %v791_v10, %v4446_v4  ;;  %v1025_v14 = vmax.f32 %v788_v7, 0.0 }
 0x1f8   :  { %v1026_v13 = vmax.f32 %v790_v9, 0.0 }
 0x1f9   :  { %v1027_v15 = vmax.f32 %v792_v11, 0.0 }
 0x1fa   :  { %v4452_v16 = vpack.c.bf16 %v1026_v13, %v1024_v12 }
 0x1fb   :  { %v4454_v19 = vpack.c.bf16 %v1027_v15, %v1025_v14  ;;  %v795_v20 = vpop.f32.mrb[4].mxu1 }
 0x1fc   :  { %v796_v21 = vadd.f32 %v795_v20, %v4442_v3  ;;  %v797_v22 = vpop.f32.mrb[5].mxu1 }
 0x1fd   :  { %v798_v23 = vadd.f32 %v797_v22, %v4446_v4  ;;  %v799_v24 = vpop.f32.mrb[6].mxu1  ;;  %1606 = vmatprep.mubr.bf16.mxu0 %v4454_v19 }
 0x1fe   :  { %v800_v25 = vadd.f32 %v799_v24, %v4442_v3  ;;  %v801_v0 = vpop.f32.mrb[7].mxu1  ;;  %1607 = vmatmul.mubr.bf16.vlgmr.msra.gmra.mrb[48].mxu0 %v4452_v16  ;;  %v1028_v27 = vmax.f32 %v796_v21, 0.0  ;;  %v3994_v21 = vld [vmem:[%s5433_s7] sm:$0xff]  }
 0x1ff   :  { %v802_v26 = vadd.f32 %v801_v0, %v4446_v4  ;;  %v1029_v29 = vmax.f32 %v798_v23, 0.0  ;;  %2672 = vmatpush1.bf16.msra.mxu0 %v3994_v21  ;;  %v4009_v21 = vld [vmem:[%s5433_s7 + $0x30] sm:$0xff]  }
 0x200   :  { %v1030_v28 = vmax.f32 %v800_v25, 0.0  ;;  %2673 = vmatprep.subr.bf16.mxu0 %v5438_v43 }
 0x201   :  { %v1031_v30 = vmax.f32 %v802_v26, 0.0 }
 0x202   :  { %v4462_v32 = vpack.c.bf16 %v1030_v28, %v1028_v27  ;;  %v3998_v28 = vld [vmem:[%s5433_s7 + $0x8] sm:$0xff]  }
 0x203   :  { %v4464_v31 = vpack.c.bf16 %v1031_v30, %v1029_v29  ;;  %v805_v35 = vpop.f32.mrb[8].mxu1  ;;  %2674 = vmatpush1.bf16.msra.mxu0 %v3998_v28  ;;  %v4013_v28 = vld [vmem:[%s5433_s7 + $0x38] sm:$0xff]  }
 0x204   :  { %v806_v36 = vadd.f32 %v805_v35, %v4442_v3  ;;  %v807_v37 = vpop.f32.mrb[9].mxu1  ;;  %2675 = vmatprep.subr.bf16.mxu0 %v5438_v43 }
 0x205   :  { %v808_v38 = vadd.f32 %v807_v37, %v4446_v4  ;;  %v809_v39 = vpop.f32.mrb[10].mxu1  ;;  %1616 = vmatprep.mubr.bf16.mxu0 %v4464_v31 }
 0x206   :  { %v810_v40 = vadd.f32 %v809_v39, %v4442_v3  ;;  %v811_v41 = vpop.f32.mrb[11].mxu1  ;;  %1617 = vmatmul.mubr.bf16.gmra.mrb[52].mxu0 %v4462_v32  ;;  %v1032_v44 = vmax.f32 %v806_v36, 0.0 }
 0x207   :  { %v812_v42 = vadd.f32 %v811_v41, %v4446_v4  ;;  %v1033_v63 = vmax.f32 %v808_v38, 0.0 }
 0x208   :  { %v1034_v45 = vmax.f32 %v810_v40, 0.0  ;;  %v3999_v40 = vld [vmem:[%s5433_s7 + $0x10] sm:$0xff]  }
 0x209   :  { %v1035_v48 = vmax.f32 %v812_v42, 0.0  ;;  %2676 = vmatpush1.bf16.msra.mxu0 %v3999_v40 }
 0x20a   :  { %v4472_v49 = vpack.c.bf16 %v1034_v45, %v1032_v44  ;;  %2677 = vmatprep.subr.bf16.mxu0 %v5438_v43 }
 0x20b   :  { %v4474_v51 = vpack.c.bf16 %v1035_v48, %v1033_v63  ;;  %v815_v47 = vpop.f32.mrb[12].mxu1 }
 0x20c   :  { %v816_v54 = vadd.f32 %v815_v47, %v4442_v3  ;;  %v817_v55 = vpop.f32.mrb[13].mxu1 }
 0x20d   :  { %v818_v56 = vadd.f32 %v817_v55, %v4446_v4  ;;  %v819_v57 = vpop.f32.mrb[14].mxu1  ;;  %1626 = vmatprep.mubr.bf16.mxu0 %v4474_v51 }
 0x20e   :  { %v820_v58 = vadd.f32 %v819_v57, %v4442_v3  ;;  %v821_v59 = vpop.f32.mrb[15].mxu1  ;;  %1627 = vmatmul.mubr.bf16.gmra.mrb[56].mxu0 %v4472_v49  ;;  %v1036_v61 = vmax.f32 %v816_v54, 0.0  ;;  %v4003_v54 = vld [vmem:[%s5433_s7 + $0x18] sm:$0xff]  }
 0x20f   :  { %v822_v60 = vadd.f32 %v821_v59, %v4446_v4  ;;  %v1037_v1 = vmax.f32 %v818_v56, 0.0  ;;  %2678 = vmatpush1.bf16.msra.mxu0 %v4003_v54 }
 0x210   :  { %v1038_v62 = vmax.f32 %v820_v58, 0.0  ;;  %2679 = vmatprep.subr.bf16.mxu0 %v5438_v43 }
 0x211   :  { %v1039_v2 = vmax.f32 %v822_v60, 0.0 }
 0x212   :  { %v4482_v18 = vpack.c.bf16 %v1038_v62, %v1036_v61  ;;  %v4004_v62 = vld [vmem:[%s5433_s7 + $0x20] sm:$0xff]  }
 0x213   :  { %v4484_v50 = vpack.c.bf16 %v1039_v2, %v1037_v1  ;;  %v825_v17 = vpop.f32.mrb[16].mxu1  ;;  %2680 = vmatpush1.bf16.msra.mxu0 %v4004_v62 }
 0x214   :  { %v826_v52 = vadd.f32 %v825_v17, %v4442_v3  ;;  %v827_v5 = vpop.f32.mrb[17].mxu1  ;;  %2681 = vmatprep.subr.bf16.mxu0 %v5438_v43 }
 0x215   :  { %v828_v46 = vadd.f32 %v827_v5, %v4446_v4  ;;  %v829_v6 = vpop.f32.mrb[18].mxu1  ;;  %1636 = vmatprep.mubr.bf16.mxu0 %v4484_v50 }
 0x216   :  { %v830_v7 = vadd.f32 %v829_v6, %v4442_v3  ;;  %v831_v8 = vpop.f32.mrb[19].mxu1  ;;  %1637 = vmatmul.mubr.bf16.gmra.mrb[60].mxu0 %v4482_v18  ;;  %v1040_v10 = vmax.f32 %v826_v52, 0.0 }
 0x217   :  { %v832_v9 = vadd.f32 %v831_v8, %v4446_v4  ;;  %v1041_v12 = vmax.f32 %v828_v46, 0.0 }
 0x218   :  { %v1042_v11 = vmax.f32 %v830_v7, 0.0  ;;  %v4008_v7 = vld [vmem:[%s5433_s7 + $0x28] sm:$0xff]  }
 0x219   :  { %v1043_v13 = vmax.f32 %v832_v9, 0.0  ;;  %2682 = vmatpush1.bf16.msra.mxu0 %v4008_v7 }
 0x21a   :  { %v4492_v14 = vpack.c.bf16 %v1042_v11, %v1040_v10  ;;  %2683 = vmatprep.subr.bf16.mxu0 %v5438_v43 }
 0x21b   :  { %v4494_v15 = vpack.c.bf16 %v1043_v13, %v1041_v12  ;;  %v835_v20 = vpop.f32.mrb[20].mxu1 }
 0x21c   :  { %v836_v22 = vadd.f32 %v835_v20, %v4442_v3  ;;  %v837_v23 = vpop.f32.mrb[21].mxu1 }
 0x21d   :  { %v838_v24 = vadd.f32 %v837_v23, %v4446_v4  ;;  %v839_v25 = vpop.f32.mrb[22].mxu1  ;;  %1646 = vmatprep.mubr.bf16.mxu0 %v4494_v15  ;;  %2684 = vmatpush1.bf16.msra.mxu0 %v4009_v21 }
 0x21e   :  { %v840_v0 = vadd.f32 %v839_v25, %v4442_v3  ;;  %v841_v26 = vpop.f32.mrb[23].mxu1  ;;  %1647 = vmatmul.mubr.bf16.gmra.mrb[64].mxu0 %v4492_v14  ;;  %v1044_v29 = vmax.f32 %v836_v22, 0.0  ;;  %2685 = vmatprep.subr.bf16.mxu0 %v5438_v43 }
 0x21f   :  { %v842_v27 = vadd.f32 %v841_v26, %v4446_v4  ;;  %v1045_v35 = vmax.f32 %v838_v24, 0.0 }
 0x220   :  { %v1046_v30 = vmax.f32 %v840_v0, 0.0 }
 0x221   :  { %v1047_v36 = vmax.f32 %v842_v27, 0.0  ;;  %2686 = vmatpush1.bf16.msra.mxu0 %v4013_v28  ;;  %v3972_v28 = vld [vmem:[#allocation7 + $0x8c] ss:$16 sps:$4 sm:$0xff]  }
 0x222   :  { %v4509_v37 = vpack.c.bf16 %v1046_v30, %v1044_v29  ;;  %2687 = vmatprep.subr.bf16.mxu0 %v5438_v43 }
 0x223   :  { %v4512_v38 = vpack.c.bf16 %v1047_v36, %v1045_v35  ;;  %v845_v39 = vpop.f32.mrb[24].mxu1 }
 0x224   :  { %v846_v41 = vadd.f32 %v845_v39, %v4442_v3  ;;  %v847_v42 = vpop.f32.mrb[25].mxu1  ;;  %v4014_v39 = vld [vmem:[%s5433_s7 + $0x40] sm:$0xff]  }
 0x225   :  { %v848_v44 = vadd.f32 %v847_v42, %v4446_v4  ;;  %v849_v45 = vpop.f32.mrb[26].mxu1  ;;  %1656 = vmatprep.mubr.bf16.mxu0 %v4512_v38  ;;  %2688 = vmatpush1.bf16.msra.mxu0 %v4014_v39 }
 0x226   :  { %v850_v63 = vadd.f32 %v849_v45, %v4442_v3  ;;  %v851_v48 = vpop.f32.mrb[27].mxu1  ;;  %1657 = vmatmul.mubr.bf16.gmra.mrb[68].mxu0 %v4509_v37  ;;  %v1048_v55 = vmax.f32 %v846_v41, 0.0  ;;  %2689 = vmatprep.subr.bf16.mxu0 %v5438_v43 }
 0x227   :  { %v852_v47 = vadd.f32 %v851_v48, %v4446_v4  ;;  %v1049_v57 = vmax.f32 %v848_v44, 0.0  ;;  %v3958_v44 = vld [vmem:[#allocation7 + $0x8] ss:$16 sps:$4 sm:$0xff]   ;;  %v3963_v48 = vld [vmem:[#allocation7 + $0x2c] ss:$16 sps:$4 sm:$0xff]  }
 0x228   :  { %v1050_v56 = vmax.f32 %v850_v63, 0.0 }
 0x229   :  { %v1051_v58 = vmax.f32 %v852_v47, 0.0 }
 0x22a   :  { %v4527_v59 = vpack.c.bf16 %v1050_v56, %v1048_v55 }
 0x22b   :  { %v4530_v60 = vpack.c.bf16 %v1051_v58, %v1049_v57  ;;  %v855_v61 = vpop.f32.mrb[28].mxu1  ;;  %v3961_v58 = vld [vmem:[#allocation7 + $0x28] ss:$16 sps:$4 sm:$0xff]  }
 0x22c   :  { %v856_v1 = vadd.f32 %v855_v61, %v4442_v3  ;;  %v857_v2 = vpop.f32.mrb[29].mxu1  ;;  %v4015_v61 = vld [vmem:[%s5433_s7 + $0x48] sm:$0xff]  }
 0x22d   :  { %v858_v17 = vadd.f32 %v857_v2, %v4446_v4  ;;  %v859_v52 = vpop.f32.mrb[30].mxu1  ;;  %1666 = vmatprep.mubr.bf16.mxu0 %v4530_v60  ;;  %v3966_v2 = vld [vmem:[#allocation7 + $0x4c] ss:$16 sps:$4 sm:$0xff]   ;;  %2690 = vmatpush1.bf16.msra.mxu0 %v4015_v61 }
 0x22e   :  { %v860_v5 = vadd.f32 %v859_v52, %v4442_v3  ;;  %v861_v46 = vpop.f32.mrb[31].mxu1  ;;  %1667 = vmatmul.mubr.bf16.gmra.mrb[72].mxu0 %v4527_v59  ;;  %v1052_v8 = vmax.f32 %v856_v1, 0.0  ;;  %2691 = vmatprep.subr.bf16.mxu0 %v5438_v43  ;;  %v4019_v61 = vld [vmem:[%s5433_s7 + $0x68] sm:$0xff]  }
 0x22f   :  { %v862_v6 = vadd.f32 %v861_v46, %v4446_v4  ;;  %v1053_v10 = vmax.f32 %v858_v17, 0.0 }
 0x230   :  { %v1054_v9 = vmax.f32 %v860_v5, 0.0  ;;  %v4016_v5 = vld [vmem:[%s5433_s7 + $0x50] sm:$0xff]  }
 0x231   :  { %v1055_v11 = vmax.f32 %v862_v6, 0.0  ;;  %2692 = vmatpush1.bf16.msra.mxu0 %v4016_v5 }
 0x232   :  { %v4545_v12 = vpack.c.bf16 %v1054_v9, %v1052_v8  ;;  %v3964_v8 = vld [vmem:[#allocation7 + $0x48] ss:$16 sps:$4 sm:$0xff]   ;;  %2693 = vmatprep.subr.bf16.mxu0 %v5438_v43 }
 0x233   :  { %v4548_v13 = vpack.c.bf16 %v1055_v11, %v1053_v10  ;;  %v865_v20 = vpop.f32.mrb[32].mxu1  ;;  %v3969_v11 = vld [vmem:[#allocation7 + $0x6c] ss:$16 sps:$4 sm:$0xff]  }
 0x234   :  { %v866_v22 = vadd.f32 %v865_v20, %v4442_v3  ;;  %v867_v23 = vpop.f32.mrb[33].mxu1 }
 0x235   :  { %v868_v24 = vadd.f32 %v867_v23, %v4446_v4  ;;  %v869_v25 = vpop.f32.mrb[34].mxu1  ;;  %1676 = vmatprep.mubr.bf16.mxu0 %v4548_v13 }
 0x236   :  { %v870_v0 = vadd.f32 %v869_v25, %v4442_v3  ;;  %v871_v26 = vpop.f32.mrb[35].mxu1  ;;  %1677 = vmatmul.mubr.bf16.gmra.mrb[76].mxu0 %v4545_v12  ;;  %v1056_v29 = vmax.f32 %v866_v22, 0.0  ;;  %v3967_v25 = vld [vmem:[#allocation7 + $0x68] ss:$16 sps:$4 sm:$0xff]  }
 0x237   :  { %v872_v27 = vadd.f32 %v871_v26, %v4446_v4  ;;  %v1057_v35 = vmax.f32 %v868_v24, 0.0 }
 0x238   :  { %v1058_v30 = vmax.f32 %v870_v0, 0.0  ;;  %v4017_v0 = vld [vmem:[%s5433_s7 + $0x58] sm:$0xff]  }
 0x239   :  { %v1059_v36 = vmax.f32 %v872_v27, 0.0  ;;  %2694 = vmatpush1.bf16.msra.mxu0 %v4017_v0 }
 0x23a   :  { %v4566_v40 = vpack.c.bf16 %v1058_v30, %v1056_v29  ;;  %2695 = vmatprep.subr.bf16.mxu0 %v5438_v43 }
 0x23b   :  { %v4569_v41 = vpack.c.bf16 %v1059_v36, %v1057_v35  ;;  %v875_v42 = vpop.f32.mrb[36].mxu1  ;;  %v4018_v35 = vld [vmem:[%s5433_s7 + $0x60] sm:$0xff]  }
 0x23c   :  { %v876_v45 = vadd.f32 %v875_v42, %v4442_v3  ;;  %v877_v63 = vpop.f32.mrb[37].mxu1 }
 0x23d   :  { %v878_v47 = vadd.f32 %v877_v63, %v4446_v4  ;;  %v879_v54 = vpop.f32.mrb[38].mxu1  ;;  %1686 = vmatprep.mubr.bf16.mxu1 %v4569_v41  ;;  %2696 = vmatpush1.bf16.msra.mxu0 %v4018_v35 }
 0x23e   :  { %v880_v55 = vadd.f32 %v879_v54, %v4442_v3  ;;  %v881_v56 = vpop.f32.mrb[39].mxu1  ;;  %1687 = vmatmul.mubr.bf16.vlgmr.msra.gmra.mrb[96].mxu1 %v4566_v40  ;;  %v1060_v62 = vmax.f32 %v876_v45, 0.0  ;;  %2697 = vmatprep.subr.bf16.mxu0 %v5438_v43 }
 0x23f   :  { %v882_v57 = vadd.f32 %v881_v56, %v4446_v4  ;;  %1848 = vmatpush1.bf16.msra.mxu1 %v3958_v44  ;;  %v1061_v17 = vmax.f32 %v878_v47, 0.0  ;;  %v3970_v44 = vld [vmem:[#allocation7 + $0x88] ss:$16 sps:$4 sm:$0xff]  }
 0x240   :  { %v1062_v1 = vmax.f32 %v880_v55, 0.0  ;;  %1849 = vmatprep.subr.bf16.mxu1 %v3963_v48  ;;  %v3975_v48 = vld [vmem:[#allocation7 + $0xac] ss:$16 sps:$4 sm:$0xff]  }
 0x241   :  { %v1063_v52 = vmax.f32 %v882_v57, 0.0  ;;  %2698 = vmatpush1.bf16.msra.mxu0 %v4019_v61 }
 0x242   :  { %v4584_v46 = vpack.c.bf16 %v1062_v1, %v1060_v62  ;;  %2699 = vmatprep.subr.bf16.mxu0 %v5438_v43 }
 0x243   :  { %v4587_v6 = vpack.c.bf16 %v1063_v52, %v1061_v17  ;;  %v885_v7 = vpop.f32.mrb[40].mxu1  ;;  %1850 = vmatpush1.bf16.msra.mxu1 %v3961_v58  ;;  %v3973_v58 = vld [vmem:[#allocation7 + $0xa8] ss:$16 sps:$4 sm:$0xff]  }
 0x244   :  { %v886_v9 = vadd.f32 %v885_v7, %v4442_v3  ;;  %v887_v10 = vpop.f32.mrb[41].mxu1  ;;  %1851 = vmatprep.subr.bf16.mxu1 %v3966_v2  ;;  %v3978_v2 = vld [vmem:[#allocation7 + $0xcc] ss:$16 sps:$4 sm:$0xff]  }
 0x245   :  { %v888_v20 = vadd.f32 %v887_v10, %v4446_v4  ;;  %v889_v21 = vpop.f32.mrb[42].mxu1  ;;  %1696 = vmatprep.mubr.bf16.mxu1 %v4587_v6  ;;  %v4020_v10 = vld [vmem:[%s5433_s7 + $0x70] sm:$0xff]  }
 0x246   :  { %v890_v22 = vadd.f32 %v889_v21, %v4442_v3  ;;  %v891_v23 = vpop.f32.mrb[43].mxu1  ;;  %1697 = vmatmul.mubr.bf16.gmra.mrb[100].mxu1 %v4584_v46  ;;  %v1064_v26 = vmax.f32 %v886_v9, 0.0  ;;  %v3976_v9 = vld [vmem:[#allocation7 + $0xc8] ss:$16 sps:$4 sm:$0xff]   ;;  %v3981_v21 = vld [vmem:[#allocation7 + $0xec] ss:$16 sps:$4 sm:$0xff]   ;;  %2700 = vmatpush1.bf16.msra.mxu0 %v4020_v10 }
 0x247   :  { %v892_v24 = vadd.f32 %v891_v23, %v4446_v4  ;;  %1852 = vmatpush1.bf16.msra.mxu1 %v3964_v8  ;;  %v1065_v29 = vmax.f32 %v888_v20, 0.0  ;;  %2701 = vmatprep.subr.bf16.mxu0 %v5438_v43 }
 0x248   :  { %v1066_v27 = vmax.f32 %v890_v22, 0.0  ;;  %1853 = vmatprep.subr.bf16.mxu1 %v3969_v11 }
 0x249   :  { %v1067_v30 = vmax.f32 %v892_v24, 0.0 }
 0x24a   :  { %v4602_v36 = vpack.c.bf16 %v1066_v27, %v1064_v26  ;;  %v3979_v26 = vld [vmem:[#allocation7 + $0xe8] ss:$16 sps:$4 sm:$0xff]  }
 0x24b   :  { %v4605_v39 = vpack.c.bf16 %v1067_v30, %v1065_v29  ;;  %v895_v42 = vpop.f32.mrb[44].mxu1  ;;  %1854 = vmatpush1.bf16.msra.mxu1 %v3967_v25  ;;  %v4021_v27 = vld [vmem:[%s5433_s7 + $0x78] sm:$0xff]  }
 0x24c   :  { %v896_v45 = vadd.f32 %v895_v42, %v4442_v3  ;;  %v897_v63 = vpop.f32.mrb[45].mxu1  ;;  %1855 = vmatprep.subr.bf16.mxu1 %v3972_v28  ;;  %v3984_v30 = vld [vmem:[#allocation7 + $0x10c] ss:$16 sps:$4 sm:$0xff]   ;;  %2702 = vmatpush1.bf16.msra.mxu0 %v4021_v27 }
 0x24d   :  { %v898_v47 = vadd.f32 %v897_v63, %v4446_v4  ;;  %v899_v54 = vpop.f32.mrb[46].mxu1  ;;  %1706 = vmatprep.mubr.bf16.mxu1 %v4605_v39  ;;  %2896 = vmatprep.subr.bf16.mxu0 %v5438_v43 }
 0x24e   :  { %v900_v55 = vadd.f32 %v899_v54, %v4442_v3  ;;  %v901_v56 = vpop.f32.mrb[47].mxu1  ;;  %1707 = vmatmul.mubr.bf16.gmra.mrb[104].mxu1 %v4602_v36  ;;  %v1068_v62 = vmax.f32 %v896_v45, 0.0 }
 0x24f   :  { %v902_v57 = vadd.f32 %v901_v56, %v4446_v4  ;;  %1856 = vmatpush1.bf16.msra.mxu1 %v3970_v44  ;;  %v1069_v17 = vmax.f32 %v898_v47, 0.0 }
 0x250   :  { %v1070_v1 = vmax.f32 %v900_v55, 0.0  ;;  %1857 = vmatprep.subr.bf16.mxu1 %v3975_v48  ;;  %v3982_v48 = vld [vmem:[#allocation7 + $0x108] ss:$16 sps:$4 sm:$0xff]   ;;  %v3987_v55 = vld [vmem:[#allocation7 + $0x12c] ss:$16 sps:$4 sm:$0xff]  }
 0x251   :  { %v1071_v52 = vmax.f32 %v902_v57, 0.0 }
 0x252   :  { %v4617_v5 = vpack.c.bf16 %v1070_v1, %v1068_v62  ;;  %v3985_v1 = vld [vmem:[#allocation7 + $0x128] ss:$16 sps:$4 sm:$0xff]  }
 0x253   :  { %v4620_v7 = vpack.c.bf16 %v1071_v52, %v1069_v17  ;;  %v905_v8 = vpop.f32.mrb[48].mxu1  ;;  %1858 = vmatpush1.bf16.msra.mxu1 %v3973_v58  ;;  %v3990_v52 = vld [vmem:[#allocation7 + $0x14c] ss:$16 sps:$4 sm:$0xff]  }
 0x254   :  { %v906_v11 = vadd.f32 %v905_v8, %v4442_v3  ;;  %v907_v20 = vpop.f32.mrb[49].mxu1  ;;  %1859 = vmatprep.subr.bf16.mxu1 %v3978_v2 }
 0x255   :  { %v908_v22 = vadd.f32 %v907_v20, %v4446_v4  ;;  %v909_v23 = vpop.f32.mrb[50].mxu1  ;;  %1716 = vmatprep.mubr.bf16.mxu1 %v4620_v7 }
 0x256   :  { %v910_v24 = vadd.f32 %v909_v23, %v4442_v3  ;;  %v911_v25 = vpop.f32.mrb[51].mxu1  ;;  %1717 = vmatmul.mubr.bf16.gmra.mrb[108].mxu1 %v4617_v5  ;;  %v1072_v28 = vmax.f32 %v906_v11, 0.0 }
 0x257   :  { %v912_v0 = vadd.f32 %v911_v25, %v4446_v4  ;;  %1860 = vmatpush1.bf16.msra.mxu1 %v3976_v9  ;;  %v1073_v35 = vmax.f32 %v908_v22, 0.0 }
 0x258   :  { %v1074_v29 = vmax.f32 %v910_v24, 0.0  ;;  %1861 = vmatprep.subr.bf16.mxu1 %v3981_v21  ;;  %v3988_v21 = vld [vmem:[#allocation7 + $0x148] ss:$16 sps:$4 sm:$0xff]   ;;  %v3993_v24 = vld [vmem:[#allocation7 + $0x16c] ss:$16 sps:$4 sm:$0xff]  }
 0x259   :  { %v1075_v42 = vmax.f32 %v912_v0, 0.0 }
 0x25a   :  { %v4635_v44 = vpack.c.bf16 %v1074_v29, %v1072_v28  ;;  %v3991_v29 = vld [vmem:[#allocation7 + $0x168] ss:$16 sps:$4 sm:$0xff]  }
 0x25b   :  { %v4638_v45 = vpack.c.bf16 %v1075_v42, %v1073_v35  ;;  %v915_v63 = vpop.f32.mrb[52].mxu1  ;;  %1862 = vmatpush1.bf16.msra.mxu1 %v3979_v26  ;;  %v3997_v42 = vld [vmem:[#allocation7 + $0x18c] ss:$16 sps:$4 sm:$0xff]  }
 0x25c   :  { %v916_v47 = vadd.f32 %v915_v63, %v4442_v3  ;;  %v917_v54 = vpop.f32.mrb[53].mxu1  ;;  %1863 = vmatprep.subr.bf16.mxu1 %v3984_v30 }
 0x25d   :  { %v918_v56 = vadd.f32 %v917_v54, %v4446_v4  ;;  %v919_v57 = vpop.f32.mrb[54].mxu1  ;;  %1726 = vmatprep.mubr.bf16.mxu1 %v4638_v45 }
 0x25e   :  { %v920_v58 = vadd.f32 %v919_v57, %v4442_v3  ;;  %v921_v61 = vpop.f32.mrb[55].mxu1  ;;  %1727 = vmatmul.mubr.bf16.gmra.mrb[112].mxu1 %v4635_v44  ;;  %v1076_v2 = vmax.f32 %v916_v47, 0.0 }
 0x25f   :  { %v922_v62 = vadd.f32 %v921_v61, %v4446_v4  ;;  %1864 = vmatpush1.bf16.msra.mxu1 %v3982_v48  ;;  %v1077_v8 = vmax.f32 %v918_v56, 0.0  ;;  %v3995_v56 = vld [vmem:[#allocation7 + $0x188] ss:$16 sps:$4 sm:$0xff]   ;;  %v4002_v61 = vld [vmem:[#allocation7 + $0x1ac] ss:$16 sps:$4 sm:$0xff]  }
 0x260   :  { %v1078_v17 = vmax.f32 %v920_v58, 0.0  ;;  %1865 = vmatprep.subr.bf16.mxu1 %v3987_v55 }
 0x261   :  { %v1079_v9 = vmax.f32 %v922_v62, 0.0 }
 0x262   :  { %v4646_v10 = vpack.c.bf16 %v1078_v17, %v1076_v2 }
 0x263   :  { %v4648_v11 = vpack.c.bf16 %v1079_v9, %v1077_v8  ;;  %v925_v20 = vpop.f32.mrb[56].mxu1  ;;  %1866 = vmatpush1.bf16.msra.mxu1 %v3985_v1  ;;  %v4000_v8 = vld [vmem:[#allocation7 + $0x1a8] ss:$16 sps:$4 sm:$0xff]  }
 0x264   :  { %v926_v22 = vadd.f32 %v925_v20, %v4442_v3  ;;  %v927_v23 = vpop.f32.mrb[57].mxu1  ;;  %1867 = vmatprep.subr.bf16.mxu1 %v3990_v52 }
 0x265   :  { %v928_v25 = vadd.f32 %v927_v23, %v4446_v4  ;;  %v929_v0 = vpop.f32.mrb[58].mxu1  ;;  %1736 = vmatprep.mubr.bf16.mxu1 %v4648_v11 }
 0x266   :  { %v930_v26 = vadd.f32 %v929_v0, %v4442_v3  ;;  %v931_v27 = vpop.f32.mrb[59].mxu1  ;;  %1737 = vmatmul.mubr.bf16.gmra.mrb[116].mxu1 %v4646_v10  ;;  %v1080_v30 = vmax.f32 %v926_v22, 0.0 }
 0x267   :  { %v932_v28 = vadd.f32 %v931_v27, %v4446_v4  ;;  %1868 = vmatpush1.bf16.msra.mxu1 %v3988_v21  ;;  %v1081_v63 = vmax.f32 %v928_v25, 0.0  ;;  %v4007_v21 = vld [vmem:[#allocation7 + $0x1cc] ss:$16 sps:$4 sm:$0xff]  }
 0x268   :  { %v1082_v35 = vmax.f32 %v930_v26, 0.0  ;;  %1869 = vmatprep.subr.bf16.mxu1 %v3993_v24  ;;  %v4005_v26 = vld [vmem:[#allocation7 + $0x1c8] ss:$16 sps:$4 sm:$0xff]  }
 0x269   :  { %v1083_v48 = vmax.f32 %v932_v28, 0.0 }
 0x26a   :  { %v4656_v47 = vpack.c.bf16 %v1082_v35, %v1080_v30 }
 0x26b   :  { %v4658_v54 = vpack.c.bf16 %v1083_v48, %v1081_v63  ;;  %v935_v55 = vpop.f32.mrb[60].mxu1  ;;  %1870 = vmatpush1.bf16.msra.mxu1 %v3991_v29  ;;  %v4012_v29 = vld [vmem:[#allocation7 + $0x1ec] ss:$16 sps:$4 sm:$0xff]  }
 0x26c   :  { %v936_v57 = vadd.f32 %v935_v55, %v4442_v3  ;;  %v937_v58 = vpop.f32.mrb[61].mxu1  ;;  %1871 = vmatprep.subr.bf16.mxu1 %v3997_v42  ;;  %v4010_v55 = vld [vmem:[#allocation7 + $0x1e8] ss:$16 sps:$4 sm:$0xff]  }
 0x26d   :  { %v938_v62 = vadd.f32 %v937_v58, %v4446_v4  ;;  %v939_v1 = vpop.f32.mrb[62].mxu1  ;;  %1746 = vmatprep.mubr.bf16.mxu1 %v4658_v54 }
 0x26e   :  { %v940_v2 = vadd.f32 %v939_v1, %v4442_v3  ;;  %v941_v17 = vpop.f32.mrb[63].mxu1  ;;  %1747 = vmatmul.mubr.bf16.gmra.mrb[120].mxu1 %v4656_v47  ;;  %v1084_v9 = vmax.f32 %v936_v57, 0.0 }
 0x26f   :  { %v942_v52 = vadd.f32 %v941_v17, %v4446_v4  ;;  %1872 = vmatpush1.bf16.msra.mxu1 %v3995_v56  ;;  %v1085_v22 = vmax.f32 %v938_v62, 0.0 }
 0x270   :  { %v1086_v20 = vmax.f32 %v940_v2, 0.0  ;;  %1873 = vmatprep.subr.bf16.mxu1 %v4002_v61 }
 0x271   :  { %v1087_v23 = vmax.f32 %v942_v52, 0.0 }
 0x272   :  { %v4666_v24 = vpack.c.bf16 %v1086_v20, %v1084_v9 }
 0x273   :  { %v4668_v25 = vpack.c.bf16 %v1087_v23, %v1085_v22  ;;  %v945_v0 = vpop.f32.mrb[64].mxu1  ;;  %1874 = vmatpush1.bf16.msra.mxu1 %v4000_v8 }
 0x274   :  { %v946_v27 = vadd.f32 %v945_v0, %v4442_v3  ;;  %v947_v28 = vpop.f32.mrb[65].mxu1  ;;  %1875 = vmatprep.subr.bf16.mxu1 %v4007_v21 }
 0x275   :  { %v948_v30 = vadd.f32 %v947_v28, %v4446_v4  ;;  %v949_v35 = vpop.f32.mrb[66].mxu1  ;;  %1756 = vmatprep.mubr.bf16.mxu1 %v4668_v25 }
 0x276   :  { %v950_v42 = vadd.f32 %v949_v35, %v4442_v3  ;;  %v951_v63 = vpop.f32.mrb[67].mxu1  ;;  %1757 = vmatmul.mubr.bf16.gmra.mrb[124].mxu1 %v4666_v24  ;;  %v1088_v56 = vmax.f32 %v946_v27, 0.0 }
 0x277   :  { %v952_v48 = vadd.f32 %v951_v63, %v4446_v4  ;;  %1876 = vmatpush1.bf16.msra.mxu1 %v4005_v26  ;;  %v1089_v58 = vmax.f32 %v948_v30, 0.0 }
 0x278   :  { %v1090_v57 = vmax.f32 %v950_v42, 0.0  ;;  %1877 = vmatprep.subr.bf16.mxu1 %v4012_v29 }
 0x279   :  { %v1091_v61 = vmax.f32 %v952_v48, 0.0 }
 0x27a   :  { %v4676_v62 = vpack.c.bf16 %v1090_v57, %v1088_v56 }
 0x27b   :  { %v4678_v1 = vpack.c.bf16 %v1091_v61, %v1089_v58  ;;  %v955_v2 = vpop.f32.mrb[68].mxu1  ;;  %1878 = vmatpush1.bf16.msra.mxu1 %v4010_v55 }
 0x27c   :  { %v956_v17 = vadd.f32 %v955_v2, %v4442_v3  ;;  %v957_v52 = vpop.f32.mrb[69].mxu1 }
 0x27d   :  { %v958_v8 = vadd.f32 %v957_v52, %v4446_v4  ;;  %v959_v9 = vpop.f32.mrb[70].mxu1  ;;  %1766 = vmatprep.mubr.bf16.mxu1 %v4678_v1 }
 0x27e   :  { %v960_v20 = vadd.f32 %v959_v9, %v4442_v3  ;;  %v961_v21 = vpop.f32.mrb[71].mxu1  ;;  %1767 = vmatmul.mubr.bf16.gmra.mrb[128].mxu1 %v4676_v62  ;;  %v1092_v23 = vmax.f32 %v956_v17, 0.0 }
 0x27f   :  { %v962_v22 = vadd.f32 %v961_v21, %v4446_v4  ;;  %v1093_v26 = vmax.f32 %v958_v8, 0.0 }
 0x280   :  { %v1094_v0 = vmax.f32 %v960_v20, 0.0 }
 0x281   :  { %v1095_v27 = vmax.f32 %v962_v22, 0.0 }
 0x282   :  { %v4686_v28 = vpack.c.bf16 %v1094_v0, %v1092_v23 }
 0x283   :  { %v4688_v29 = vpack.c.bf16 %v1095_v27, %v1093_v26  ;;  %v965_v30 = vpop.f32.mrb[72].mxu1 }
 0x284   :  { %v966_v35 = vadd.f32 %v965_v30, %v4442_v3  ;;  %v967_v42 = vpop.f32.mrb[73].mxu1 }
 0x285   :  { %v968_v63 = vadd.f32 %v967_v42, %v4446_v4  ;;  %v969_v48 = vpop.f32.mrb[74].mxu1  ;;  %1776 = vmatprep.mubr.bf16.mxu1 %v4688_v29 }
 0x286   :  { %v970_v55 = vadd.f32 %v969_v48, %v4442_v3  ;;  %v971_v56 = vpop.f32.mrb[75].mxu1  ;;  %1777 = vmatmul.mubr.bf16.gmra.mrb[132].mxu1 %v4686_v28  ;;  %v1096_v58 = vmax.f32 %v966_v35, 0.0 }
 0x287   :  { %v972_v57 = vadd.f32 %v971_v56, %v4446_v4  ;;  %v1097_v2 = vmax.f32 %v968_v63, 0.0 }
 0x288   :  { %v1098_v61 = vmax.f32 %v970_v55, 0.0 }
 0x289   :  { %v1099_v17 = vmax.f32 %v972_v57, 0.0 }
 0x28a   :  { %v4696_v52 = vpack.c.bf16 %v1098_v61, %v1096_v58 }
 0x28b   :  { %v4698_v8 = vpack.c.bf16 %v1099_v17, %v1097_v2  ;;  %v975_v9 = vpop.f32.mrb[76].mxu1 }
 0x28c   :  { %v976_v20 = vadd.f32 %v975_v9, %v4442_v3  ;;  %v977_v21 = vpop.f32.mrb[77].mxu1 }
 0x28d   :  { %v978_v22 = vadd.f32 %v977_v21, %v4446_v4  ;;  %v979_v23 = vpop.f32.mrb[78].mxu1  ;;  %1786 = vmatprep.mubr.bf16.mxu1 %v4698_v8 }
 0x28e   :  { %v980_v0 = vadd.f32 %v979_v23, %v4442_v3  ;;  %v981_v26 = vpop.f32.mrb[79].mxu1  ;;  %1787 = vmatmul.mubr.bf16.gmra.mrb[136].mxu1 %v4696_v52  ;;  %v1100_v30 = vmax.f32 %v976_v20, 0.0 }
 0x28f   :  { %v982_v27 = vadd.f32 %v981_v26, %v4446_v4  ;;  %v1101_v42 = vmax.f32 %v978_v22, 0.0 }
 0x290   :  { %v1102_v35 = vmax.f32 %v980_v0, 0.0 }
 0x291   :  { %v1103_v63 = vmax.f32 %v982_v27, 0.0 }
 0x292   :  { %v4706_v48 = vpack.c.bf16 %v1102_v35, %v1100_v30 }
 0x293   :  { %v4708_v55 = vpack.c.bf16 %v1103_v63, %v1101_v42  ;;  %v985_v56 = vpop.f32.mrb[80].mxu1 }
 0x294   :  { %v986_v57 = vadd.f32 %v985_v56, %v4442_v3  ;;  %v987_v58 = vpop.f32.mrb[81].mxu1 }
 0x295   :  { %v988_v61 = vadd.f32 %v987_v58, %v4446_v4  ;;  %v989_v2 = vpop.f32.mrb[82].mxu1  ;;  %1796 = vmatprep.mubr.bf16.mxu1 %v4708_v55 }
 0x296   :  { %v990_v17 = vadd.f32 %v989_v2, %v4442_v3  ;;  %v991_v9 = vpop.f32.mrb[83].mxu1  ;;  %1797 = vmatmul.mubr.bf16.gmra.mrb[140].mxu1 %v4706_v48  ;;  %v1104_v21 = vmax.f32 %v986_v57, 0.0 }
 0x297   :  { %v992_v20 = vadd.f32 %v991_v9, %v4446_v4  ;;  %v1105_v23 = vmax.f32 %v988_v61, 0.0 }
 0x298   :  { %v1106_v22 = vmax.f32 %v990_v17, 0.0 }
 0x299   :  { %v1107_v0 = vmax.f32 %v992_v20, 0.0 }
 0x29a   :  { %v4716_v26 = vpack.c.bf16 %v1106_v22, %v1104_v21 }
 0x29b   :  { %v4718_v27 = vpack.c.bf16 %v1107_v0, %v1105_v23  ;;  %v995_v30 = vpop.f32.mrb[84].mxu1 }
 0x29c   :  { %v996_v35 = vadd.f32 %v995_v30, %v4442_v3  ;;  %v997_v42 = vpop.f32.mrb[85].mxu1 }
 0x29d   :  { %v998_v63 = vadd.f32 %v997_v42, %v4446_v4  ;;  %v999_v56 = vpop.f32.mrb[86].mxu1  ;;  %1806 = vmatprep.mubr.bf16.mxu1 %v4718_v27 }
 0x29e   :  { %v1000_v58 = vadd.f32 %v999_v56, %v4442_v3  ;;  %v1001_v2 = vpop.f32.mrb[87].mxu1  ;;  %1807 = vmatmul.mubr.bf16.gmra.mrb[144].mxu1 %v4716_v26  ;;  %v1108_v61 = vmax.f32 %v996_v35, 0.0 }
 0x29f   :  { %v1002_v57 = vadd.f32 %v1001_v2, %v4446_v4  ;;  %v1109_v9 = vmax.f32 %v998_v63, 0.0 }
 0x2a0   :  { %v1110_v17 = vmax.f32 %v1000_v58, 0.0 }
 0x2a1   :  { %v1111_v20 = vmax.f32 %v1002_v57, 0.0 }
 0x2a2   :  { %v4726_v21 = vpack.c.bf16 %v1110_v17, %v1108_v61 }
 0x2a3   :  { %v4728_v22 = vpack.c.bf16 %v1111_v20, %v1109_v9  ;;  %v1005_v23 = vpop.f32.mrb[88].mxu1 }
 0x2a4   :  { %v1006_v0 = vadd.f32 %v1005_v23, %v4442_v3  ;;  %v1007_v30 = vpop.f32.mrb[89].mxu1 }
 0x2a5   :  { %v1008_v42 = vadd.f32 %v1007_v30, %v4446_v4  ;;  %v1009_v56 = vpop.f32.mrb[90].mxu1  ;;  %1816 = vmatprep.mubr.bf16.mxu1 %v4728_v22 }
 0x2a6   :  { %v1010_v43 = vadd.f32 %v1009_v56, %v4442_v3  ;;  %v1011_v2 = vpop.f32.mrb[91].mxu1  ;;  %1817 = vmatmul.mubr.bf16.gmra.mrb[148].mxu1 %v4726_v21  ;;  %v1112_v63 = vmax.f32 %v1006_v0, 0.0 }
 0x2a7   :  { %v1012_v35 = vadd.f32 %v1011_v2, %v4446_v4  ;;  %v1113_v57 = vmax.f32 %v1008_v42, 0.0 }
 0x2a8   :  { %v1114_v58 = vmax.f32 %v1010_v43, 0.0 }
 0x2a9   :  { %v1115_v61 = vmax.f32 %v1012_v35, 0.0 }
 0x2aa   :  { %v4736_v17 = vpack.c.bf16 %v1114_v58, %v1112_v63 }
 0x2ab   :  { %v4738_v9 = vpack.c.bf16 %v1115_v61, %v1113_v57  ;;  %v1015_v20 = vpop.f32.mrb[92].mxu1 }
 0x2ac   :  { %v1016_v23 = vadd.f32 %v1015_v20, %v4442_v3  ;;  %v1017_v30 = vpop.f32.mrb[93].mxu1 }
 0x2ad   :  { %v1018_v53 = vadd.f32 %v1017_v30, %v4446_v4  ;;  %v1019_v56 = vpop.f32.mrb[94].mxu1  ;;  %1826 = vmatprep.mubr.bf16.mxu1 %v4738_v9 }
 0x2ae   :  { %v1020_v34 = vadd.f32 %v1019_v56, %v4442_v3  ;;  %v1021_v2 = vpop.f32.mrb[95].mxu1  ;;  %1827 = vmatmul.mubr.bf16.gmra.mrb[152].mxu1 %v4736_v17  ;;  %v1116_v0 = vmax.f32 %v1016_v23, 0.0 }
 0x2af   :  { %v1022_v43 = vadd.f32 %v1021_v2, %v4446_v4  ;;  %v1117_v35 = vmax.f32 %v1018_v53, 0.0  ;;  %v5442_v53 = vsub.s32 0, %v4433_v33  ;;  %v5443_v4 = vsub.s32 1, %v4433_v33 }
 0x2b0   :  { %v1118_v42 = vmax.f32 %v1020_v34, 0.0  ;;  %v4760_v34 = vld [vmem:[%s5432_s6] sm:$0xf] }
 0x2b1   :  { %v1119_v63 = vmax.f32 %v1022_v43, 0.0  ;;  %v4766_v3 = vrot.slane %v4760_v34, %v5442_v53 }
 0x2b2   :  { %v4746_v58 = vpack.c.bf16 %v1118_v42, %v1116_v0 }
 0x2b3   :  { %v4748_v57 = vpack.c.bf16 %v1119_v63, %v1117_v35  ;;  %v4022_v35 = vld [vmem:[%s5433_s7 + $0x80] sm:$0xff]  }
 0x2b5   :  { %1836 = vmatprep.mubr.bf16.mxu1 %v4748_v57 }
 0x2b6   :  { %1837 = vmatmul.mubr.bf16.gmra.mrb[156].mxu1 %v4746_v58 }
 0x2b7   :  { %1879 = vmatprep.mubr.bf16.mxu1 %v4454_v19 }
 0x2be   :  { %1880 = vmatmul.mubr.bf16.vlgmr.msra.gmra.mrb[160].mxu1 %v4452_v16  ;;  %v4772_v16 = vrot.slane %v4760_v34, %v5443_v4 }
 0x2bf   :  { %1889 = vmatprep.mubr.bf16.mxu1 %v4464_v31 }
 0x2c6   :  { %1890 = vmatmul.mubr.bf16.gmra.mrb[164].mxu1 %v4462_v32 }
 0x2c7   :  { %1899 = vmatprep.mubr.bf16.mxu1 %v4474_v51 }
 0x2ce   :  { %1900 = vmatmul.mubr.bf16.gmra.mrb[168].mxu1 %v4472_v49 }
 0x2cf   :  { %1909 = vmatprep.mubr.bf16.mxu1 %v4484_v50 }
 0x2d1   :  { %v1608_v19 = vpop.f32.mrb[48].mxu0 }
 0x2d2   :  { %v1609_v32 = vadd.f32 %v1608_v19, %v4766_v3  ;;  %v1610_v31 = vpop.f32.mrb[49].mxu0 }
 0x2d3   :  { %v1611_v51 = vadd.f32 %v1610_v31, %v4772_v16  ;;  %v1612_v61 = vpop.f32.mrb[50].mxu0  ;;  %v4023_v31 = vld [vmem:[%s5433_s7 + $0x88] sm:$0xff]  }
 0x2d4   :  { %v1613_v49 = vadd.f32 %v1612_v61, %v4766_v3  ;;  %v1614_v20 = vpop.f32.mrb[51].mxu0  ;;  %v2120_v30 = vmax.f32 %v1609_v32, 0.0 }
 0x2d5   :  { %v1615_v23 = vadd.f32 %v1614_v20, %v4772_v16  ;;  %v2121_v50 = vmax.f32 %v1611_v51, 0.0 }
 0x2d6   :  { %v2124_v56 = vmax.f32 %v1613_v49, 0.0  ;;  %1910 = vmatmul.mubr.bf16.gmra.mrb[172].mxu1 %v4482_v18  ;;  %v5444_v49 = vmov 0  }
 0x2d7   :  { %v2125_v2 = vmax.f32 %v1615_v23, 0.0  ;;  %1919 = vmatprep.mubr.bf16.mxu1 %v4494_v15 }
 0x2d8   :  { %v2312_v43 = vpack.c.bf16 %v2124_v56, %v2120_v30 }
 0x2d9   :  { %v2313_v0 = vpack.c.bf16 %v2125_v2, %v2121_v50  ;;  %v1618_v42 = vpop.f32.mrb[52].mxu0  ;;  %v4024_v2 = vld [vmem:[%s5433_s7 + $0x90] sm:$0xff]  }
 0x2da   :  { %v1619_v63 = vadd.f32 %v1618_v42, %v4766_v3  ;;  %v1620_v53 = vpop.f32.mrb[53].mxu0 }
 0x2db   :  { %v1621_v4 = vadd.f32 %v1620_v53, %v4772_v16  ;;  %v1622_v19 = vpop.f32.mrb[54].mxu0  ;;  %2703 = vmatprep.mubr.bf16.mxu0 %v2313_v0  ;;  %v4025_v53 = vld [vmem:[%s5433_s7 + $0x98] sm:$0xff]  }
 0x2dc   :  { %v1623_v18 = vadd.f32 %v1622_v19, %v4766_v3  ;;  %v1624_v32 = vpop.f32.mrb[55].mxu0  ;;  %2704 = vmatmul.mubr.bf16.vlgmr.msra.gmra.mrb[80].mxu0 %v2312_v43  ;;  %v2128_v51 = vmax.f32 %v1619_v63, 0.0 }
 0x2dd   :  { %v1625_v15 = vadd.f32 %v1624_v32, %v4772_v16  ;;  %2897 = vmatpush1.bf16.msra.mxu0 %v4022_v35  ;;  %v2129_v20 = vmax.f32 %v1621_v4, 0.0 }
 0x2de   :  { %v2132_v61 = vmax.f32 %v1623_v18, 0.0  ;;  %1920 = vmatmul.mubr.bf16.gmra.mrb[176].mxu1 %v4492_v14  ;;  %2898 = vmatprep.subr.bf16.mxu0 %v5444_v49 }
 0x2df   :  { %v2133_v23 = vmax.f32 %v1625_v15, 0.0  ;;  %1929 = vmatprep.mubr.bf16.mxu1 %v4512_v38 }
 0x2e0   :  { %v2316_v30 = vpack.c.bf16 %v2132_v61, %v2128_v51  ;;  %v4026_v61 = vld [vmem:[%s5433_s7 + $0xa0] sm:$0xff]  }
 0x2e1   :  { %v2317_v56 = vpack.c.bf16 %v2133_v23, %v2129_v20  ;;  %v1628_v50 = vpop.f32.mrb[56].mxu0  ;;  %2899 = vmatpush1.bf16.msra.mxu0 %v4023_v31 }
 0x2e2   :  { %v1629_v43 = vadd.f32 %v1628_v50, %v4766_v3  ;;  %v1630_v0 = vpop.f32.mrb[57].mxu0  ;;  %2900 = vmatprep.subr.bf16.mxu0 %v5444_v49 }
 0x2e3   :  { %v1631_v14 = vadd.f32 %v1630_v0, %v4772_v16  ;;  %v1632_v42 = vpop.f32.mrb[58].mxu0  ;;  %2711 = vmatprep.mubr.bf16.mxu0 %v2317_v56 }
 0x2e4   :  { %v1633_v35 = vadd.f32 %v1632_v42, %v4766_v3  ;;  %v1634_v38 = vpop.f32.mrb[59].mxu0  ;;  %2712 = vmatmul.mubr.bf16.gmra.mrb[84].mxu0 %v2316_v30  ;;  %v2136_v4 = vmax.f32 %v1629_v43, 0.0 }
 0x2e5   :  { %v1635_v63 = vadd.f32 %v1634_v38, %v4772_v16  ;;  %2901 = vmatpush1.bf16.msra.mxu0 %v4024_v2  ;;  %v2137_v18 = vmax.f32 %v1631_v14, 0.0  ;;  %v4027_v2 = vld [vmem:[%s5433_s7 + $0xa8] sm:$0xff]  }
 0x2e6   :  { %v2140_v19 = vmax.f32 %v1633_v35, 0.0  ;;  %1930 = vmatmul.mubr.bf16.gmra.mrb[180].mxu1 %v4509_v37  ;;  %2902 = vmatprep.subr.bf16.mxu0 %v5444_v49 }
 0x2e7   :  { %v2141_v32 = vmax.f32 %v1635_v63, 0.0  ;;  %1939 = vmatprep.mubr.bf16.mxu1 %v4530_v60 }
 0x2e8   :  { %v2320_v15 = vpack.c.bf16 %v2140_v19, %v2136_v4 }
 0x2e9   :  { %v2321_v31 = vpack.c.bf16 %v2141_v32, %v2137_v18  ;;  %v1638_v51 = vpop.f32.mrb[60].mxu0  ;;  %2903 = vmatpush1.bf16.msra.mxu0 %v4025_v53  ;;  %v4028_v53 = vld [vmem:[%s5433_s7 + $0xb0] sm:$0xff]  }
 0x2ea   :  { %v1639_v20 = vadd.f32 %v1638_v51, %v4766_v3  ;;  %v1640_v23 = vpop.f32.mrb[61].mxu0  ;;  %2904 = vmatprep.subr.bf16.mxu0 %v5444_v49 }
 0x2eb   :  { %v1641_v37 = vadd.f32 %v1640_v23, %v4772_v16  ;;  %v1642_v30 = vpop.f32.mrb[62].mxu0  ;;  %2719 = vmatprep.mubr.bf16.mxu0 %v2321_v31  ;;  %v4029_v31 = vld [vmem:[%s5433_s7 + $0xb8] sm:$0xff]  }
 0x2ec   :  { %v1643_v56 = vadd.f32 %v1642_v30, %v4766_v3  ;;  %v1644_v60 = vpop.f32.mrb[63].mxu0  ;;  %2720 = vmatmul.mubr.bf16.gmra.mrb[88].mxu0 %v2320_v15  ;;  %v2144_v43 = vmax.f32 %v1639_v20, 0.0 }
 0x2ed   :  { %v1645_v50 = vadd.f32 %v1644_v60, %v4772_v16  ;;  %2905 = vmatpush1.bf16.msra.mxu0 %v4026_v61  ;;  %v2145_v14 = vmax.f32 %v1641_v37, 0.0  ;;  %v4030_v60 = vld [vmem:[%s5433_s7 + $0xc0] sm:$0xff]  }
 0x2ee   :  { %v2148_v0 = vmax.f32 %v1643_v56, 0.0  ;;  %1940 = vmatmul.mubr.bf16.gmra.mrb[184].mxu1 %v4527_v59  ;;  %2906 = vmatprep.subr.bf16.mxu0 %v5444_v49 }
 0x2ef   :  { %v2149_v42 = vmax.f32 %v1645_v50, 0.0  ;;  %1949 = vmatprep.mubr.bf16.mxu1 %v4548_v13 }
 0x2f0   :  { %v2324_v35 = vpack.c.bf16 %v2148_v0, %v2144_v43 }
 0x2f1   :  { %v2325_v38 = vpack.c.bf16 %v2149_v42, %v2145_v14  ;;  %v1648_v63 = vpop.f32.mrb[64].mxu0  ;;  %2907 = vmatpush1.bf16.msra.mxu0 %v4027_v2  ;;  %v4031_v42 = vld [vmem:[%s5433_s7 + $0xc8] sm:$0xff]  }
 0x2f2   :  { %v1649_v4 = vadd.f32 %v1648_v63, %v4766_v3  ;;  %v1650_v19 = vpop.f32.mrb[65].mxu0  ;;  %2908 = vmatprep.subr.bf16.mxu0 %v5444_v49 }
 0x2f3   :  { %v1651_v59 = vadd.f32 %v1650_v19, %v4772_v16  ;;  %v1652_v18 = vpop.f32.mrb[66].mxu0  ;;  %2727 = vmatprep.mubr.bf16.mxu0 %v2325_v38 }
 0x2f4   :  { %v1653_v32 = vadd.f32 %v1652_v18, %v4766_v3  ;;  %v1654_v13 = vpop.f32.mrb[67].mxu0  ;;  %2728 = vmatmul.mubr.bf16.gmra.mrb[92].mxu0 %v2324_v35  ;;  %v2152_v51 = vmax.f32 %v1649_v4, 0.0  ;;  %v4032_v18 = vld [vmem:[%s5433_s7 + $0xd0] sm:$0xff]  }
 0x2f5   :  { %v1655_v15 = vadd.f32 %v1654_v13, %v4772_v16  ;;  %2909 = vmatpush1.bf16.msra.mxu0 %v4028_v53  ;;  %v2153_v20 = vmax.f32 %v1651_v59, 0.0 }
 0x2f6   :  { %v2156_v61 = vmax.f32 %v1653_v32, 0.0  ;;  %1950 = vmatmul.mubr.bf16.gmra.mrb[188].mxu1 %v4545_v12  ;;  %2910 = vmatprep.subr.bf16.mxu0 %v5444_v49 }
 0x2f7   :  { %v2157_v23 = vmax.f32 %v1655_v15, 0.0  ;;  %1959 = vmatprep.mubr.bf16.mxu1 %v4569_v41 }
 0x2f8   :  { %v2328_v37 = vpack.c.bf16 %v2156_v61, %v2152_v51  ;;  %v4033_v61 = vld [vmem:[%s5433_s7 + $0xd8] sm:$0xff]  }
 0x2f9   :  { %v2329_v30 = vpack.c.bf16 %v2157_v23, %v2153_v20  ;;  %v1658_v56 = vpop.f32.mrb[68].mxu0  ;;  %2911 = vmatpush1.bf16.msra.mxu0 %v4029_v31 }
 0x2fa   :  { %v1659_v50 = vadd.f32 %v1658_v56, %v4766_v3  ;;  %v1660_v2 = vpop.f32.mrb[69].mxu0  ;;  %2912 = vmatprep.subr.bf16.mxu0 %v5444_v49 }
 0x2fb   :  { %v1661_v12 = vadd.f32 %v1660_v2, %v4772_v16  ;;  %v1662_v43 = vpop.f32.mrb[70].mxu0  ;;  %2735 = vmatprep.mubr.bf16.mxu0 %v2329_v30  ;;  %v4034_v2 = vld [vmem:[%s5433_s7 + $0xe0] sm:$0xff]  }
 0x2fc   :  { %v1663_v0 = vadd.f32 %v1662_v43, %v4766_v3  ;;  %v1664_v41 = vpop.f32.mrb[71].mxu0  ;;  %2736 = vmatmul.mubr.bf16.gmra.mrb[96].mxu0 %v2328_v37  ;;  %v2160_v35 = vmax.f32 %v1659_v50, 0.0 }
 0x2fd   :  { %v1665_v14 = vadd.f32 %v1664_v41, %v4772_v16  ;;  %2913 = vmatpush1.bf16.msra.mxu0 %v4030_v60  ;;  %v2161_v63 = vmax.f32 %v1661_v12, 0.0 }
 0x2fe   :  { %v2164_v38 = vmax.f32 %v1663_v0, 0.0  ;;  %1960 = vmatmul.mubr.bf16.gmra.mrb[192].mxu1 %v4566_v40  ;;  %2914 = vmatprep.subr.bf16.mxu0 %v5444_v49 }
 0x2ff   :  { %v2165_v53 = vmax.f32 %v1665_v14, 0.0  ;;  %1969 = vmatprep.mubr.bf16.mxu1 %v4587_v6 }
 0x300   :  { %v2332_v4 = vpack.c.bf16 %v2164_v38, %v2160_v35 }
 0x301   :  { %v2333_v19 = vpack.c.bf16 %v2165_v53, %v2161_v63  ;;  %v1668_v59 = vpop.f32.mrb[72].mxu0  ;;  %2915 = vmatpush1.bf16.msra.mxu0 %v4031_v42  ;;  %v4035_v42 = vld [vmem:[%s5433_s7 + $0xe8] sm:$0xff]  }
 0x302   :  { %v1669_v32 = vadd.f32 %v1668_v59, %v4766_v3  ;;  %v1670_v13 = vpop.f32.mrb[73].mxu0  ;;  %2916 = vmatprep.subr.bf16.mxu0 %v5444_v49 }
 0x303   :  { %v1671_v40 = vadd.f32 %v1670_v13, %v4772_v16  ;;  %v1672_v15 = vpop.f32.mrb[74].mxu0  ;;  %2743 = vmatprep.mubr.bf16.mxu0 %v2333_v19 }
 0x304   :  { %v1673_v31 = vadd.f32 %v1672_v15, %v4766_v3  ;;  %v1674_v6 = vpop.f32.mrb[75].mxu0  ;;  %2744 = vmatmul.mubr.bf16.gmra.mrb[100].mxu0 %v2332_v4  ;;  %v2168_v20 = vmax.f32 %v1669_v32, 0.0 }
 0x305   :  { %v1675_v51 = vadd.f32 %v1674_v6, %v4772_v16  ;;  %2917 = vmatpush1.bf16.msra.mxu0 %v4032_v18  ;;  %v2169_v37 = vmax.f32 %v1671_v40, 0.0  ;;  %v4036_v18 = vld [vmem:[%s5433_s7 + $0xf0] sm:$0xff]   ;;  %v4037_v6 = vld [vmem:[%s5433_s7 + $0xf8] sm:$0xff]  }
 0x306   :  { %v2172_v23 = vmax.f32 %v1673_v31, 0.0  ;;  %1970 = vmatmul.mubr.bf16.gmra.mrb[196].mxu1 %v4584_v46  ;;  %2918 = vmatprep.subr.bf16.mxu0 %v5444_v49 }
 0x307   :  { %v2173_v30 = vmax.f32 %v1675_v51, 0.0  ;;  %1979 = vmatprep.mubr.bf16.mxu1 %v4605_v39 }
 0x308   :  { %v2336_v56 = vpack.c.bf16 %v2172_v23, %v2168_v20 }
 0x309   :  { %v2337_v60 = vpack.c.bf16 %v2173_v30, %v2169_v37  ;;  %v1678_v50 = vpop.f32.mrb[76].mxu0  ;;  %2919 = vmatpush1.bf16.msra.mxu0 %v4033_v61 }
 0x30a   :  { %v1679_v12 = vadd.f32 %v1678_v50, %v4766_v3  ;;  %v1680_v43 = vpop.f32.mrb[77].mxu0  ;;  %2920 = vmatprep.subr.bf16.mxu0 %v5444_v49 }
 0x30b   :  { %v1681_v46 = vadd.f32 %v1680_v43, %v4772_v16  ;;  %v1682_v0 = vpop.f32.mrb[78].mxu0  ;;  %2751 = vmatprep.mubr.bf16.mxu0 %v2337_v60 }
 0x30c   :  { %v1683_v41 = vadd.f32 %v1682_v0, %v4766_v3  ;;  %v1684_v39 = vpop.f32.mrb[79].mxu0  ;;  %2752 = vmatmul.mubr.bf16.gmra.mrb[104].mxu0 %v2336_v56  ;;  %v2176_v35 = vmax.f32 %v1679_v12, 0.0 }
 0x30d   :  { %v1685_v14 = vadd.f32 %v1684_v39, %v4772_v16  ;;  %2921 = vmatpush1.bf16.msra.mxu0 %v4034_v2  ;;  %v2177_v63 = vmax.f32 %v1681_v46, 0.0 }
 0x30e   :  { %v2180_v38 = vmax.f32 %v1683_v41, 0.0  ;;  %1980 = vmatmul.mubr.bf16.gmra.mrb[200].mxu1 %v4602_v36  ;;  %2922 = vmatprep.subr.bf16.mxu0 %v5444_v49 }
 0x30f   :  { %v2181_v53 = vmax.f32 %v1685_v14, 0.0  ;;  %1989 = vmatprep.mubr.bf16.mxu1 %v4620_v7 }
 0x310   :  { %v2340_v4 = vpack.c.bf16 %v2180_v38, %v2176_v35 }
 0x311   :  { %v2341_v19 = vpack.c.bf16 %v2181_v53, %v2177_v63  ;;  %v1688_v59 = vpop.f32.mrb[96].mxu1  ;;  %2923 = vmatpush1.bf16.msra.mxu0 %v4035_v42 }
 0x312   :  { %v1689_v32 = vadd.f32 %v1688_v59, %v4766_v3  ;;  %v1690_v13 = vpop.f32.mrb[97].mxu1  ;;  %2924 = vmatprep.subr.bf16.mxu0 %v5444_v49 }
 0x313   :  { %v1691_v36 = vadd.f32 %v1690_v13, %v4772_v16  ;;  %v1692_v40 = vpop.f32.mrb[98].mxu1  ;;  %2759 = vmatprep.mubr.bf16.mxu0 %v2341_v19 }
 0x314   :  { %v1693_v15 = vadd.f32 %v1692_v40, %v4766_v3  ;;  %v1694_v7 = vpop.f32.mrb[99].mxu1  ;;  %2760 = vmatmul.mubr.bf16.gmra.mrb[108].mxu0 %v2340_v4  ;;  %v2184_v51 = vmax.f32 %v1689_v32, 0.0 }
 0x315   :  { %v1695_v31 = vadd.f32 %v1694_v7, %v4772_v16  ;;  %2925 = vmatpush1.bf16.msra.mxu0 %v4036_v18  ;;  %v2185_v20 = vmax.f32 %v1691_v36, 0.0 }
 0x316   :  { %v2188_v61 = vmax.f32 %v1693_v15, 0.0  ;;  %1990 = vmatmul.mubr.bf16.gmra.mrb[204].mxu1 %v4617_v5  ;;  %2926 = vmatprep.subr.bf16.mxu0 %v5444_v49 }
 0x317   :  { %v2189_v23 = vmax.f32 %v1695_v31, 0.0  ;;  %1999 = vmatprep.mubr.bf16.mxu1 %v4638_v45 }
 0x318   :  { %v2344_v37 = vpack.c.bf16 %v2188_v61, %v2184_v51 }
 0x319   :  { %v2345_v30 = vpack.c.bf16 %v2189_v23, %v2185_v20  ;;  %v1698_v56 = vpop.f32.mrb[100].mxu1  ;;  %2927 = vmatpush1.bf16.msra.mxu0 %v4037_v6 }
 0x31a   :  { %v1699_v60 = vadd.f32 %v1698_v56, %v4766_v3  ;;  %v1700_v50 = vpop.f32.mrb[101].mxu1 }
 0x31b   :  { %v1701_v2 = vadd.f32 %v1700_v50, %v4772_v16  ;;  %v1702_v12 = vpop.f32.mrb[102].mxu1  ;;  %2767 = vmatprep.mubr.bf16.mxu0 %v2345_v30 }
 0x31c   :  { %v1703_v43 = vadd.f32 %v1702_v12, %v4766_v3  ;;  %v1704_v5 = vpop.f32.mrb[103].mxu1  ;;  %2768 = vmatmul.mubr.bf16.gmra.mrb[112].mxu0 %v2344_v37  ;;  %v2192_v46 = vmax.f32 %v1699_v60, 0.0 }
 0x31d   :  { %v1705_v49 = vadd.f32 %v1704_v5, %v4772_v16  ;;  %v2193_v45 = vmax.f32 %v1701_v2, 0.0 }
 0x31e   :  { %v2196_v0 = vmax.f32 %v1703_v43, 0.0  ;;  %2000 = vmatmul.mubr.bf16.gmra.mrb[208].mxu1 %v4635_v44 }
 0x31f   :  { %v2197_v41 = vmax.f32 %v1705_v49, 0.0  ;;  %2009 = vmatprep.mubr.bf16.mxu1 %v4648_v11 }
 0x320   :  { %v2348_v39 = vpack.c.bf16 %v2196_v0, %v2192_v46 }
 0x321   :  { %v2349_v14 = vpack.c.bf16 %v2197_v41, %v2193_v45  ;;  %v1708_v42 = vpop.f32.mrb[104].mxu1 }
 0x322   :  { %v1709_v35 = vadd.f32 %v1708_v42, %v4766_v3  ;;  %v1710_v38 = vpop.f32.mrb[105].mxu1 }
 0x323   :  { %v1711_v63 = vadd.f32 %v1710_v38, %v4772_v16  ;;  %v1712_v53 = vpop.f32.mrb[106].mxu1  ;;  %2775 = vmatprep.mubr.bf16.mxu0 %v2349_v14 }
 0x324   :  { %v1713_v4 = vadd.f32 %v1712_v53, %v4766_v3  ;;  %v1714_v19 = vpop.f32.mrb[107].mxu1  ;;  %2776 = vmatmul.mubr.bf16.gmra.mrb[116].mxu0 %v2348_v39  ;;  %v2200_v59 = vmax.f32 %v1709_v35, 0.0 }
 0x325   :  { %v1715_v44 = vadd.f32 %v1714_v19, %v4772_v16  ;;  %v2201_v11 = vmax.f32 %v1711_v63, 0.0 }
 0x326   :  { %v2204_v18 = vmax.f32 %v1713_v4, 0.0  ;;  %2010 = vmatmul.mubr.bf16.gmra.mrb[212].mxu1 %v4646_v10 }
 0x327   :  { %v2205_v32 = vmax.f32 %v1715_v44, 0.0  ;;  %2019 = vmatprep.mubr.bf16.mxu1 %v4658_v54 }
 0x328   :  { %v2352_v13 = vpack.c.bf16 %v2204_v18, %v2200_v59 }
 0x329   :  { %v2353_v36 = vpack.c.bf16 %v2205_v32, %v2201_v11  ;;  %v1718_v40 = vpop.f32.mrb[108].mxu1 }
 0x32a   :  { %v1719_v15 = vadd.f32 %v1718_v40, %v4766_v3  ;;  %v1720_v7 = vpop.f32.mrb[109].mxu1 }
 0x32b   :  { %v1721_v31 = vadd.f32 %v1720_v7, %v4772_v16  ;;  %v1722_v6 = vpop.f32.mrb[110].mxu1  ;;  %2783 = vmatprep.mubr.bf16.mxu0 %v2353_v36 }
 0x32c   :  { %v1723_v51 = vadd.f32 %v1722_v6, %v4766_v3  ;;  %v1724_v61 = vpop.f32.mrb[111].mxu1  ;;  %2784 = vmatmul.mubr.bf16.gmra.mrb[120].mxu0 %v2352_v13  ;;  %v2208_v20 = vmax.f32 %v1719_v15, 0.0 }
 0x32d   :  { %v1725_v10 = vadd.f32 %v1724_v61, %v4772_v16  ;;  %v2209_v54 = vmax.f32 %v1721_v31, 0.0 }
 0x32e   :  { %v2212_v23 = vmax.f32 %v1723_v51, 0.0  ;;  %2020 = vmatmul.mubr.bf16.gmra.mrb[216].mxu1 %v4656_v47 }
 0x32f   :  { %v2213_v37 = vmax.f32 %v1725_v10, 0.0  ;;  %2029 = vmatprep.mubr.bf16.mxu1 %v4668_v25 }
 0x330   :  { %v2356_v30 = vpack.c.bf16 %v2212_v23, %v2208_v20 }
 0x331   :  { %v2357_v56 = vpack.c.bf16 %v2213_v37, %v2209_v54  ;;  %v1728_v60 = vpop.f32.mrb[112].mxu1 }
 0x332   :  { %v1729_v50 = vadd.f32 %v1728_v60, %v4766_v3  ;;  %v1730_v2 = vpop.f32.mrb[113].mxu1 }
 0x333   :  { %v1731_v12 = vadd.f32 %v1730_v2, %v4772_v16  ;;  %v1732_v43 = vpop.f32.mrb[114].mxu1  ;;  %2791 = vmatprep.mubr.bf16.mxu0 %v2357_v56 }
 0x334   :  { %v1733_v5 = vadd.f32 %v1732_v43, %v4766_v3  ;;  %v1734_v49 = vpop.f32.mrb[115].mxu1  ;;  %2792 = vmatmul.mubr.bf16.gmra.mrb[124].mxu0 %v2356_v30  ;;  %v2216_v46 = vmax.f32 %v1729_v50, 0.0 }
 0x335   :  { %v1735_v47 = vadd.f32 %v1734_v49, %v4772_v16  ;;  %v2217_v25 = vmax.f32 %v1731_v12, 0.0 }
 0x336   :  { %v2220_v0 = vmax.f32 %v1733_v5, 0.0  ;;  %2030 = vmatmul.mubr.bf16.gmra.mrb[220].mxu1 %v4666_v24 }
 0x337   :  { %v2221_v45 = vmax.f32 %v1735_v47, 0.0  ;;  %2039 = vmatprep.mubr.bf16.mxu1 %v4678_v1 }
 0x338   :  { %v2360_v41 = vpack.c.bf16 %v2220_v0, %v2216_v46 }
 0x339   :  { %v2361_v39 = vpack.c.bf16 %v2221_v45, %v2217_v25  ;;  %v1738_v14 = vpop.f32.mrb[116].mxu1 }
 0x33a   :  { %v1739_v42 = vadd.f32 %v1738_v14, %v4766_v3  ;;  %v1740_v35 = vpop.f32.mrb[117].mxu1 }
 0x33b   :  { %v1741_v38 = vadd.f32 %v1740_v35, %v4772_v16  ;;  %v1742_v63 = vpop.f32.mrb[118].mxu1  ;;  %2799 = vmatprep.mubr.bf16.mxu0 %v2361_v39 }
 0x33c   :  { %v1743_v53 = vadd.f32 %v1742_v63, %v4766_v3  ;;  %v1744_v4 = vpop.f32.mrb[119].mxu1  ;;  %2800 = vmatmul.mubr.bf16.gmra.mrb[128].mxu0 %v2360_v41  ;;  %v2224_v19 = vmax.f32 %v1739_v42, 0.0 }
 0x33d   :  { %v1745_v24 = vadd.f32 %v1744_v4, %v4772_v16  ;;  %v2225_v1 = vmax.f32 %v1741_v38, 0.0 }
 0x33e   :  { %v2228_v44 = vmax.f32 %v1743_v53, 0.0  ;;  %2040 = vmatmul.mubr.bf16.gmra.mrb[224].mxu1 %v4676_v62 }
 0x33f   :  { %v2229_v59 = vmax.f32 %v1745_v24, 0.0  ;;  %2049 = vmatprep.mubr.bf16.mxu1 %v4688_v29 }
 0x340   :  { %v2364_v18 = vpack.c.bf16 %v2228_v44, %v2224_v19 }
 0x341   :  { %v2365_v11 = vpack.c.bf16 %v2229_v59, %v2225_v1  ;;  %v1748_v32 = vpop.f32.mrb[120].mxu1 }
 0x342   :  { %v1749_v13 = vadd.f32 %v1748_v32, %v4766_v3  ;;  %v1750_v36 = vpop.f32.mrb[121].mxu1 }
 0x343   :  { %v1751_v40 = vadd.f32 %v1750_v36, %v4772_v16  ;;  %v1752_v15 = vpop.f32.mrb[122].mxu1  ;;  %2807 = vmatprep.mubr.bf16.mxu0 %v2365_v11 }
 0x344   :  { %v1753_v7 = vadd.f32 %v1752_v15, %v4766_v3  ;;  %v1754_v31 = vpop.f32.mrb[123].mxu1  ;;  %2808 = vmatmul.mubr.bf16.gmra.mrb[132].mxu0 %v2364_v18  ;;  %v2232_v6 = vmax.f32 %v1749_v13, 0.0 }
 0x345   :  { %v1755_v62 = vadd.f32 %v1754_v31, %v4772_v16  ;;  %v2233_v29 = vmax.f32 %v1751_v40, 0.0 }
 0x346   :  { %v2236_v51 = vmax.f32 %v1753_v7, 0.0  ;;  %2050 = vmatmul.mubr.bf16.gmra.mrb[228].mxu1 %v4686_v28 }
 0x347   :  { %v2237_v61 = vmax.f32 %v1755_v62, 0.0  ;;  %2059 = vmatprep.mubr.bf16.mxu1 %v4698_v8 }
 0x348   :  { %v2368_v10 = vpack.c.bf16 %v2236_v51, %v2232_v6 }
 0x349   :  { %v2369_v20 = vpack.c.bf16 %v2237_v61, %v2233_v29  ;;  %v1758_v23 = vpop.f32.mrb[124].mxu1 }
 0x34a   :  { %v1759_v54 = vadd.f32 %v1758_v23, %v4766_v3  ;;  %v1760_v37 = vpop.f32.mrb[125].mxu1 }
 0x34b   :  { %v1761_v30 = vadd.f32 %v1760_v37, %v4772_v16  ;;  %v1762_v56 = vpop.f32.mrb[126].mxu1  ;;  %2815 = vmatprep.mubr.bf16.mxu0 %v2369_v20 }
 0x34c   :  { %v1763_v60 = vadd.f32 %v1762_v56, %v4766_v3  ;;  %v1764_v50 = vpop.f32.mrb[127].mxu1  ;;  %2816 = vmatmul.mubr.bf16.gmra.mrb[136].mxu0 %v2368_v10  ;;  %v2240_v2 = vmax.f32 %v1759_v54, 0.0 }
 0x34d   :  { %v1765_v28 = vadd.f32 %v1764_v50, %v4772_v16  ;;  %v2241_v8 = vmax.f32 %v1761_v30, 0.0 }
 0x34e   :  { %v2244_v12 = vmax.f32 %v1763_v60, 0.0  ;;  %2060 = vmatmul.mubr.bf16.gmra.mrb[232].mxu1 %v4696_v52 }
 0x34f   :  { %v2245_v43 = vmax.f32 %v1765_v28, 0.0  ;;  %2069 = vmatprep.mubr.bf16.mxu1 %v4708_v55 }
 0x350   :  { %v2372_v5 = vpack.c.bf16 %v2244_v12, %v2240_v2 }
 0x351   :  { %v2373_v49 = vpack.c.bf16 %v2245_v43, %v2241_v8  ;;  %v1768_v47 = vpop.f32.mrb[128].mxu1 }
 0x352   :  { %v1769_v46 = vadd.f32 %v1768_v47, %v4766_v3  ;;  %v1770_v0 = vpop.f32.mrb[129].mxu1 }
 0x353   :  { %v1771_v25 = vadd.f32 %v1770_v0, %v4772_v16  ;;  %v1772_v45 = vpop.f32.mrb[130].mxu1  ;;  %2823 = vmatprep.mubr.bf16.mxu0 %v2373_v49 }
 0x354   :  { %v1773_v41 = vadd.f32 %v1772_v45, %v4766_v3  ;;  %v1774_v39 = vpop.f32.mrb[131].mxu1  ;;  %2824 = vmatmul.mubr.bf16.gmra.mrb[140].mxu0 %v2372_v5  ;;  %v2248_v14 = vmax.f32 %v1769_v46, 0.0 }
 0x355   :  { %v1775_v52 = vadd.f32 %v1774_v39, %v4772_v16  ;;  %v2249_v55 = vmax.f32 %v1771_v25, 0.0 }
 0x356   :  { %v2252_v42 = vmax.f32 %v1773_v41, 0.0  ;;  %2070 = vmatmul.mubr.bf16.gmra.mrb[236].mxu1 %v4706_v48 }
 0x357   :  { %v2253_v35 = vmax.f32 %v1775_v52, 0.0  ;;  %2079 = vmatprep.mubr.bf16.mxu1 %v4718_v27 }
 0x358   :  { %v2376_v38 = vpack.c.bf16 %v2252_v42, %v2248_v14 }
 0x359   :  { %v2377_v63 = vpack.c.bf16 %v2253_v35, %v2249_v55  ;;  %v1778_v53 = vpop.f32.mrb[132].mxu1 }
 0x35a   :  { %v1779_v4 = vadd.f32 %v1778_v53, %v4766_v3  ;;  %v1780_v24 = vpop.f32.mrb[133].mxu1 }
 0x35b   :  { %v1781_v19 = vadd.f32 %v1780_v24, %v4772_v16  ;;  %v1782_v44 = vpop.f32.mrb[134].mxu1  ;;  %2831 = vmatprep.mubr.bf16.mxu0 %v2377_v63 }
 0x35c   :  { %v1783_v1 = vadd.f32 %v1782_v44, %v4766_v3  ;;  %v1784_v59 = vpop.f32.mrb[135].mxu1  ;;  %2832 = vmatmul.mubr.bf16.gmra.mrb[144].mxu0 %v2376_v38  ;;  %v2256_v18 = vmax.f32 %v1779_v4, 0.0 }
 0x35d   :  { %v1785_v48 = vadd.f32 %v1784_v59, %v4772_v16  ;;  %v2257_v27 = vmax.f32 %v1781_v19, 0.0 }
 0x35e   :  { %v2260_v11 = vmax.f32 %v1783_v1, 0.0  ;;  %2080 = vmatmul.mubr.bf16.gmra.mrb[240].mxu1 %v4716_v26 }
 0x35f   :  { %v2261_v32 = vmax.f32 %v1785_v48, 0.0  ;;  %2089 = vmatprep.mubr.bf16.mxu1 %v4728_v22 }
 0x360   :  { %v2380_v13 = vpack.c.bf16 %v2260_v11, %v2256_v18 }
 0x361   :  { %v2381_v36 = vpack.c.bf16 %v2261_v32, %v2257_v27  ;;  %v1788_v40 = vpop.f32.mrb[136].mxu1 }
 0x362   :  { %v1789_v15 = vadd.f32 %v1788_v40, %v4766_v3  ;;  %v1790_v7 = vpop.f32.mrb[137].mxu1 }
 0x363   :  { %v1791_v31 = vadd.f32 %v1790_v7, %v4772_v16  ;;  %v1792_v62 = vpop.f32.mrb[138].mxu1  ;;  %2839 = vmatprep.mubr.bf16.mxu0 %v2381_v36 }
 0x364   :  { %v1793_v6 = vadd.f32 %v1792_v62, %v4766_v3  ;;  %v1794_v51 = vpop.f32.mrb[139].mxu1  ;;  %2840 = vmatmul.mubr.bf16.gmra.mrb[148].mxu0 %v2380_v13  ;;  %v2264_v29 = vmax.f32 %v1789_v15, 0.0 }
 0x365   :  { %v1795_v26 = vadd.f32 %v1794_v51, %v4772_v16  ;;  %v2265_v22 = vmax.f32 %v1791_v31, 0.0 }
 0x366   :  { %v2268_v61 = vmax.f32 %v1793_v6, 0.0  ;;  %2090 = vmatmul.mubr.bf16.gmra.mrb[244].mxu1 %v4726_v21 }
 0x367   :  { %v2269_v10 = vmax.f32 %v1795_v26, 0.0  ;;  %2099 = vmatprep.mubr.bf16.mxu1 %v4738_v9 }
 0x368   :  { %v2384_v20 = vpack.c.bf16 %v2268_v61, %v2264_v29 }
 0x369   :  { %v2385_v23 = vpack.c.bf16 %v2269_v10, %v2265_v22  ;;  %v1798_v54 = vpop.f32.mrb[140].mxu1 }
 0x36a   :  { %v1799_v37 = vadd.f32 %v1798_v54, %v4766_v3  ;;  %v1800_v30 = vpop.f32.mrb[141].mxu1 }
 0x36b   :  { %v1801_v56 = vadd.f32 %v1800_v30, %v4772_v16  ;;  %v1802_v60 = vpop.f32.mrb[142].mxu1  ;;  %2847 = vmatprep.mubr.bf16.mxu0 %v2385_v23  ;;  %v1244_v23 = vsub.s32 2, %v4433_v33  ;;  %v1248_v30 = vsub.s32 3, %v4433_v33 }
 0x36c   :  { %v1803_v50 = vadd.f32 %v1802_v60, %v4766_v3  ;;  %v1804_v28 = vpop.f32.mrb[143].mxu1  ;;  %2848 = vmatmul.mubr.bf16.gmra.mrb[152].mxu0 %v2384_v20  ;;  %v2272_v2 = vmax.f32 %v1799_v37, 0.0 }
 0x36d   :  { %v1805_v21 = vadd.f32 %v1804_v28, %v4772_v16  ;;  %v2273_v9 = vmax.f32 %v1801_v56, 0.0 }
 0x36e   :  { %v2276_v12 = vmax.f32 %v1803_v50, 0.0  ;;  %2100 = vmatmul.mubr.bf16.gmra.mrb[248].mxu1 %v4736_v17 }
 0x36f   :  { %v2277_v8 = vmax.f32 %v1805_v21, 0.0  ;;  %2109 = vmatprep.mubr.bf16.mxu1 %v4748_v57 }
 0x370   :  { %v2388_v43 = vpack.c.bf16 %v2276_v12, %v2272_v2  ;;  %v4977_v2 = vrot.slane %v4760_v34, %v1244_v23 }
 0x371   :  { %v2389_v5 = vpack.c.bf16 %v2277_v8, %v2273_v9  ;;  %v1808_v49 = vpop.f32.mrb[144].mxu1  ;;  %v4980_v8 = vrot.slane %v4760_v34, %v1248_v30 }
 0x372   :  { %v1809_v47 = vadd.f32 %v1808_v49, %v4766_v3  ;;  %v1810_v46 = vpop.f32.mrb[145].mxu1 }
 0x373   :  { %v1811_v0 = vadd.f32 %v1810_v46, %v4772_v16  ;;  %v1812_v25 = vpop.f32.mrb[146].mxu1  ;;  %2855 = vmatprep.mubr.bf16.mxu0 %v2389_v5 }
 0x374   :  { %v1813_v45 = vadd.f32 %v1812_v25, %v4766_v3  ;;  %v1814_v41 = vpop.f32.mrb[147].mxu1  ;;  %2856 = vmatmul.mubr.bf16.gmra.mrb[156].mxu0 %v2388_v43  ;;  %v2280_v39 = vmax.f32 %v1809_v47, 0.0 }
 0x375   :  { %v1815_v17 = vadd.f32 %v1814_v41, %v4772_v16  ;;  %v2281_v57 = vmax.f32 %v1811_v0, 0.0 }
 0x376   :  { %v2284_v52 = vmax.f32 %v1813_v45, 0.0  ;;  %2110 = vmatmul.mubr.bf16.gmra.mrb[252].mxu1 %v4746_v58 }
 0x377   :  { %v2285_v14 = vmax.f32 %v1815_v17, 0.0 }
 0x378   :  { %v2392_v42 = vpack.c.bf16 %v2284_v52, %v2280_v39 }
 0x379   :  { %v2393_v55 = vpack.c.bf16 %v2285_v14, %v2281_v57  ;;  %v1818_v35 = vpop.f32.mrb[148].mxu1 }
 0x37a   :  { %v1819_v38 = vadd.f32 %v1818_v35, %v4766_v3  ;;  %v1820_v63 = vpop.f32.mrb[149].mxu1 }
 0x37b   :  { %v1821_v53 = vadd.f32 %v1820_v63, %v4772_v16  ;;  %v1822_v4 = vpop.f32.mrb[150].mxu1  ;;  %2863 = vmatprep.mubr.bf16.mxu0 %v2393_v55 }
 0x37c   :  { %v1823_v24 = vadd.f32 %v1822_v4, %v4766_v3  ;;  %v1824_v19 = vpop.f32.mrb[151].mxu1  ;;  %2864 = vmatmul.mubr.bf16.gmra.mrb[160].mxu0 %v2392_v42  ;;  %v2288_v1 = vmax.f32 %v1819_v38, 0.0 }
 0x37d   :  { %v1825_v44 = vadd.f32 %v1824_v19, %v4772_v16  ;;  %v2289_v59 = vmax.f32 %v1821_v53, 0.0 }
 0x37e   :  { %v2292_v58 = vmax.f32 %v1823_v24, 0.0 }
 0x37f   :  { %v2293_v48 = vmax.f32 %v1825_v44, 0.0 }
 0x380   :  { %v2396_v18 = vpack.c.bf16 %v2292_v58, %v2288_v1 }
 0x381   :  { %v2397_v11 = vpack.c.bf16 %v2293_v48, %v2289_v59  ;;  %v1828_v27 = vpop.f32.mrb[152].mxu1 }
 0x382   :  { %v1829_v32 = vadd.f32 %v1828_v27, %v4766_v3  ;;  %v1830_v13 = vpop.f32.mrb[153].mxu1 }
 0x383   :  { %v1831_v36 = vadd.f32 %v1830_v13, %v4772_v16  ;;  %v1832_v40 = vpop.f32.mrb[154].mxu1  ;;  %2871 = vmatprep.mubr.bf16.mxu0 %v2397_v11 }
 0x384   :  { %v1833_v15 = vadd.f32 %v1832_v40, %v4766_v3  ;;  %v1834_v7 = vpop.f32.mrb[155].mxu1  ;;  %2872 = vmatmul.mubr.bf16.gmra.mrb[164].mxu0 %v2396_v18  ;;  %v2296_v62 = vmax.f32 %v1829_v32, 0.0 }
 0x385   :  { %v1835_v31 = vadd.f32 %v1834_v7, %v4772_v16  ;;  %v2297_v51 = vmax.f32 %v1831_v36, 0.0 }
 0x386   :  { %v2300_v6 = vmax.f32 %v1833_v15, 0.0 }
 0x387   :  { %v2301_v26 = vmax.f32 %v1835_v31, 0.0 }
 0x388   :  { %v2400_v29 = vpack.c.bf16 %v2300_v6, %v2296_v62 }
 0x389   :  { %v2401_v61 = vpack.c.bf16 %v2301_v26, %v2297_v51  ;;  %v1838_v22 = vpop.f32.mrb[156].mxu1 }
 0x38a   :  { %v1839_v10 = vadd.f32 %v1838_v22, %v4766_v3  ;;  %v1840_v20 = vpop.f32.mrb[157].mxu1 }
 0x38b   :  { %v1841_v54 = vadd.f32 %v1840_v20, %v4772_v16  ;;  %v1842_v37 = vpop.f32.mrb[158].mxu1  ;;  %2879 = vmatprep.mubr.bf16.mxu0 %v2401_v61 }
 0x38c   :  { %v1843_v56 = vadd.f32 %v1842_v37, %v4766_v3  ;;  %v1844_v60 = vpop.f32.mrb[159].mxu1  ;;  %2880 = vmatmul.mubr.bf16.gmra.mrb[168].mxu0 %v2400_v29  ;;  %v2304_v28 = vmax.f32 %v1839_v10, 0.0 }
 0x38d   :  { %v1845_v50 = vadd.f32 %v1844_v60, %v4772_v16  ;;  %v2305_v12 = vmax.f32 %v1841_v54, 0.0 }
 0x38e   :  { %v2308_v21 = vmax.f32 %v1843_v56, 0.0 }
 0x38f   :  { %v2309_v9 = vmax.f32 %v1845_v50, 0.0 }
 0x390   :  { %v2404_v43 = vpack.c.bf16 %v2308_v21, %v2304_v28 }
 0x391   :  { %v2405_v5 = vpack.c.bf16 %v2309_v9, %v2305_v12  ;;  %v1881_v49 = vpop.f32.mrb[160].mxu1 }
 0x392   :  { %v1882_v33 = vadd.f32 %v1881_v49, %v4977_v2  ;;  %v1883_v3 = vpop.f32.mrb[161].mxu1 }
 0x393   :  { %v1884_v47 = vadd.f32 %v1883_v3, %v4980_v8  ;;  %v1885_v46 = vpop.f32.mrb[162].mxu1  ;;  %2887 = vmatprep.mubr.bf16.mxu0 %v2405_v5 }
 0x394   :  { %v1886_v16 = vadd.f32 %v1885_v46, %v4977_v2  ;;  %v1887_v0 = vpop.f32.mrb[163].mxu1  ;;  %2888 = vmatmul.mubr.bf16.gmra.mrb[172].mxu0 %v2404_v43  ;;  %v2122_v45 = vmax.f32 %v1882_v33, 0.0 }
 0x395   :  { %v1888_v25 = vadd.f32 %v1887_v0, %v4980_v8  ;;  %v2123_v34 = vmax.f32 %v1884_v47, 0.0 }
 0x396   :  { %v2126_v41 = vmax.f32 %v1886_v16, 0.0 }
 0x397   :  { %v2127_v17 = vmax.f32 %v1888_v25, 0.0 }
 0x398   :  { %v2314_v39 = vpack.c.bf16 %v2126_v41, %v2122_v45 }
 0x399   :  { %v2315_v52 = vpack.c.bf16 %v2127_v17, %v2123_v34  ;;  %v1891_v57 = vpop.f32.mrb[164].mxu1 }
 0x39a   :  { %v1892_v14 = vadd.f32 %v1891_v57, %v4977_v2  ;;  %v1893_v42 = vpop.f32.mrb[165].mxu1 }
 0x39b   :  { %v1894_v55 = vadd.f32 %v1893_v42, %v4980_v8  ;;  %v1895_v35 = vpop.f32.mrb[166].mxu1  ;;  %2928 = vmatprep.mubr.bf16.mxu0 %v2315_v52 }
 0x39c   :  { %v1896_v38 = vadd.f32 %v1895_v35, %v4977_v2  ;;  %v1897_v63 = vpop.f32.mrb[167].mxu1  ;;  %2929 = vmatmul.mubr.bf16.vlgmr.msra.gmra.mrb[80].mxu0 %v2314_v39  ;;  %v2130_v4 = vmax.f32 %v1892_v14, 0.0 }
 0x39d   :  { %v1898_v53 = vadd.f32 %v1897_v63, %v4980_v8  ;;  %v2131_v19 = vmax.f32 %v1894_v55, 0.0 }
 0x39e   :  { %v2134_v24 = vmax.f32 %v1896_v38, 0.0 }
 0x39f   :  { %v2135_v44 = vmax.f32 %v1898_v53, 0.0 }
 0x3a0   :  { %v2318_v1 = vpack.c.bf16 %v2134_v24, %v2130_v4 }
 0x3a1   :  { %v2319_v58 = vpack.c.bf16 %v2135_v44, %v2131_v19  ;;  %v1901_v59 = vpop.f32.mrb[168].mxu1 }
 0x3a2   :  { %v1902_v48 = vadd.f32 %v1901_v59, %v4977_v2  ;;  %v1903_v18 = vpop.f32.mrb[169].mxu1 }
 0x3a3   :  { %v1904_v11 = vadd.f32 %v1903_v18, %v4980_v8  ;;  %v1905_v27 = vpop.f32.mrb[170].mxu1  ;;  %2936 = vmatprep.mubr.bf16.mxu0 %v2319_v58 }
 0x3a4   :  { %v1906_v32 = vadd.f32 %v1905_v27, %v4977_v2  ;;  %v1907_v13 = vpop.f32.mrb[171].mxu1  ;;  %2937 = vmatmul.mubr.bf16.gmra.mrb[84].mxu0 %v2318_v1  ;;  %v2138_v40 = vmax.f32 %v1902_v48, 0.0 }
 0x3a5   :  { %v1908_v36 = vadd.f32 %v1907_v13, %v4980_v8  ;;  %v2139_v7 = vmax.f32 %v1904_v11, 0.0 }
 0x3a6   :  { %v2142_v15 = vmax.f32 %v1906_v32, 0.0 }
 0x3a7   :  { %v2143_v31 = vmax.f32 %v1908_v36, 0.0 }
 0x3a8   :  { %v2322_v62 = vpack.c.bf16 %v2142_v15, %v2138_v40 }
 0x3a9   :  { %v2323_v6 = vpack.c.bf16 %v2143_v31, %v2139_v7  ;;  %v1911_v51 = vpop.f32.mrb[172].mxu1 }
 0x3aa   :  { %v1912_v26 = vadd.f32 %v1911_v51, %v4977_v2  ;;  %v1913_v29 = vpop.f32.mrb[173].mxu1 }
 0x3ab   :  { %v1914_v61 = vadd.f32 %v1913_v29, %v4980_v8  ;;  %v1915_v22 = vpop.f32.mrb[174].mxu1  ;;  %2944 = vmatprep.mubr.bf16.mxu0 %v2323_v6 }
 0x3ac   :  { %v1916_v10 = vadd.f32 %v1915_v22, %v4977_v2  ;;  %v1917_v20 = vpop.f32.mrb[175].mxu1  ;;  %2945 = vmatmul.mubr.bf16.gmra.mrb[88].mxu0 %v2322_v62  ;;  %v2146_v54 = vmax.f32 %v1912_v26, 0.0 }
 0x3ad   :  { %v1918_v23 = vadd.f32 %v1917_v20, %v4980_v8  ;;  %v2147_v30 = vmax.f32 %v1914_v61, 0.0 }
 0x3ae   :  { %v2150_v37 = vmax.f32 %v1916_v10, 0.0 }
 0x3af   :  { %v2151_v56 = vmax.f32 %v1918_v23, 0.0 }
 0x3b0   :  { %v2326_v60 = vpack.c.bf16 %v2150_v37, %v2146_v54 }
 0x3b1   :  { %v2327_v50 = vpack.c.bf16 %v2151_v56, %v2147_v30  ;;  %v1921_v28 = vpop.f32.mrb[176].mxu1 }
 0x3b2   :  { %v1922_v21 = vadd.f32 %v1921_v28, %v4977_v2  ;;  %v1923_v12 = vpop.f32.mrb[177].mxu1 }
 0x3b3   :  { %v1924_v9 = vadd.f32 %v1923_v12, %v4980_v8  ;;  %v1925_v43 = vpop.f32.mrb[178].mxu1  ;;  %2952 = vmatprep.mubr.bf16.mxu0 %v2327_v50 }
 0x3b4   :  { %v1926_v5 = vadd.f32 %v1925_v43, %v4977_v2  ;;  %v1927_v49 = vpop.f32.mrb[179].mxu1  ;;  %2953 = vmatmul.mubr.bf16.gmra.mrb[92].mxu0 %v2326_v60  ;;  %v2154_v3 = vmax.f32 %v1922_v21, 0.0 }
 0x3b5   :  { %v1928_v33 = vadd.f32 %v1927_v49, %v4980_v8  ;;  %v2155_v46 = vmax.f32 %v1924_v9, 0.0 }
 0x3b6   :  { %v2158_v47 = vmax.f32 %v1926_v5, 0.0 }
 0x3b7   :  { %v2159_v16 = vmax.f32 %v1928_v33, 0.0 }
 0x3b8   :  { %v2330_v0 = vpack.c.bf16 %v2158_v47, %v2154_v3 }
 0x3b9   :  { %v2331_v25 = vpack.c.bf16 %v2159_v16, %v2155_v46  ;;  %v1931_v45 = vpop.f32.mrb[180].mxu1 }
 0x3ba   :  { %v1932_v41 = vadd.f32 %v1931_v45, %v4977_v2  ;;  %v1933_v34 = vpop.f32.mrb[181].mxu1 }
 0x3bb   :  { %v1934_v17 = vadd.f32 %v1933_v34, %v4980_v8  ;;  %v1935_v39 = vpop.f32.mrb[182].mxu1  ;;  %2960 = vmatprep.mubr.bf16.mxu0 %v2331_v25 }
 0x3bc   :  { %v1936_v52 = vadd.f32 %v1935_v39, %v4977_v2  ;;  %v1937_v57 = vpop.f32.mrb[183].mxu1  ;;  %2961 = vmatmul.mubr.bf16.gmra.mrb[96].mxu0 %v2330_v0  ;;  %v2162_v42 = vmax.f32 %v1932_v41, 0.0 }
 0x3bd   :  { %v1938_v14 = vadd.f32 %v1937_v57, %v4980_v8  ;;  %v2163_v35 = vmax.f32 %v1934_v17, 0.0 }
 0x3be   :  { %v2166_v55 = vmax.f32 %v1936_v52, 0.0 }
 0x3bf   :  { %v2167_v38 = vmax.f32 %v1938_v14, 0.0 }
 0x3c0   :  { %v2334_v63 = vpack.c.bf16 %v2166_v55, %v2162_v42 }
 0x3c1   :  { %v2335_v53 = vpack.c.bf16 %v2167_v38, %v2163_v35  ;;  %v1941_v4 = vpop.f32.mrb[184].mxu1 }
 0x3c2   :  { %v1942_v24 = vadd.f32 %v1941_v4, %v4977_v2  ;;  %v1943_v19 = vpop.f32.mrb[185].mxu1 }
 0x3c3   :  { %v1944_v44 = vadd.f32 %v1943_v19, %v4980_v8  ;;  %v1945_v1 = vpop.f32.mrb[186].mxu1  ;;  %2968 = vmatprep.mubr.bf16.mxu0 %v2335_v53 }
 0x3c4   :  { %v1946_v58 = vadd.f32 %v1945_v1, %v4977_v2  ;;  %v1947_v59 = vpop.f32.mrb[187].mxu1  ;;  %2969 = vmatmul.mubr.bf16.gmra.mrb[100].mxu0 %v2334_v63  ;;  %v2170_v18 = vmax.f32 %v1942_v24, 0.0 }
 0x3c5   :  { %v1948_v48 = vadd.f32 %v1947_v59, %v4980_v8  ;;  %v2171_v27 = vmax.f32 %v1944_v44, 0.0 }
 0x3c6   :  { %v2174_v11 = vmax.f32 %v1946_v58, 0.0 }
 0x3c7   :  { %v2175_v32 = vmax.f32 %v1948_v48, 0.0 }
 0x3c8   :  { %v2338_v13 = vpack.c.bf16 %v2174_v11, %v2170_v18 }
 0x3c9   :  { %v2339_v36 = vpack.c.bf16 %v2175_v32, %v2171_v27  ;;  %v1951_v40 = vpop.f32.mrb[188].mxu1 }
 0x3ca   :  { %v1952_v15 = vadd.f32 %v1951_v40, %v4977_v2  ;;  %v1953_v7 = vpop.f32.mrb[189].mxu1 }
 0x3cb   :  { %v1954_v31 = vadd.f32 %v1953_v7, %v4980_v8  ;;  %v1955_v62 = vpop.f32.mrb[190].mxu1  ;;  %2976 = vmatprep.mubr.bf16.mxu0 %v2339_v36 }
 0x3cc   :  { %v1956_v6 = vadd.f32 %v1955_v62, %v4977_v2  ;;  %v1957_v51 = vpop.f32.mrb[191].mxu1  ;;  %2977 = vmatmul.mubr.bf16.gmra.mrb[104].mxu0 %v2338_v13  ;;  %v2178_v29 = vmax.f32 %v1952_v15, 0.0 }
 0x3cd   :  { %v1958_v26 = vadd.f32 %v1957_v51, %v4980_v8  ;;  %v2179_v22 = vmax.f32 %v1954_v31, 0.0 }
 0x3ce   :  { %v2182_v61 = vmax.f32 %v1956_v6, 0.0 }
 0x3cf   :  { %v2183_v10 = vmax.f32 %v1958_v26, 0.0 }
 0x3d0   :  { %v2342_v20 = vpack.c.bf16 %v2182_v61, %v2178_v29 }
 0x3d1   :  { %v2343_v23 = vpack.c.bf16 %v2183_v10, %v2179_v22  ;;  %v1961_v54 = vpop.f32.mrb[192].mxu1 }
 0x3d2   :  { %v1962_v37 = vadd.f32 %v1961_v54, %v4977_v2  ;;  %v1963_v30 = vpop.f32.mrb[193].mxu1 }
 0x3d3   :  { %v1964_v56 = vadd.f32 %v1963_v30, %v4980_v8  ;;  %v1965_v60 = vpop.f32.mrb[194].mxu1  ;;  %2984 = vmatprep.mubr.bf16.mxu0 %v2343_v23 }
 0x3d4   :  { %v1966_v50 = vadd.f32 %v1965_v60, %v4977_v2  ;;  %v1967_v28 = vpop.f32.mrb[195].mxu1  ;;  %2985 = vmatmul.mubr.bf16.gmra.mrb[108].mxu0 %v2342_v20  ;;  %v2186_v12 = vmax.f32 %v1962_v37, 0.0 }
 0x3d5   :  { %v1968_v21 = vadd.f32 %v1967_v28, %v4980_v8  ;;  %v2187_v43 = vmax.f32 %v1964_v56, 0.0 }
 0x3d6   :  { %v2190_v9 = vmax.f32 %v1966_v50, 0.0 }
 0x3d7   :  { %v2191_v5 = vmax.f32 %v1968_v21, 0.0 }
 0x3d8   :  { %v2346_v49 = vpack.c.bf16 %v2190_v9, %v2186_v12 }
 0x3d9   :  { %v2347_v33 = vpack.c.bf16 %v2191_v5, %v2187_v43  ;;  %v1971_v3 = vpop.f32.mrb[196].mxu1 }
 0x3da   :  { %v1972_v47 = vadd.f32 %v1971_v3, %v4977_v2  ;;  %v1973_v46 = vpop.f32.mrb[197].mxu1 }
 0x3db   :  { %v1974_v16 = vadd.f32 %v1973_v46, %v4980_v8  ;;  %v1975_v0 = vpop.f32.mrb[198].mxu1  ;;  %2992 = vmatprep.mubr.bf16.mxu0 %v2347_v33 }
 0x3dc   :  { %v1976_v25 = vadd.f32 %v1975_v0, %v4977_v2  ;;  %v1977_v45 = vpop.f32.mrb[199].mxu1  ;;  %2993 = vmatmul.mubr.bf16.gmra.mrb[112].mxu0 %v2346_v49  ;;  %v2194_v34 = vmax.f32 %v1972_v47, 0.0 }
 0x3dd   :  { %v1978_v41 = vadd.f32 %v1977_v45, %v4980_v8  ;;  %v2195_v39 = vmax.f32 %v1974_v16, 0.0 }
 0x3de   :  { %v2198_v17 = vmax.f32 %v1976_v25, 0.0 }
 0x3df   :  { %v2199_v52 = vmax.f32 %v1978_v41, 0.0 }
 0x3e0   :  { %v2350_v57 = vpack.c.bf16 %v2198_v17, %v2194_v34 }
 0x3e1   :  { %v2351_v14 = vpack.c.bf16 %v2199_v52, %v2195_v39  ;;  %v1981_v42 = vpop.f32.mrb[200].mxu1 }
 0x3e2   :  { %v1982_v55 = vadd.f32 %v1981_v42, %v4977_v2  ;;  %v1983_v35 = vpop.f32.mrb[201].mxu1 }
 0x3e3   :  { %v1984_v38 = vadd.f32 %v1983_v35, %v4980_v8  ;;  %v1985_v63 = vpop.f32.mrb[202].mxu1  ;;  %3000 = vmatprep.mubr.bf16.mxu0 %v2351_v14 }
 0x3e4   :  { %v1986_v53 = vadd.f32 %v1985_v63, %v4977_v2  ;;  %v1987_v4 = vpop.f32.mrb[203].mxu1  ;;  %3001 = vmatmul.mubr.bf16.gmra.mrb[116].mxu0 %v2350_v57  ;;  %v2202_v19 = vmax.f32 %v1982_v55, 0.0 }
 0x3e5   :  { %v1988_v24 = vadd.f32 %v1987_v4, %v4980_v8  ;;  %v2203_v1 = vmax.f32 %v1984_v38, 0.0 }
 0x3e6   :  { %v2206_v44 = vmax.f32 %v1986_v53, 0.0 }
 0x3e7   :  { %v2207_v58 = vmax.f32 %v1988_v24, 0.0 }
 0x3e8   :  { %v2354_v59 = vpack.c.bf16 %v2206_v44, %v2202_v19 }
 0x3e9   :  { %v2355_v48 = vpack.c.bf16 %v2207_v58, %v2203_v1  ;;  %v1991_v18 = vpop.f32.mrb[204].mxu1 }
 0x3ea   :  { %v1992_v11 = vadd.f32 %v1991_v18, %v4977_v2  ;;  %v1993_v27 = vpop.f32.mrb[205].mxu1 }
 0x3eb   :  { %v1994_v32 = vadd.f32 %v1993_v27, %v4980_v8  ;;  %v1995_v13 = vpop.f32.mrb[206].mxu1  ;;  %3008 = vmatprep.mubr.bf16.mxu0 %v2355_v48 }
 0x3ec   :  { %v1996_v36 = vadd.f32 %v1995_v13, %v4977_v2  ;;  %v1997_v40 = vpop.f32.mrb[207].mxu1  ;;  %3009 = vmatmul.mubr.bf16.gmra.mrb[120].mxu0 %v2354_v59  ;;  %v2210_v7 = vmax.f32 %v1992_v11, 0.0 }
 0x3ed   :  { %v1998_v15 = vadd.f32 %v1997_v40, %v4980_v8  ;;  %v2211_v62 = vmax.f32 %v1994_v32, 0.0 }
 0x3ee   :  { %v2214_v31 = vmax.f32 %v1996_v36, 0.0 }
 0x3ef   :  { %v2215_v6 = vmax.f32 %v1998_v15, 0.0 }
 0x3f0   :  { %v2358_v51 = vpack.c.bf16 %v2214_v31, %v2210_v7 }
 0x3f1   :  { %v2359_v26 = vpack.c.bf16 %v2215_v6, %v2211_v62  ;;  %v2001_v29 = vpop.f32.mrb[208].mxu1 }
 0x3f2   :  { %v2002_v61 = vadd.f32 %v2001_v29, %v4977_v2  ;;  %v2003_v22 = vpop.f32.mrb[209].mxu1 }
 0x3f3   :  { %v2004_v10 = vadd.f32 %v2003_v22, %v4980_v8  ;;  %v2005_v20 = vpop.f32.mrb[210].mxu1  ;;  %3016 = vmatprep.mubr.bf16.mxu0 %v2359_v26 }
 0x3f4   :  { %v2006_v23 = vadd.f32 %v2005_v20, %v4977_v2  ;;  %v2007_v54 = vpop.f32.mrb[211].mxu1  ;;  %3017 = vmatmul.mubr.bf16.gmra.mrb[124].mxu0 %v2358_v51  ;;  %v2218_v30 = vmax.f32 %v2002_v61, 0.0 }
 0x3f5   :  { %v2008_v37 = vadd.f32 %v2007_v54, %v4980_v8  ;;  %v2219_v60 = vmax.f32 %v2004_v10, 0.0 }
 0x3f6   :  { %v2222_v56 = vmax.f32 %v2006_v23, 0.0 }
 0x3f7   :  { %v2223_v50 = vmax.f32 %v2008_v37, 0.0 }
 0x3f8   :  { %v2362_v28 = vpack.c.bf16 %v2222_v56, %v2218_v30 }
 0x3f9   :  { %v2363_v21 = vpack.c.bf16 %v2223_v50, %v2219_v60  ;;  %v2011_v12 = vpop.f32.mrb[212].mxu1 }
 0x3fa   :  { %v2012_v9 = vadd.f32 %v2011_v12, %v4977_v2  ;;  %v2013_v43 = vpop.f32.mrb[213].mxu1 }
 0x3fb   :  { %v2014_v5 = vadd.f32 %v2013_v43, %v4980_v8  ;;  %v2015_v49 = vpop.f32.mrb[214].mxu1  ;;  %3024 = vmatprep.mubr.bf16.mxu0 %v2363_v21 }
 0x3fc   :  { %v2016_v33 = vadd.f32 %v2015_v49, %v4977_v2  ;;  %v2017_v3 = vpop.f32.mrb[215].mxu1  ;;  %3025 = vmatmul.mubr.bf16.gmra.mrb[128].mxu0 %v2362_v28  ;;  %v2226_v46 = vmax.f32 %v2012_v9, 0.0 }
 0x3fd   :  { %v2018_v47 = vadd.f32 %v2017_v3, %v4980_v8  ;;  %v2227_v0 = vmax.f32 %v2014_v5, 0.0 }
 0x3fe   :  { %v2230_v16 = vmax.f32 %v2016_v33, 0.0 }
 0x3ff   :  { %v2231_v25 = vmax.f32 %v2018_v47, 0.0 }
 0x400   :  { %v2366_v45 = vpack.c.bf16 %v2230_v16, %v2226_v46 }
 0x401   :  { %v2367_v41 = vpack.c.bf16 %v2231_v25, %v2227_v0  ;;  %v2021_v34 = vpop.f32.mrb[216].mxu1 }
 0x402   :  { %v2022_v17 = vadd.f32 %v2021_v34, %v4977_v2  ;;  %v2023_v39 = vpop.f32.mrb[217].mxu1 }
 0x403   :  { %v2024_v52 = vadd.f32 %v2023_v39, %v4980_v8  ;;  %v2025_v57 = vpop.f32.mrb[218].mxu1  ;;  %3032 = vmatprep.mubr.bf16.mxu0 %v2367_v41 }
 0x404   :  { %v2026_v14 = vadd.f32 %v2025_v57, %v4977_v2  ;;  %v2027_v42 = vpop.f32.mrb[219].mxu1  ;;  %3033 = vmatmul.mubr.bf16.gmra.mrb[132].mxu0 %v2366_v45  ;;  %v2234_v35 = vmax.f32 %v2022_v17, 0.0 }
 0x405   :  { %v2028_v55 = vadd.f32 %v2027_v42, %v4980_v8  ;;  %v2235_v63 = vmax.f32 %v2024_v52, 0.0 }
 0x406   :  { %v2238_v38 = vmax.f32 %v2026_v14, 0.0 }
 0x407   :  { %v2239_v53 = vmax.f32 %v2028_v55, 0.0 }
 0x408   :  { %v2370_v4 = vpack.c.bf16 %v2238_v38, %v2234_v35 }
 0x409   :  { %v2371_v24 = vpack.c.bf16 %v2239_v53, %v2235_v63  ;;  %v2031_v19 = vpop.f32.mrb[220].mxu1 }
 0x40a   :  { %v2032_v44 = vadd.f32 %v2031_v19, %v4977_v2  ;;  %v2033_v1 = vpop.f32.mrb[221].mxu1 }
 0x40b   :  { %v2034_v58 = vadd.f32 %v2033_v1, %v4980_v8  ;;  %v2035_v59 = vpop.f32.mrb[222].mxu1  ;;  %3040 = vmatprep.mubr.bf16.mxu0 %v2371_v24 }
 0x40c   :  { %v2036_v48 = vadd.f32 %v2035_v59, %v4977_v2  ;;  %v2037_v18 = vpop.f32.mrb[223].mxu1  ;;  %3041 = vmatmul.mubr.bf16.gmra.mrb[136].mxu0 %v2370_v4  ;;  %v2242_v27 = vmax.f32 %v2032_v44, 0.0 }
 0x40d   :  { %v2038_v11 = vadd.f32 %v2037_v18, %v4980_v8  ;;  %v2243_v13 = vmax.f32 %v2034_v58, 0.0 }
 0x40e   :  { %v2246_v32 = vmax.f32 %v2036_v48, 0.0 }
 0x40f   :  { %v2247_v36 = vmax.f32 %v2038_v11, 0.0 }
 0x410   :  { %v2374_v40 = vpack.c.bf16 %v2246_v32, %v2242_v27 }
 0x411   :  { %v2375_v15 = vpack.c.bf16 %v2247_v36, %v2243_v13  ;;  %v2041_v7 = vpop.f32.mrb[224].mxu1 }
 0x412   :  { %v2042_v31 = vadd.f32 %v2041_v7, %v4977_v2  ;;  %v2043_v62 = vpop.f32.mrb[225].mxu1 }
 0x413   :  { %v2044_v6 = vadd.f32 %v2043_v62, %v4980_v8  ;;  %v2045_v51 = vpop.f32.mrb[226].mxu1  ;;  %3048 = vmatprep.mubr.bf16.mxu0 %v2375_v15 }
 0x414   :  { %v2046_v26 = vadd.f32 %v2045_v51, %v4977_v2  ;;  %v2047_v29 = vpop.f32.mrb[227].mxu1  ;;  %3049 = vmatmul.mubr.bf16.gmra.mrb[140].mxu0 %v2374_v40  ;;  %v2250_v22 = vmax.f32 %v2042_v31, 0.0 }
 0x415   :  { %v2048_v61 = vadd.f32 %v2047_v29, %v4980_v8  ;;  %v2251_v20 = vmax.f32 %v2044_v6, 0.0 }
 0x416   :  { %v2254_v10 = vmax.f32 %v2046_v26, 0.0 }
 0x417   :  { %v2255_v23 = vmax.f32 %v2048_v61, 0.0 }
 0x418   :  { %v2378_v54 = vpack.c.bf16 %v2254_v10, %v2250_v22 }
 0x419   :  { %v2379_v37 = vpack.c.bf16 %v2255_v23, %v2251_v20  ;;  %v2051_v30 = vpop.f32.mrb[228].mxu1 }
 0x41a   :  { %v2052_v56 = vadd.f32 %v2051_v30, %v4977_v2  ;;  %v2053_v60 = vpop.f32.mrb[229].mxu1 }
 0x41b   :  { %v2054_v50 = vadd.f32 %v2053_v60, %v4980_v8  ;;  %v2055_v28 = vpop.f32.mrb[230].mxu1  ;;  %3056 = vmatprep.mubr.bf16.mxu0 %v2379_v37 }
 0x41c   :  { %v2056_v21 = vadd.f32 %v2055_v28, %v4977_v2  ;;  %v2057_v12 = vpop.f32.mrb[231].mxu1  ;;  %3057 = vmatmul.mubr.bf16.gmra.mrb[144].mxu0 %v2378_v54  ;;  %v2258_v43 = vmax.f32 %v2052_v56, 0.0 }
 0x41d   :  { %v2058_v9 = vadd.f32 %v2057_v12, %v4980_v8  ;;  %v2259_v49 = vmax.f32 %v2054_v50, 0.0 }
 0x41e   :  { %v2262_v5 = vmax.f32 %v2056_v21, 0.0 }
 0x41f   :  { %v2263_v33 = vmax.f32 %v2058_v9, 0.0 }
 0x420   :  { %v2382_v3 = vpack.c.bf16 %v2262_v5, %v2258_v43 }
 0x421   :  { %v2383_v47 = vpack.c.bf16 %v2263_v33, %v2259_v49  ;;  %v2061_v46 = vpop.f32.mrb[232].mxu1 }
 0x422   :  { %v2062_v16 = vadd.f32 %v2061_v46, %v4977_v2  ;;  %v2063_v0 = vpop.f32.mrb[233].mxu1 }
 0x423   :  { %v2064_v25 = vadd.f32 %v2063_v0, %v4980_v8  ;;  %v2065_v45 = vpop.f32.mrb[234].mxu1  ;;  %3064 = vmatprep.mubr.bf16.mxu0 %v2383_v47 }
 0x424   :  { %v2066_v41 = vadd.f32 %v2065_v45, %v4977_v2  ;;  %v2067_v34 = vpop.f32.mrb[235].mxu1  ;;  %3065 = vmatmul.mubr.bf16.gmra.mrb[148].mxu0 %v2382_v3  ;;  %v2266_v39 = vmax.f32 %v2062_v16, 0.0 }
 0x425   :  { %v2068_v17 = vadd.f32 %v2067_v34, %v4980_v8  ;;  %v2267_v57 = vmax.f32 %v2064_v25, 0.0 }
 0x426   :  { %v2270_v52 = vmax.f32 %v2066_v41, 0.0 }
 0x427   :  { %v2271_v14 = vmax.f32 %v2068_v17, 0.0 }
 0x428   :  { %v2386_v42 = vpack.c.bf16 %v2270_v52, %v2266_v39 }
 0x429   :  { %v2387_v55 = vpack.c.bf16 %v2271_v14, %v2267_v57  ;;  %v2071_v35 = vpop.f32.mrb[236].mxu1 }
 0x42a   :  { %v2072_v38 = vadd.f32 %v2071_v35, %v4977_v2  ;;  %v2073_v63 = vpop.f32.mrb[237].mxu1 }
 0x42b   :  { %v2074_v53 = vadd.f32 %v2073_v63, %v4980_v8  ;;  %v2075_v4 = vpop.f32.mrb[238].mxu1  ;;  %3072 = vmatprep.mubr.bf16.mxu0 %v2387_v55 }
 0x42c   :  { %v2076_v24 = vadd.f32 %v2075_v4, %v4977_v2  ;;  %v2077_v19 = vpop.f32.mrb[239].mxu1  ;;  %3073 = vmatmul.mubr.bf16.gmra.mrb[152].mxu0 %v2386_v42  ;;  %v2274_v1 = vmax.f32 %v2072_v38, 0.0 }
 0x42d   :  { %v2078_v44 = vadd.f32 %v2077_v19, %v4980_v8  ;;  %v2275_v59 = vmax.f32 %v2074_v53, 0.0 }
 0x42e   :  { %v2278_v58 = vmax.f32 %v2076_v24, 0.0 }
 0x42f   :  { %v2279_v48 = vmax.f32 %v2078_v44, 0.0 }
 0x430   :  { %v2390_v18 = vpack.c.bf16 %v2278_v58, %v2274_v1  ;;  %v5081_v1 = vld [vmem:[%s5434_s8] ss:$0 sm:$0xff] }
 0x431   :  { %v2391_v11 = vpack.c.bf16 %v2279_v48, %v2275_v59  ;;  %v2081_v27 = vpop.f32.mrb[240].mxu1 }
 0x432   :  { %v2082_v32 = vadd.f32 %v2081_v27, %v4977_v2  ;;  %v2083_v13 = vpop.f32.mrb[241].mxu1 }
 0x433   :  { %v2084_v36 = vadd.f32 %v2083_v13, %v4980_v8  ;;  %v2085_v40 = vpop.f32.mrb[242].mxu1  ;;  %3080 = vmatprep.mubr.bf16.mxu0 %v2391_v11 }
 0x434   :  { %v2086_v15 = vadd.f32 %v2085_v40, %v4977_v2  ;;  %v2087_v7 = vpop.f32.mrb[243].mxu1  ;;  %3081 = vmatmul.mubr.bf16.gmra.mrb[156].mxu0 %v2390_v18  ;;  %v2282_v62 = vmax.f32 %v2082_v32, 0.0 }
 0x435   :  { %v2088_v31 = vadd.f32 %v2087_v7, %v4980_v8  ;;  %v2283_v51 = vmax.f32 %v2084_v36, 0.0 }
 0x436   :  { %v2286_v6 = vmax.f32 %v2086_v15, 0.0 }
 0x437   :  { %v2287_v26 = vmax.f32 %v2088_v31, 0.0 }
 0x438   :  { %v2394_v29 = vpack.c.bf16 %v2286_v6, %v2282_v62 }
 0x439   :  { %v2395_v61 = vpack.c.bf16 %v2287_v26, %v2283_v51  ;;  %v2091_v22 = vpop.f32.mrb[244].mxu1 }
 0x43a   :  { %v2092_v10 = vadd.f32 %v2091_v22, %v4977_v2  ;;  %v2093_v20 = vpop.f32.mrb[245].mxu1 }
 0x43b   :  { %v2094_v23 = vadd.f32 %v2093_v20, %v4980_v8  ;;  %v2095_v54 = vpop.f32.mrb[246].mxu1  ;;  %3088 = vmatprep.mubr.bf16.mxu0 %v2395_v61 }
 0x43c   :  { %v2096_v37 = vadd.f32 %v2095_v54, %v4977_v2  ;;  %v2097_v30 = vpop.f32.mrb[247].mxu1  ;;  %3089 = vmatmul.mubr.bf16.gmra.mrb[160].mxu0 %v2394_v29  ;;  %v2290_v60 = vmax.f32 %v2092_v10, 0.0 }
 0x43d   :  { %v2098_v56 = vadd.f32 %v2097_v30, %v4980_v8  ;;  %v2291_v28 = vmax.f32 %v2094_v23, 0.0 }
 0x43e   :  { %v2294_v50 = vmax.f32 %v2096_v37, 0.0 }
 0x43f   :  { %v2295_v21 = vmax.f32 %v2098_v56, 0.0 }
 0x440   :  { %v2398_v12 = vpack.c.bf16 %v2294_v50, %v2290_v60 }
 0x441   :  { %v2399_v9 = vpack.c.bf16 %v2295_v21, %v2291_v28  ;;  %v2101_v43 = vpop.f32.mrb[248].mxu1 }
 0x442   :  { %v2102_v5 = vadd.f32 %v2101_v43, %v4977_v2  ;;  %v2103_v49 = vpop.f32.mrb[249].mxu1 }
 0x443   :  { %v2104_v33 = vadd.f32 %v2103_v49, %v4980_v8  ;;  %v2105_v3 = vpop.f32.mrb[250].mxu1  ;;  %3096 = vmatprep.mubr.bf16.mxu0 %v2399_v9 }
 0x444   :  { %v2106_v47 = vadd.f32 %v2105_v3, %v4977_v2  ;;  %v2107_v46 = vpop.f32.mrb[251].mxu1  ;;  %3097 = vmatmul.mubr.bf16.gmra.mrb[164].mxu0 %v2398_v12  ;;  %v2298_v0 = vmax.f32 %v2102_v5, 0.0 }
 0x445   :  { %v2108_v16 = vadd.f32 %v2107_v46, %v4980_v8  ;;  %v2299_v45 = vmax.f32 %v2104_v33, 0.0 }
 0x446   :  { %v2302_v25 = vmax.f32 %v2106_v47, 0.0 }
 0x447   :  { %v2303_v41 = vmax.f32 %v2108_v16, 0.0 }
 0x448   :  { %v2402_v34 = vpack.c.bf16 %v2302_v25, %v2298_v0 }
 0x449   :  { %v2403_v17 = vpack.c.bf16 %v2303_v41, %v2299_v45  ;;  %v2111_v39 = vpop.f32.mrb[252].mxu1 }
 0x44a   :  { %v2112_v52 = vadd.f32 %v2111_v39, %v4977_v2  ;;  %v2113_v57 = vpop.f32.mrb[253].mxu1 }
 0x44b   :  { %v2114_v14 = vadd.f32 %v2113_v57, %v4980_v8  ;;  %v2115_v42 = vpop.f32.mrb[254].mxu1  ;;  %3104 = vmatprep.mubr.bf16.mxu0 %v2403_v17 }
 0x44c   :  { %v2116_v55 = vadd.f32 %v2115_v42, %v4977_v2  ;;  %v2117_v35 = vpop.f32.mrb[255].mxu1  ;;  %3105 = vmatmul.mubr.bf16.gmra.mrb[168].mxu0 %v2402_v34  ;;  %v2306_v63 = vmax.f32 %v2112_v52, 0.0 }
 0x44d   :  { %v2118_v38 = vadd.f32 %v2117_v35, %v4980_v8  ;;  %v2307_v4 = vmax.f32 %v2114_v14, 0.0  ;;  %v5087_v8 = vld [vmem:[%s5435_s9] ss:$0 sm:$0xff] }
 0x44e   :  { %v2310_v53 = vmax.f32 %v2116_v55, 0.0 }
 0x44f   :  { %v2311_v24 = vmax.f32 %v2118_v38, 0.0 }
 0x450   :  { %v2406_v19 = vpack.c.bf16 %v2310_v53, %v2306_v63 }
 0x451   :  { %v2407_v44 = vpack.c.bf16 %v2311_v24, %v2307_v4 }
 0x453   :  { %3112 = vmatprep.mubr.bf16.mxu0 %v2407_v44 }
 0x454   :  { %3113 = vmatmul.mubr.bf16.gmra.mrb[172].mxu0 %v2406_v19 }
 0x46f   :  { %v2930_v58 = vpop.f32.mrb[80].mxu0 }
 0x470   :  { %v3706_v2 = vadd.f32 %v5081_v1, %v2930_v58  ;;  %v2932_v59 = vpop.f32.mrb[81].mxu0 }
 0x471   :  { %v2933_v48 = vpop.f32.mrb[82].mxu0 }
 0x472   :  { %v3121_v18 = vmax.f32 %v3706_v2, 0.0  ;;  %v3707_v11 = vadd.f32 %v5081_v1, %v2933_v48  ;;  %v2935_v27 = vpop.f32.mrb[83].mxu0 }
 0x474   :  { %v3122_v32 = vmax.f32 %v3707_v11, 0.0  ;;  %v3176_v13 = vmul.f32 %v5087_v8, %v3121_v18 }
 0x476   :  { %3224 = vadd.xlane.f32.xlu0 %v3176_v13  ;;  %v3177_v7 = vmul.f32 %v5087_v8, %v3122_v32 }
 0x477   :  { %v2938_v36 = vpop.f32.mrb[84].mxu0 }
 0x478   :  { %v3708_v40 = vadd.f32 %v5081_v1, %v2938_v36  ;;  %v2940_v15 = vpop.f32.mrb[85].mxu0 }
 0x479   :  { %v2941_v31 = vpop.f32.mrb[86].mxu0 }
 0x47a   :  { %v3123_v62 = vmax.f32 %v3708_v40, 0.0  ;;  %v3709_v6 = vadd.f32 %v5081_v1, %v2941_v31  ;;  %v2943_v51 = vpop.f32.mrb[87].mxu0  ;;  %3226 = vadd.xlane.f32.xlu0 %v3177_v7 }
 0x47c   :  { %v3124_v26 = vmax.f32 %v3709_v6, 0.0  ;;  %v3178_v29 = vmul.f32 %v5087_v8, %v3123_v62 }
 0x47e   :  { %3228 = vadd.xlane.f32.xlu1 %v3178_v29  ;;  %v3179_v20 = vmul.f32 %v5087_v8, %v3124_v26 }
 0x47f   :  { %v2946_v61 = vpop.f32.mrb[88].mxu0 }
 0x480   :  { %v3710_v22 = vadd.f32 %v5081_v1, %v2946_v61  ;;  %v2948_v10 = vpop.f32.mrb[89].mxu0 }
 0x481   :  { %v2949_v23 = vpop.f32.mrb[90].mxu0 }
 0x482   :  { %v3125_v54 = vmax.f32 %v3710_v22, 0.0  ;;  %v3711_v37 = vadd.f32 %v5081_v1, %v2949_v23  ;;  %v2951_v30 = vpop.f32.mrb[91].mxu0  ;;  %3230 = vadd.xlane.f32.xlu1 %v3179_v20 }
 0x484   :  { %v3126_v56 = vmax.f32 %v3711_v37, 0.0  ;;  %v3180_v60 = vmul.f32 %v5087_v8, %v3125_v54 }
 0x486   :  { %3232 = vadd.xlane.f32.xlu0 %v3180_v60  ;;  %v3181_v50 = vmul.f32 %v5087_v8, %v3126_v56 }
 0x487   :  { %v2954_v28 = vpop.f32.mrb[92].mxu0 }
 0x488   :  { %v3712_v21 = vadd.f32 %v5081_v1, %v2954_v28  ;;  %v2956_v12 = vpop.f32.mrb[93].mxu0  ;;  %3234 = vadd.xlane.f32.xlu1 %v3181_v50 }
 0x489   :  { %v2957_v9 = vpop.f32.mrb[94].mxu0 }
 0x48a   :  { %v3127_v43 = vmax.f32 %v3712_v21, 0.0  ;;  %v3713_v5 = vadd.f32 %v5081_v1, %v2957_v9  ;;  %v2959_v49 = vpop.f32.mrb[95].mxu0 }
 0x48c   :  { %v3128_v33 = vmax.f32 %v3713_v5, 0.0  ;;  %v3182_v3 = vmul.f32 %v5087_v8, %v3127_v43 }
 0x48e   :  { %3236 = vadd.xlane.f32.xlu0 %v3182_v3  ;;  %v3183_v47 = vmul.f32 %v5087_v8, %v3128_v33 }
 0x48f   :  { %v2962_v46 = vpop.f32.mrb[96].mxu0 }
 0x490   :  { %v3714_v16 = vadd.f32 %v5081_v1, %v2962_v46  ;;  %v2964_v0 = vpop.f32.mrb[97].mxu0  ;;  %3238 = vadd.xlane.f32.xlu1 %v3183_v47 }
 0x491   :  { %v2965_v25 = vpop.f32.mrb[98].mxu0 }
 0x492   :  { %v3129_v45 = vmax.f32 %v3714_v16, 0.0  ;;  %v3715_v41 = vadd.f32 %v5081_v1, %v2965_v25  ;;  %v2967_v34 = vpop.f32.mrb[99].mxu0 }
 0x494   :  { %v3130_v17 = vmax.f32 %v3715_v41, 0.0  ;;  %v3184_v39 = vmul.f32 %v5087_v8, %v3129_v45 }
 0x496   :  { %3240 = vadd.xlane.f32.xlu0 %v3184_v39  ;;  %v3185_v52 = vmul.f32 %v5087_v8, %v3130_v17 }
 0x497   :  { %v2970_v57 = vpop.f32.mrb[100].mxu0 }
 0x498   :  { %v3716_v14 = vadd.f32 %v5081_v1, %v2970_v57  ;;  %v2972_v42 = vpop.f32.mrb[101].mxu0  ;;  %3242 = vadd.xlane.f32.xlu1 %v3185_v52 }
 0x499   :  { %v2973_v55 = vpop.f32.mrb[102].mxu0 }
 0x49a   :  { %v3131_v35 = vmax.f32 %v3716_v14, 0.0  ;;  %v3717_v38 = vadd.f32 %v5081_v1, %v2973_v55  ;;  %v2975_v63 = vpop.f32.mrb[103].mxu0 }
 0x49c   :  { %v3132_v53 = vmax.f32 %v3717_v38, 0.0  ;;  %v3186_v4 = vmul.f32 %v5087_v8, %v3131_v35 }
 0x49e   :  { %3244 = vadd.xlane.f32.xlu0 %v3186_v4  ;;  %v3187_v24 = vmul.f32 %v5087_v8, %v3132_v53 }
 0x49f   :  { %v2978_v19 = vpop.f32.mrb[104].mxu0 }
 0x4a0   :  { %v3718_v44 = vadd.f32 %v5081_v1, %v2978_v19  ;;  %v2980_v58 = vpop.f32.mrb[105].mxu0  ;;  %3246 = vadd.xlane.f32.xlu1 %v3187_v24 }
 0x4a1   :  { %v2981_v2 = vpop.f32.mrb[106].mxu0 }
 0x4a2   :  { %v3133_v59 = vmax.f32 %v3718_v44, 0.0  ;;  %v3719_v48 = vadd.f32 %v5081_v1, %v2981_v2  ;;  %v2983_v18 = vpop.f32.mrb[107].mxu0 }
 0x4a4   :  { %v3134_v11 = vmax.f32 %v3719_v48, 0.0  ;;  %v3188_v27 = vmul.f32 %v5087_v8, %v3133_v59 }
 0x4a6   :  { %3248 = vadd.xlane.f32.xlu0 %v3188_v27  ;;  %v3189_v32 = vmul.f32 %v5087_v8, %v3134_v11 }
 0x4a7   :  { %v2986_v13 = vpop.f32.mrb[108].mxu0 }
 0x4a8   :  { %v3720_v36 = vadd.f32 %v5081_v1, %v2986_v13  ;;  %v2988_v40 = vpop.f32.mrb[109].mxu0  ;;  %3250 = vadd.xlane.f32.xlu1 %v3189_v32 }
 0x4a9   :  { %v2989_v15 = vpop.f32.mrb[110].mxu0 }
 0x4aa   :  { %v3135_v7 = vmax.f32 %v3720_v36, 0.0  ;;  %v3721_v31 = vadd.f32 %v5081_v1, %v2989_v15  ;;  %v2991_v62 = vpop.f32.mrb[111].mxu0 }
 0x4ac   :  { %v3136_v6 = vmax.f32 %v3721_v31, 0.0  ;;  %v3190_v51 = vmul.f32 %v5087_v8, %v3135_v7 }
 0x4ae   :  { %3252 = vadd.xlane.f32.xlu0 %v3190_v51  ;;  %v3191_v26 = vmul.f32 %v5087_v8, %v3136_v6 }
 0x4af   :  { %v2994_v29 = vpop.f32.mrb[112].mxu0 }
 0x4b0   :  { %v3722_v61 = vadd.f32 %v5081_v1, %v2994_v29  ;;  %v2996_v22 = vpop.f32.mrb[113].mxu0  ;;  %3254 = vadd.xlane.f32.xlu1 %v3191_v26 }
 0x4b1   :  { %v2997_v10 = vpop.f32.mrb[114].mxu0 }
 0x4b2   :  { %v3137_v20 = vmax.f32 %v3722_v61, 0.0  ;;  %v3723_v23 = vadd.f32 %v5081_v1, %v2997_v10  ;;  %v2999_v54 = vpop.f32.mrb[115].mxu0 }
 0x4b4   :  { %v3138_v37 = vmax.f32 %v3723_v23, 0.0  ;;  %v3192_v30 = vmul.f32 %v5087_v8, %v3137_v20 }
 0x4b6   :  { %3256 = vadd.xlane.f32.xlu0 %v3192_v30  ;;  %v3193_v56 = vmul.f32 %v5087_v8, %v3138_v37 }
 0x4b7   :  { %v3002_v60 = vpop.f32.mrb[116].mxu0 }
 0x4b8   :  { %v3724_v50 = vadd.f32 %v5081_v1, %v3002_v60  ;;  %v3004_v28 = vpop.f32.mrb[117].mxu0  ;;  %3258 = vadd.xlane.f32.xlu1 %v3193_v56 }
 0x4b9   :  { %v3005_v21 = vpop.f32.mrb[118].mxu0 }
 0x4ba   :  { %v3139_v12 = vmax.f32 %v3724_v50, 0.0  ;;  %v3725_v9 = vadd.f32 %v5081_v1, %v3005_v21  ;;  %v3007_v43 = vpop.f32.mrb[119].mxu0 }
 0x4bc   :  { %v3140_v5 = vmax.f32 %v3725_v9, 0.0  ;;  %v3194_v49 = vmul.f32 %v5087_v8, %v3139_v12 }
 0x4be   :  { %3260 = vadd.xlane.f32.xlu0 %v3194_v49  ;;  %v3195_v33 = vmul.f32 %v5087_v8, %v3140_v5 }
 0x4bf   :  { %v3010_v3 = vpop.f32.mrb[120].mxu0 }
 0x4c0   :  { %v3726_v47 = vadd.f32 %v5081_v1, %v3010_v3  ;;  %v3012_v46 = vpop.f32.mrb[121].mxu0  ;;  %3262 = vadd.xlane.f32.xlu1 %v3195_v33 }
 0x4c1   :  { %v3013_v16 = vpop.f32.mrb[122].mxu0 }
 0x4c2   :  { %v3141_v0 = vmax.f32 %v3726_v47, 0.0  ;;  %v3727_v25 = vadd.f32 %v5081_v1, %v3013_v16  ;;  %v3015_v45 = vpop.f32.mrb[123].mxu0 }
 0x4c4   :  { %v3142_v41 = vmax.f32 %v3727_v25, 0.0  ;;  %v3196_v34 = vmul.f32 %v5087_v8, %v3141_v0 }
 0x4c6   :  { %3264 = vadd.xlane.f32.xlu0 %v3196_v34  ;;  %v3197_v17 = vmul.f32 %v5087_v8, %v3142_v41 }
 0x4c7   :  { %v3018_v39 = vpop.f32.mrb[124].mxu0 }
 0x4c8   :  { %v3728_v52 = vadd.f32 %v5081_v1, %v3018_v39  ;;  %v3020_v57 = vpop.f32.mrb[125].mxu0  ;;  %3266 = vadd.xlane.f32.xlu1 %v3197_v17 }
 0x4c9   :  { %v3021_v14 = vpop.f32.mrb[126].mxu0 }
 0x4ca   :  { %v3143_v42 = vmax.f32 %v3728_v52, 0.0  ;;  %v3729_v55 = vadd.f32 %v5081_v1, %v3021_v14  ;;  %v3023_v35 = vpop.f32.mrb[127].mxu0 }
 0x4cc   :  { %v3144_v38 = vmax.f32 %v3729_v55, 0.0  ;;  %v3198_v63 = vmul.f32 %v5087_v8, %v3143_v42 }
 0x4ce   :  { %3268 = vadd.xlane.f32.xlu0 %v3198_v63  ;;  %v3199_v53 = vmul.f32 %v5087_v8, %v3144_v38 }
 0x4cf   :  { %v3026_v4 = vpop.f32.mrb[128].mxu0 }
 0x4d0   :  { %v3730_v24 = vadd.f32 %v5081_v1, %v3026_v4  ;;  %v3028_v19 = vpop.f32.mrb[129].mxu0  ;;  %3270 = vadd.xlane.f32.xlu1 %v3199_v53 }
 0x4d1   :  { %v3029_v44 = vpop.f32.mrb[130].mxu0  ;;  %v5161_v19 = vld [vmem:[#allocation2] ss:$0 sm:$0xff] }
 0x4d2   :  { %v3145_v58 = vmax.f32 %v3730_v24, 0.0  ;;  %v3731_v2 = vadd.f32 %v5081_v1, %v3029_v44  ;;  %v3031_v59 = vpop.f32.mrb[131].mxu0 }
 0x4d4   :  { %v3146_v48 = vmax.f32 %v3731_v2, 0.0  ;;  %v3200_v18 = vmul.f32 %v5087_v8, %v3145_v58 }
 0x4d6   :  { %3272 = vadd.xlane.f32.xlu0 %v3200_v18  ;;  %v3201_v11 = vmul.f32 %v5087_v8, %v3146_v48 }
 0x4d7   :  { %v3034_v27 = vpop.f32.mrb[132].mxu0 }
 0x4d8   :  { %v3732_v32 = vadd.f32 %v5081_v1, %v3034_v27  ;;  %v3036_v13 = vpop.f32.mrb[133].mxu0  ;;  %3274 = vadd.xlane.f32.xlu1 %v3201_v11 }
 0x4d9   :  { %v3037_v36 = vpop.f32.mrb[134].mxu0 }
 0x4da   :  { %v3147_v40 = vmax.f32 %v3732_v32, 0.0  ;;  %v3733_v15 = vadd.f32 %v5081_v1, %v3037_v36  ;;  %v3039_v7 = vpop.f32.mrb[135].mxu0 }
 0x4dc   :  { %v3148_v31 = vmax.f32 %v3733_v15, 0.0  ;;  %v3202_v62 = vmul.f32 %v5087_v8, %v3147_v40 }
 0x4de   :  { %3276 = vadd.xlane.f32.xlu0 %v3202_v62  ;;  %v3203_v6 = vmul.f32 %v5087_v8, %v3148_v31 }
 0x4df   :  { %v3042_v51 = vpop.f32.mrb[136].mxu0 }
 0x4e0   :  { %v3734_v26 = vadd.f32 %v5081_v1, %v3042_v51  ;;  %v3044_v29 = vpop.f32.mrb[137].mxu0  ;;  %3278 = vadd.xlane.f32.xlu1 %v3203_v6 }
 0x4e1   :  { %v3045_v61 = vpop.f32.mrb[138].mxu0 }
 0x4e2   :  { %v3149_v22 = vmax.f32 %v3734_v26, 0.0  ;;  %v3735_v10 = vadd.f32 %v5081_v1, %v3045_v61  ;;  %v3047_v20 = vpop.f32.mrb[139].mxu0 }
 0x4e4   :  { %v3150_v23 = vmax.f32 %v3735_v10, 0.0  ;;  %v3204_v54 = vmul.f32 %v5087_v8, %v3149_v22 }
 0x4e6   :  { %3280 = vadd.xlane.f32.xlu0 %v3204_v54  ;;  %v3205_v37 = vmul.f32 %v5087_v8, %v3150_v23 }
 0x4e7   :  { %v3050_v30 = vpop.f32.mrb[140].mxu0 }
 0x4e8   :  { %v3736_v56 = vadd.f32 %v5081_v1, %v3050_v30  ;;  %v3052_v60 = vpop.f32.mrb[141].mxu0  ;;  %3282 = vadd.xlane.f32.xlu1 %v3205_v37 }
 0x4e9   :  { %v3053_v50 = vpop.f32.mrb[142].mxu0 }
 0x4ea   :  { %v3151_v28 = vmax.f32 %v3736_v56, 0.0  ;;  %v3737_v21 = vadd.f32 %v5081_v1, %v3053_v50  ;;  %v3055_v12 = vpop.f32.mrb[143].mxu0 }
 0x4ec   :  { %v3152_v9 = vmax.f32 %v3737_v21, 0.0  ;;  %v3206_v43 = vmul.f32 %v5087_v8, %v3151_v28 }
 0x4ee   :  { %3284 = vadd.xlane.f32.xlu0 %v3206_v43  ;;  %v3207_v5 = vmul.f32 %v5087_v8, %v3152_v9 }
 0x4ef   :  { %v3058_v49 = vpop.f32.mrb[144].mxu0 }
 0x4f0   :  { %v3738_v33 = vadd.f32 %v5081_v1, %v3058_v49  ;;  %v3060_v3 = vpop.f32.mrb[145].mxu0  ;;  %3286 = vadd.xlane.f32.xlu1 %v3207_v5 }
 0x4f1   :  { %v3061_v47 = vpop.f32.mrb[146].mxu0 }
 0x4f2   :  { %v3153_v46 = vmax.f32 %v3738_v33, 0.0  ;;  %v3739_v16 = vadd.f32 %v5081_v1, %v3061_v47  ;;  %v3063_v0 = vpop.f32.mrb[147].mxu0 }
 0x4f4   :  { %v3154_v25 = vmax.f32 %v3739_v16, 0.0  ;;  %v3208_v45 = vmul.f32 %v5087_v8, %v3153_v46 }
 0x4f6   :  { %3288 = vadd.xlane.f32.xlu0 %v3208_v45  ;;  %v3209_v41 = vmul.f32 %v5087_v8, %v3154_v25 }
 0x4f7   :  { %v3066_v34 = vpop.f32.mrb[148].mxu0 }
 0x4f8   :  { %v3740_v17 = vadd.f32 %v5081_v1, %v3066_v34  ;;  %v3068_v39 = vpop.f32.mrb[149].mxu0  ;;  %3290 = vadd.xlane.f32.xlu1 %v3209_v41 }
 0x4f9   :  { %v3069_v52 = vpop.f32.mrb[150].mxu0 }
 0x4fa   :  { %v3155_v57 = vmax.f32 %v3740_v17, 0.0  ;;  %v3741_v14 = vadd.f32 %v5081_v1, %v3069_v52  ;;  %v3071_v42 = vpop.f32.mrb[151].mxu0 }
 0x4fc   :  { %v3156_v55 = vmax.f32 %v3741_v14, 0.0  ;;  %v3210_v35 = vmul.f32 %v5087_v8, %v3155_v57 }
 0x4fe   :  { %3292 = vadd.xlane.f32.xlu0 %v3210_v35  ;;  %v3211_v38 = vmul.f32 %v5087_v8, %v3156_v55 }
 0x4ff   :  { %v3074_v63 = vpop.f32.mrb[152].mxu0 }
 0x500   :  { %v3742_v53 = vadd.f32 %v5081_v1, %v3074_v63  ;;  %v3076_v4 = vpop.f32.mrb[153].mxu0  ;;  %3294 = vadd.xlane.f32.xlu1 %v3211_v38 }
 0x501   :  { %v3077_v24 = vpop.f32.mrb[154].mxu0 }
 0x502   :  { %v3157_v44 = vmax.f32 %v3742_v53, 0.0  ;;  %v3743_v58 = vadd.f32 %v5081_v1, %v3077_v24  ;;  %v3079_v2 = vpop.f32.mrb[155].mxu0 }
 0x503   :  { %v3225_v59 = vpop.xlane.xlu0 %3224 }
 0x504   :  { %v3158_v48 = vmax.f32 %v3743_v58, 0.0  ;;  %v3327_v18 = vadd.f32 %v5161_v19, %v3225_v59  ;;  %v3212_v11 = vmul.f32 %v5087_v8, %v3157_v44 }
 0x506   :  { %3376 = vst.msk [vmem:[%s5437_s11] sm:$0xff] %vm3375_vm1, %v3327_v18  ;;  %3296 = vadd.xlane.f32.xlu0 %v3212_v11  ;;  %v3213_v27 = vmul.f32 %v5087_v8, %v3158_v48 }
 0x507   :  { %v3082_v32 = vpop.f32.mrb[156].mxu0  ;;  %v3227_v13 = vpop.xlane.xlu0 %3226 }
 0x508   :  { %v3744_v36 = vadd.f32 %v5081_v1, %v3082_v32  ;;  %v3328_v40 = vadd.f32 %v5161_v19, %v3227_v13  ;;  %v3084_v15 = vpop.f32.mrb[157].mxu0  ;;  %3298 = vadd.xlane.f32.xlu1 %v3213_v27 }
 0x509   :  { %v3085_v7 = vpop.f32.mrb[158].mxu0 }
 0x50a   :  { %v3159_v31 = vmax.f32 %v3744_v36, 0.0  ;;  %3377 = vst.msk [vmem:[%s5437_s11 + $0x8] sm:$0xff] %vm3375_vm1, %v3328_v40  ;;  %v3745_v62 = vadd.f32 %v5081_v1, %v3085_v7  ;;  %v3087_v6 = vpop.f32.mrb[159].mxu0 }
 0x50b   :  { %v3229_v51 = vpop.xlane.xlu1 %3228 }
 0x50c   :  { %v3160_v26 = vmax.f32 %v3745_v62, 0.0  ;;  %v3329_v29 = vadd.f32 %v5161_v19, %v3229_v51  ;;  %v3214_v61 = vmul.f32 %v5087_v8, %v3159_v31 }
 0x50e   :  { %3378 = vst.msk [vmem:[%s5437_s11 + $0x10] sm:$0xff] %vm3375_vm1, %v3329_v29  ;;  %3300 = vadd.xlane.f32.xlu0 %v3214_v61  ;;  %v3215_v22 = vmul.f32 %v5087_v8, %v3160_v26 }
 0x50f   :  { %v3090_v10 = vpop.f32.mrb[160].mxu0  ;;  %v3231_v20 = vpop.xlane.xlu1 %3230 }
 0x510   :  { %v3746_v23 = vadd.f32 %v5081_v1, %v3090_v10  ;;  %v3330_v54 = vadd.f32 %v5161_v19, %v3231_v20  ;;  %v3092_v37 = vpop.f32.mrb[161].mxu0  ;;  %3302 = vadd.xlane.f32.xlu1 %v3215_v22 }
 0x511   :  { %v3093_v30 = vpop.f32.mrb[162].mxu0 }
 0x512   :  { %v3161_v56 = vmax.f32 %v3746_v23, 0.0  ;;  %3379 = vst.msk [vmem:[%s5437_s11 + $0x18] sm:$0xff] %vm3375_vm1, %v3330_v54  ;;  %v3747_v60 = vadd.f32 %v5081_v1, %v3093_v30  ;;  %v3095_v50 = vpop.f32.mrb[163].mxu0 }
 0x513   :  { %v3233_v28 = vpop.xlane.xlu0 %3232 }
 0x514   :  { %v3162_v21 = vmax.f32 %v3747_v60, 0.0  ;;  %v3331_v12 = vadd.f32 %v5161_v19, %v3233_v28  ;;  %v3216_v9 = vmul.f32 %v5087_v8, %v3161_v56 }
 0x515   :  { %v3235_v43 = vpop.xlane.xlu1 %3234 }
 0x516   :  { %3380 = vst.msk [vmem:[%s5437_s11 + $0x20] sm:$0xff] %vm3375_vm1, %v3331_v12  ;;  %v3332_v5 = vadd.f32 %v5161_v19, %v3235_v43  ;;  %3304 = vadd.xlane.f32.xlu0 %v3216_v9  ;;  %v3217_v49 = vmul.f32 %v5087_v8, %v3162_v21 }
 0x517   :  { %v3098_v33 = vpop.f32.mrb[164].mxu0 }
 0x518   :  { %3381 = vst.msk [vmem:[%s5437_s11 + $0x28] sm:$0xff] %vm3375_vm1, %v3332_v5  ;;  %v3748_v3 = vadd.f32 %v5081_v1, %v3098_v33  ;;  %v3100_v47 = vpop.f32.mrb[165].mxu0  ;;  %3306 = vadd.xlane.f32.xlu1 %v3217_v49 }
 0x519   :  { %v3101_v46 = vpop.f32.mrb[166].mxu0 }
 0x51a   :  { %v3163_v16 = vmax.f32 %v3748_v3, 0.0  ;;  %v3749_v0 = vadd.f32 %v5081_v1, %v3101_v46  ;;  %v3103_v25 = vpop.f32.mrb[167].mxu0 }
 0x51b   :  { %v3237_v45 = vpop.xlane.xlu0 %3236 }
 0x51c   :  { %v3164_v41 = vmax.f32 %v3749_v0, 0.0  ;;  %v3333_v34 = vadd.f32 %v5161_v19, %v3237_v45  ;;  %v3218_v17 = vmul.f32 %v5087_v8, %v3163_v16 }
 0x51d   :  { %v3239_v39 = vpop.xlane.xlu1 %3238 }
 0x51e   :  { %3382 = vst.msk [vmem:[%s5437_s11 + $0x30] sm:$0xff] %vm3375_vm1, %v3333_v34  ;;  %v3334_v52 = vadd.f32 %v5161_v19, %v3239_v39  ;;  %3308 = vadd.xlane.f32.xlu0 %v3218_v17  ;;  %v3219_v57 = vmul.f32 %v5087_v8, %v3164_v41 }
 0x51f   :  { %v3106_v14 = vpop.f32.mrb[168].mxu0 }
 0x520   :  { %3383 = vst.msk [vmem:[%s5437_s11 + $0x38] sm:$0xff] %vm3375_vm1, %v3334_v52  ;;  %v3750_v42 = vadd.f32 %v5081_v1, %v3106_v14  ;;  %v3108_v55 = vpop.f32.mrb[169].mxu0  ;;  %3310 = vadd.xlane.f32.xlu1 %v3219_v57 }
 0x521   :  { %v3109_v35 = vpop.f32.mrb[170].mxu0 }
 0x522   :  { %v3165_v38 = vmax.f32 %v3750_v42, 0.0  ;;  %v3751_v63 = vadd.f32 %v5081_v1, %v3109_v35  ;;  %v3111_v53 = vpop.f32.mrb[171].mxu0 }
 0x523   :  { %v3241_v4 = vpop.xlane.xlu0 %3240 }
 0x524   :  { %v3166_v24 = vmax.f32 %v3751_v63, 0.0  ;;  %v3335_v44 = vadd.f32 %v5161_v19, %v3241_v4  ;;  %v3220_v58 = vmul.f32 %v5087_v8, %v3165_v38 }
 0x525   :  { %v3243_v2 = vpop.xlane.xlu1 %3242 }
 0x526   :  { %3384 = vst.msk [vmem:[%s5437_s11 + $0x40] sm:$0xff] %vm3375_vm1, %v3335_v44  ;;  %v3336_v59 = vadd.f32 %v5161_v19, %v3243_v2  ;;  %3312 = vadd.xlane.f32.xlu0 %v3220_v58  ;;  %v3221_v48 = vmul.f32 %v5087_v8, %v3166_v24 }
 0x527   :  { %v3114_v18 = vpop.f32.mrb[172].mxu0 }
 0x528   :  { %3385 = vst.msk [vmem:[%s5437_s11 + $0x48] sm:$0xff] %vm3375_vm1, %v3336_v59  ;;  %v3752_v11 = vadd.f32 %v5081_v1, %v3114_v18  ;;  %v3116_v27 = vpop.f32.mrb[173].mxu0  ;;  %3314 = vadd.xlane.f32.xlu1 %v3221_v48 }
 0x529   :  { %v3117_v32 = vpop.f32.mrb[174].mxu0 }
 0x52a   :  { %v3167_v13 = vmax.f32 %v3752_v11, 0.0  ;;  %v3753_v36 = vadd.f32 %v5081_v1, %v3117_v32  ;;  %v3119_v40 = vpop.f32.mrb[175].mxu0 }
 0x52b   :  { %v3245_v15 = vpop.xlane.xlu0 %3244 }
 0x52c   :  { %v3168_v7 = vmax.f32 %v3753_v36, 0.0  ;;  %v3337_v31 = vadd.f32 %v5161_v19, %v3245_v15  ;;  %v3222_v62 = vmul.f32 %v5087_v8, %v3167_v13 }
 0x52d   :  { %v3247_v6 = vpop.xlane.xlu1 %3246 }
 0x52e   :  { %3386 = vst.msk [vmem:[%s5437_s11 + $0x50] sm:$0xff] %vm3375_vm1, %v3337_v31  ;;  %v3338_v51 = vadd.f32 %v5161_v19, %v3247_v6  ;;  %3316 = vadd.xlane.f32.xlu0 %v3222_v62  ;;  %v3223_v26 = vmul.f32 %v5087_v8, %v3168_v7 }
 0x530   :  { %3387 = vst.msk [vmem:[%s5437_s11 + $0x58] sm:$0xff] %vm3375_vm1, %v3338_v51  ;;  %3318 = vadd.xlane.f32.xlu1 %v3223_v26 }
 0x533   :  { %v3249_v1 = vpop.xlane.xlu0 %3248 }
 0x534   :  { %v3339_v29 = vadd.f32 %v5161_v19, %v3249_v1 }
 0x535   :  { %v3251_v61 = vpop.xlane.xlu1 %3250 }
 0x536   :  { %3388 = vst.msk [vmem:[%s5437_s11 + $0x60] sm:$0xff] %vm3375_vm1, %v3339_v29  ;;  %v3340_v22 = vadd.f32 %v5161_v19, %v3251_v61 }
 0x538   :  { %3389 = vst.msk [vmem:[%s5437_s11 + $0x68] sm:$0xff] %vm3375_vm1, %v3340_v22 }
 0x53b   :  { %v3253_v8 = vpop.xlane.xlu0 %3252 }
 0x53c   :  { %v3341_v10 = vadd.f32 %v5161_v19, %v3253_v8 }
 0x53d   :  { %v3255_v20 = vpop.xlane.xlu1 %3254 }
 0x53e   :  { %3390 = vst.msk [vmem:[%s5437_s11 + $0x70] sm:$0xff] %vm3375_vm1, %v3341_v10  ;;  %v3342_v23 = vadd.f32 %v5161_v19, %v3255_v20 }
 0x540   :  { %3391 = vst.msk [vmem:[%s5437_s11 + $0x78] sm:$0xff] %vm3375_vm1, %v3342_v23 }
 0x543   :  { %v3257_v54 = vpop.xlane.xlu0 %3256 }
 0x544   :  { %v3343_v37 = vadd.f32 %v5161_v19, %v3257_v54 }
 0x545   :  { %v3259_v30 = vpop.xlane.xlu1 %3258 }
 0x546   :  { %3392 = vst.msk [vmem:[%s5437_s11 + $0x80] sm:$0xff] %vm3375_vm1, %v3343_v37  ;;  %v3344_v56 = vadd.f32 %v5161_v19, %v3259_v30 }
 0x548   :  { %3393 = vst.msk [vmem:[%s5437_s11 + $0x88] sm:$0xff] %vm3375_vm1, %v3344_v56 }
 0x54b   :  { %v3261_v60 = vpop.xlane.xlu0 %3260 }
 0x54c   :  { %v3345_v50 = vadd.f32 %v5161_v19, %v3261_v60 }
 0x54d   :  { %v3263_v28 = vpop.xlane.xlu1 %3262 }
 0x54e   :  { %3394 = vst.msk [vmem:[%s5437_s11 + $0x90] sm:$0xff] %vm3375_vm1, %v3345_v50  ;;  %v3346_v21 = vadd.f32 %v5161_v19, %v3263_v28 }
 0x550   :  { %3395 = vst.msk [vmem:[%s5437_s11 + $0x98] sm:$0xff] %vm3375_vm1, %v3346_v21 }
 0x553   :  { %v3265_v12 = vpop.xlane.xlu0 %3264 }
 0x554   :  { %v3347_v9 = vadd.f32 %v5161_v19, %v3265_v12 }
 0x555   :  { %v3267_v43 = vpop.xlane.xlu1 %3266 }
 0x556   :  { %3396 = vst.msk [vmem:[%s5437_s11 + $0xa0] sm:$0xff] %vm3375_vm1, %v3347_v9  ;;  %v3348_v5 = vadd.f32 %v5161_v19, %v3267_v43 }
 0x558   :  { %3397 = vst.msk [vmem:[%s5437_s11 + $0xa8] sm:$0xff] %vm3375_vm1, %v3348_v5 }
 0x55b   :  { %v3269_v49 = vpop.xlane.xlu0 %3268 }
 0x55c   :  { %v3349_v33 = vadd.f32 %v5161_v19, %v3269_v49 }
 0x55d   :  { %v3271_v3 = vpop.xlane.xlu1 %3270 }
 0x55e   :  { %3398 = vst.msk [vmem:[%s5437_s11 + $0xb0] sm:$0xff] %vm3375_vm1, %v3349_v33  ;;  %v3350_v47 = vadd.f32 %v5161_v19, %v3271_v3 }
 0x560   :  { %3399 = vst.msk [vmem:[%s5437_s11 + $0xb8] sm:$0xff] %vm3375_vm1, %v3350_v47 }
 0x563   :  { %v3273_v46 = vpop.xlane.xlu0 %3272 }
 0x564   :  { %v3351_v16 = vadd.f32 %v5161_v19, %v3273_v46 }
 0x565   :  { %v3275_v0 = vpop.xlane.xlu1 %3274 }
 0x566   :  { %3400 = vst.msk [vmem:[%s5437_s11 + $0xc0] sm:$0xff] %vm3375_vm1, %v3351_v16  ;;  %v3352_v25 = vadd.f32 %v5161_v19, %v3275_v0 }
 0x568   :  { %3401 = vst.msk [vmem:[%s5437_s11 + $0xc8] sm:$0xff] %vm3375_vm1, %v3352_v25 }
 0x56b   :  { %v3277_v45 = vpop.xlane.xlu0 %3276 }
 0x56c   :  { %v3353_v41 = vadd.f32 %v5161_v19, %v3277_v45 }
 0x56d   :  { %v3279_v34 = vpop.xlane.xlu1 %3278 }
 0x56e   :  { %3402 = vst.msk [vmem:[%s5437_s11 + $0xd0] sm:$0xff] %vm3375_vm1, %v3353_v41  ;;  %v3354_v17 = vadd.f32 %v5161_v19, %v3279_v34 }
 0x570   :  { %3403 = vst.msk [vmem:[%s5437_s11 + $0xd8] sm:$0xff] %vm3375_vm1, %v3354_v17 }
 0x573   :  { %v3281_v39 = vpop.xlane.xlu0 %3280 }
 0x574   :  { %v3355_v52 = vadd.f32 %v5161_v19, %v3281_v39 }
 0x575   :  { %v3283_v57 = vpop.xlane.xlu1 %3282 }
 0x576   :  { %3404 = vst.msk [vmem:[%s5437_s11 + $0xe0] sm:$0xff] %vm3375_vm1, %v3355_v52  ;;  %v3356_v14 = vadd.f32 %v5161_v19, %v3283_v57 }
 0x578   :  { %3405 = vst.msk [vmem:[%s5437_s11 + $0xe8] sm:$0xff] %vm3375_vm1, %v3356_v14 }
 0x57b   :  { %v3285_v42 = vpop.xlane.xlu0 %3284 }
 0x57c   :  { %v3357_v55 = vadd.f32 %v5161_v19, %v3285_v42 }
 0x57d   :  { %v3287_v35 = vpop.xlane.xlu1 %3286 }
 0x57e   :  { %3406 = vst.msk [vmem:[%s5437_s11 + $0xf0] sm:$0xff] %vm3375_vm1, %v3357_v55  ;;  %v3358_v38 = vadd.f32 %v5161_v19, %v3287_v35 }
 0x580   :  { %3407 = vst.msk [vmem:[%s5437_s11 + $0xf8] sm:$0xff] %vm3375_vm1, %v3358_v38 }
 0x583   :  { %v3289_v63 = vpop.xlane.xlu0 %3288 }
 0x584   :  { %v3359_v53 = vadd.f32 %v5161_v19, %v3289_v63 }
 0x585   :  { %v3291_v4 = vpop.xlane.xlu1 %3290 }
 0x586   :  { %3408 = vst.msk [vmem:[%s5437_s11 + $0x100] sm:$0xff] %vm3375_vm1, %v3359_v53  ;;  %v3360_v24 = vadd.f32 %v5161_v19, %v3291_v4 }
 0x588   :  { %3409 = vst.msk [vmem:[%s5437_s11 + $0x108] sm:$0xff] %vm3375_vm1, %v3360_v24 }
 0x58b   :  { %v3293_v44 = vpop.xlane.xlu0 %3292 }
 0x58c   :  { %v3361_v58 = vadd.f32 %v5161_v19, %v3293_v44 }
 0x58d   :  { %v3295_v2 = vpop.xlane.xlu1 %3294 }
 0x58e   :  { %3410 = vst.msk [vmem:[%s5437_s11 + $0x110] sm:$0xff] %vm3375_vm1, %v3361_v58  ;;  %v3362_v59 = vadd.f32 %v5161_v19, %v3295_v2 }
 0x590   :  { %3411 = vst.msk [vmem:[%s5437_s11 + $0x118] sm:$0xff] %vm3375_vm1, %v3362_v59 }
 0x593   :  { %v3297_v48 = vpop.xlane.xlu0 %3296 }
 0x594   :  { %v3363_v18 = vadd.f32 %v5161_v19, %v3297_v48 }
 0x595   :  { %v3299_v11 = vpop.xlane.xlu1 %3298 }
 0x596   :  { %3412 = vst.msk [vmem:[%s5437_s11 + $0x120] sm:$0xff] %vm3375_vm1, %v3363_v18  ;;  %v3364_v27 = vadd.f32 %v5161_v19, %v3299_v11 }
 0x598   :  { %3413 = vst.msk [vmem:[%s5437_s11 + $0x128] sm:$0xff] %vm3375_vm1, %v3364_v27 }
 0x59b   :  { %v3301_v32 = vpop.xlane.xlu0 %3300 }
 0x59c   :  { %v3365_v13 = vadd.f32 %v5161_v19, %v3301_v32 }
 0x59d   :  { %v3303_v36 = vpop.xlane.xlu1 %3302 }
 0x59e   :  { %3414 = vst.msk [vmem:[%s5437_s11 + $0x130] sm:$0xff] %vm3375_vm1, %v3365_v13  ;;  %v3366_v40 = vadd.f32 %v5161_v19, %v3303_v36 }
 0x5a0   :  { %3415 = vst.msk [vmem:[%s5437_s11 + $0x138] sm:$0xff] %vm3375_vm1, %v3366_v40 }
 0x5a3   :  { %v3305_v15 = vpop.xlane.xlu0 %3304 }
 0x5a4   :  { %v3367_v7 = vadd.f32 %v5161_v19, %v3305_v15 }
 0x5a5   :  { %v3307_v31 = vpop.xlane.xlu1 %3306 }
 0x5a6   :  { %3416 = vst.msk [vmem:[%s5437_s11 + $0x140] sm:$0xff] %vm3375_vm1, %v3367_v7  ;;  %v3368_v62 = vadd.f32 %v5161_v19, %v3307_v31 }
 0x5a8   :  { %3417 = vst.msk [vmem:[%s5437_s11 + $0x148] sm:$0xff] %vm3375_vm1, %v3368_v62 }
 0x5ab   :  { %v3309_v6 = vpop.xlane.xlu0 %3308 }
 0x5ac   :  { %v3369_v51 = vadd.f32 %v5161_v19, %v3309_v6 }
 0x5ad   :  { %v3311_v26 = vpop.xlane.xlu1 %3310 }
 0x5ae   :  { %3418 = vst.msk [vmem:[%s5437_s11 + $0x150] sm:$0xff] %vm3375_vm1, %v3369_v51  ;;  %v3370_v1 = vadd.f32 %v5161_v19, %v3311_v26 }
 0x5b0   :  { %3419 = vst.msk [vmem:[%s5437_s11 + $0x158] sm:$0xff] %vm3375_vm1, %v3370_v1 }
 0x5b3   :  { %v3313_v29 = vpop.xlane.xlu0 %3312 }
 0x5b4   :  { %v3371_v61 = vadd.f32 %v5161_v19, %v3313_v29 }
 0x5b5   :  { %v3315_v22 = vpop.xlane.xlu1 %3314 }
 0x5b6   :  { %3420 = vst.msk [vmem:[%s5437_s11 + $0x160] sm:$0xff] %vm3375_vm1, %v3371_v61  ;;  %v3372_v8 = vadd.f32 %v5161_v19, %v3315_v22 }
 0x5b8   :  { %3421 = vst.msk [vmem:[%s5437_s11 + $0x168] sm:$0xff] %vm3375_vm1, %v3372_v8 }
 0x5bb   :  { %v3317_v10 = vpop.xlane.xlu0 %3316 }
 0x5bc   :  { %v3373_v20 = vadd.f32 %v5161_v19, %v3317_v10 }
 0x5bd   :  { %v3319_v23 = vpop.xlane.xlu1 %3318 }
 0x5be   :  { %3422 = vst.msk [vmem:[%s5437_s11 + $0x170] sm:$0xff] %vm3375_vm1, %v3373_v20  ;;  %v3374_v54 = vadd.f32 %v5161_v19, %v3319_v23 }
 0x5c0   :  { %3423 = vst.msk [vmem:[%s5437_s11 + $0x178] sm:$0xff] %vm3375_vm1, %v3374_v54 }
 0x5c1   :  { %3428 = vsyncpa [#allocation4], 1 }
 0x5c2   :  { %3429 = vsyncpa [#allocation6], 1 }

</bundles_post_ra>
